<compile_context>
chip_gen: v7x
topology: tpu7x:2x2x1
jax: 0.10.0
libtpu: 0.0.40
codegen_flags: <defaults>
</compile_context>

<pallas_src>
import functools

import jax
import jax.numpy as jnp
from jax.experimental import pallas as pl
from jax.experimental.pallas import tpu as pltpu

BN_EPS = 1e-5


# --------------------------------------------------------------------------- kernel

def _rrcnn_kernel(x_ref, w1_ref, b1_ref, S_ref, B1_ref, B2_ref,
                  g1_ref, bt1_ref, g2_ref, bt2_ref, red_ref, exp_ref,
                  o_ref, *, R, L, C, t, n_px):
    f32 = jnp.float32
    bf16 = jnp.bfloat16

    red_mat = red_ref[...]          # (L, C) 0/1 : lane -> channel pooling
    exp_mat = exp_ref[...]          # (C, L) 0/1 : channel -> lane broadcast
    inv_n = 1.0 / float(n_px)

    def expand(vc):                 # (1, C) -> (1, L), replicate per channel across w
        v8 = jnp.broadcast_to(vc, (8, C))
        return jnp.dot(v8, exp_mat, preferred_element_type=f32)[0:1, :]

    def conv_bn_relu(y, B_ref, gamma, beta):
        # y: (R, L) f32 activation in row layout.
        yb = y.astype(bf16)
        z = jnp.zeros((R, L), f32)
        for k in range(3):          # dh = k - 1 (row shift inside each image)
            sh = jnp.dot(S_ref[k], yb, preferred_element_type=f32)          # (R, L)
            z = z + jnp.dot(sh.astype(bf16), B_ref[k],
                            preferred_element_type=f32)                     # (R, L)
        # 3x3 conv bias dropped on purpose: train-mode BN subtracts the batch mean
        # immediately, so a per-channel constant cancels exactly.
        zs = jnp.sum(jnp.dot(z, red_mat, preferred_element_type=f32),
                     axis=0, keepdims=True)                                 # (1, C)
        zs2 = jnp.sum(jnp.dot(z * z, red_mat, preferred_element_type=f32),
                      axis=0, keepdims=True)                                # (1, C)
        mean = zs * inv_n
        var = zs2 * inv_n - mean * mean                                     # biased var
        scale = gamma * jax.lax.rsqrt(var + BN_EPS)                         # (1, C)
        shift = beta - mean * scale                                         # (1, C)
        return jnp.maximum(z * expand(scale) + expand(shift), 0.0)

    # ---- Conv_1x1 (bias kept: its output is the residual base everywhere below).
    x0 = jnp.dot(x_ref[...], w1_ref[...], preferred_element_type=f32) + b1_ref[...]

    # ---- Recurrent_block, mirroring the PyTorch control flow exactly.
    def recurrent(base, B_ref, g_ref, bt_ref):
        gamma, beta = g_ref[...], bt_ref[...]
        y = None
        for i in range(t):
            if i == 0:
                y = conv_bn_relu(base, B_ref, gamma, beta)
            y = conv_bn_relu(base + y, B_ref, gamma, beta)
        return y

    x1 = recurrent(x0, B1_ref, g1_ref, bt1_ref)
    x1 = recurrent(x1, B2_ref, g2_ref, bt2_ref)

    o_ref[...] = x0 + x1            # final residual; lane-dense (R, L) store


# --------------------------------------------------------------------------- wrapper

def _full_spec(shape):
    nd = len(shape)
    return pl.BlockSpec(shape, lambda i, _nd=nd: (0,) * _nd)


def rrcnn_block(x_nchw, params, t=2):
    """RRCNN_block.forward: x = Conv1x1(x); x1 = RCNN(x); return x + x1 (NCHW in/out)."""
    N, Cin, H, W = x_nchw.shape
    Cout = params["w1x1"].shape[1]
    R, L = N * H, W * Cout
    f32, bf16 = jnp.float32, jnp.bfloat16

    # ---- host-side packing into the lane-dense (N*H, W*C) row layout -----------------
    x_rows = jnp.transpose(x_nchw, (0, 2, 3, 1)).reshape(R, W * Cin).astype(bf16)

    # 1x1 conv as a block-diagonal (W*Cin, W*Cout) matmul + lane-tiled bias.
    w1_big = jnp.einsum("io,wv->wivo", params["w1x1"],
                        jnp.eye(W, dtype=f32)).reshape(W * Cin, W * Cout).astype(bf16)
    b1_row = jnp.tile(params["b1x1"], W)[None, :].astype(f32)

    # Row-shift (dh) 0/1 operators acting within each image (handles H zero padding).
    r = jnp.arange(R)
    n_idx, h_idx = r // H, r % H
    S = jnp.stack([((n_idx[:, None] == n_idx[None, :]) &
                    (h_idx[None, :] == h_idx[:, None] + dh)).astype(f32)
                   for dh in (-1, 0, 1)]).astype(bf16)                      # (3, R, R)

    # Column-shift (dw) + channel-mix operators (block tri-diagonal, handles W zero pad).
    w_ids = jnp.arange(W)

    def make_B(wc):                             # wc: (3, 3, Cin, Cout) = (kh, kw, ci, co)
        mats = []
        for kh in range(3):
            B = jnp.zeros((W, Cout, W, Cout), f32)
            for kw in range(3):
                dw = kw - 1
                m = (w_ids[:, None] == w_ids[None, :] + dw).astype(f32)     # [w_src, w_dst]
                B = B + m[:, None, :, None] * wc[kh, kw][None, :, None, :]
            mats.append(B.reshape(L, L))
        return jnp.stack(mats).astype(bf16)                                 # (3, L, L)

    B1, B2 = make_B(params["rb1"][0]), make_B(params["rb2"][0])

    # Channel <-> lane 0/1 reduce / expand matrices for the in-kernel BatchNorm stats.
    lane_c = jnp.arange(L) % Cout
    red = (lane_c[:, None] == jnp.arange(Cout)[None, :]).astype(f32)        # (L, C)
    exp = red.T                                                             # (C, L)

    g1 = params["rb1"][2][None, :].astype(f32)
    bt1 = params["rb1"][3][None, :].astype(f32)
    g2 = params["rb2"][2][None, :].astype(f32)
    bt2 = params["rb2"][3][None, :].astype(f32)
    # NOTE: params["rb*"][1] (3x3 conv biases) are intentionally not passed; train-mode
    # BatchNorm cancels them exactly (see kernel comment).

    operands = (x_rows, w1_big, b1_row, S, B1, B2, g1, bt1, g2, bt2, red, exp)
    kern = functools.partial(_rrcnn_kernel, R=R, L=L, C=Cout, t=t, n_px=N * H * W)

    out_rows = pl.pallas_call(
        kern,
        out_shape=jax.ShapeDtypeStruct((R, L), f32),
        grid=(1,),
        in_specs=[_full_spec(a.shape) for a in operands],
        out_specs=_full_spec((R, L)),
        compiler_params=pltpu.CompilerParams(dimension_semantics=("arbitrary",)),
    )(*operands)

    out = out_rows.reshape(N, H, W, Cout)
    return jnp.transpose(out, (0, 3, 1, 2))                                 # NHWC -> NCHW


# --------------------------------------------------------------------------- reference

def _ref_forward(x_nchw, params, t=2):
    """Pure-JAX reference of RRCNN_block (BN in training mode, biased var, eps=1e-5)."""
    x = jnp.transpose(x_nchw, (0, 2, 3, 1))
    x = jnp.einsum("nhwc,cd->nhwd", x, params["w1x1"]) + params["b1x1"]

    def conv_bn_relu(y, w, b, g, bta):
        z = jax.lax.conv_general_dilated(
            y, w, (1, 1), "SAME", dimension_numbers=("NHWC", "HWIO", "NHWC"))
        z = z + b[None, None, None, :]
        mean = jnp.mean(z, axis=(0, 1, 2), keepdims=True)
        var = jnp.mean(jnp.square(z - mean), axis=(0, 1, 2), keepdims=True)
        zn = (z - mean) * jax.lax.rsqrt(var + BN_EPS) * g[None, None, None, :] \
             + bta[None, None, None, :]
        return jnp.maximum(zn, 0.0)

    def recurrent(xb, p):
        w, b, g, bta = p
        x1 = None
        for i in range(t):
            if i == 0:
                x1 = conv_bn_relu(xb, w, b, g, bta)
            x1 = conv_bn_relu(xb + x1, w, b, g, bta)
        return x1

    x1 = recurrent(x, params["rb1"])
    x1 = recurrent(x1, params["rb2"])
    return jnp.transpose(x + x1, (0, 3, 1, 2))


# --------------------------------------------------------------------------- main

def _init_params(key, ch_in, ch_out):
    ks = jax.random.split(key, 11)

    def rb_params(k0, k1, k2, k3):
        return (
            0.1 * jax.random.normal(k0, (3, 3, ch_out, ch_out), jnp.float32),  # conv w (HWIO)
            0.1 * jax.random.normal(k1, (ch_out,), jnp.float32),               # conv b
            1.0 + 0.1 * jax.random.normal(k2, (ch_out,), jnp.float32),         # bn gamma
            0.1 * jax.random.normal(k3, (ch_out,), jnp.float32),               # bn beta
        )

    return {
        "w1x1": 0.1 * jax.random.normal(ks[0], (ch_in, ch_out), jnp.float32),
        "b1x1": 0.1 * jax.random.normal(ks[1], (ch_out,), jnp.float32),
        "rb1": rb_params(ks[2], ks[3], ks[4], ks[5]),
        "rb2": rb_params(ks[6], ks[7], ks[8], ks[9]),
    }


if __name__ == "__main__":
    key = jax.random.PRNGKey(0)
    k_x, k_p = jax.random.split(key)

    ch_in, ch_out, t = 4, 8, 2
    N, H, W = 2, 16, 16

    x = jax.random.normal(k_x, (N, ch_in, H, W), jnp.float32)   # NCHW, like PyTorch
    params = _init_params(k_p, ch_in, ch_out)

    fwd = jax.jit(functools.partial(rrcnn_block, t=t))
    out = fwd(x, params)
    jax.block_until_ready(out)

    assert out.shape == (N, ch_out, H, W), out.shape
    assert out.dtype == jnp.float32

    # sanity check against the pure-JAX reference (loose tolerance: bf16 matmul operands)
    ref = jax.jit(functools.partial(_ref_forward, t=t))(x, params)
    err = float(jnp.max(jnp.abs(out - ref)))
    assert err < 0.5, f"max abs err vs reference: {err}"

    print("KERNEL_OK")
</pallas_src>

<mosaic_0001>
module attributes {stable_mosaic.version = 11 : i64} {
  func.func @_rrcnn_kernel(%arg0: i32, %arg1: memref<32x64xbf16, #tpu.memory_space<vmem>>, %arg2: memref<64x128xbf16, #tpu.memory_space<vmem>>, %arg3: memref<1x128xf32, #tpu.memory_space<vmem>>, %arg4: memref<3x32x32xbf16, #tpu.memory_space<vmem>>, %arg5: memref<3x128x128xbf16, #tpu.memory_space<vmem>>, %arg6: memref<3x128x128xbf16, #tpu.memory_space<vmem>>, %arg7: memref<1x8xf32, #tpu.memory_space<vmem>>, %arg8: memref<1x8xf32, #tpu.memory_space<vmem>>, %arg9: memref<1x8xf32, #tpu.memory_space<vmem>>, %arg10: memref<1x8xf32, #tpu.memory_space<vmem>>, %arg11: memref<128x8xf32, #tpu.memory_space<vmem>>, %arg12: memref<8x128xf32, #tpu.memory_space<vmem>>, %arg13: memref<32x128xf32, #tpu.memory_space<vmem>>) attributes {dimension_semantics = [#tpu.dimension_semantics<arbitrary>], iteration_bounds = array<i64: 1>, scalar_prefetch = 0 : i64, scratch_operands = 0 : i64, tpu.core_type = #tpu.core_type<tc>, window_params = [{pipeline_mode = #tpu.pipeline_mode<synchronous>, transform_indices = @transform_0, window_bounds = array<i64: 32, 64>}, {pipeline_mode = #tpu.pipeline_mode<synchronous>, transform_indices = @transform_1, window_bounds = array<i64: 64, 128>}, {pipeline_mode = #tpu.pipeline_mode<synchronous>, transform_indices = @transform_2, window_bounds = array<i64: 1, 128>}, {pipeline_mode = #tpu.pipeline_mode<synchronous>, transform_indices = @transform_3, window_bounds = array<i64: 3, 32, 32>}, {pipeline_mode = #tpu.pipeline_mode<synchronous>, transform_indices = @transform_4, window_bounds = array<i64: 3, 128, 128>}, {pipeline_mode = #tpu.pipeline_mode<synchronous>, transform_indices = @transform_5, window_bounds = array<i64: 3, 128, 128>}, {pipeline_mode = #tpu.pipeline_mode<synchronous>, transform_indices = @transform_6, window_bounds = array<i64: 1, 8>}, {pipeline_mode = #tpu.pipeline_mode<synchronous>, transform_indices = @transform_7, window_bounds = array<i64: 1, 8>}, {pipeline_mode = #tpu.pipeline_mode<synchronous>, transform_indices = @transform_8, window_bounds = array<i64: 1, 8>}, {pipeline_mode = #tpu.pipeline_mode<synchronous>, transform_indices = @transform_9, window_bounds = array<i64: 1, 8>}, {pipeline_mode = #tpu.pipeline_mode<synchronous>, transform_indices = @transform_10, window_bounds = array<i64: 128, 8>}, {pipeline_mode = #tpu.pipeline_mode<synchronous>, transform_indices = @transform_11, window_bounds = array<i64: 8, 128>}, {pipeline_mode = #tpu.pipeline_mode<synchronous>, transform_indices = @transform_12, window_bounds = array<i64: 32, 128>}]} {
    %c0 = arith.constant 0 : index
    %c0_0 = arith.constant 0 : index
    %0 = vector.load %arg11[%c0, %c0_0] : memref<128x8xf32, #tpu.memory_space<vmem>>, vector<128x8xf32>
    %c0_1 = arith.constant 0 : index
    %c0_2 = arith.constant 0 : index
    %1 = vector.load %arg12[%c0_1, %c0_2] : memref<8x128xf32, #tpu.memory_space<vmem>>, vector<8x128xf32>
    %c0_3 = arith.constant 0 : index
    %c0_4 = arith.constant 0 : index
    %2 = vector.load %arg1[%c0_3, %c0_4] : memref<32x64xbf16, #tpu.memory_space<vmem>>, vector<32x64xbf16>
    %c0_5 = arith.constant 0 : index
    %c0_6 = arith.constant 0 : index
    %3 = vector.load %arg2[%c0_5, %c0_6] : memref<64x128xbf16, #tpu.memory_space<vmem>>, vector<64x128xbf16>
    %cst = arith.constant dense<0.000000e+00> : vector<32x128xf32>
    %4 = tpu.matmul %2, %3, %cst {dimension_numbers = #tpu.dot_dimension_numbers<[1], [0], [0], [1], [0, 0, 1, 1], [], []>} : vector<32x64xbf16>, vector<64x128xbf16>, vector<32x128xf32> -> vector<32x128xf32>
    %c0_7 = arith.constant 0 : index
    %c0_8 = arith.constant 0 : index
    %5 = vector.load %arg3[%c0_7, %c0_8] : memref<1x128xf32, #tpu.memory_space<vmem>>, vector<1x128xf32>
    %6 = vector.broadcast %5 : vector<1x128xf32> to vector<32x128xf32>
    %7 = arith.addf %4, %6 : vector<32x128xf32>
    %c0_9 = arith.constant 0 : index
    %c0_10 = arith.constant 0 : index
    %8 = vector.load %arg7[%c0_9, %c0_10] : memref<1x8xf32, #tpu.memory_space<vmem>>, vector<1x8xf32>
    %c0_11 = arith.constant 0 : index
    %c0_12 = arith.constant 0 : index
    %9 = vector.load %arg8[%c0_11, %c0_12] : memref<1x8xf32, #tpu.memory_space<vmem>>, vector<1x8xf32>
    %10 = arith.truncf %7 : vector<32x128xf32> to vector<32x128xbf16>
    %cst_13 = arith.constant 0.000000e+00 : f32
    %11 = vector.broadcast %cst_13 : f32 to vector<32x128xf32>
    %c0_14 = arith.constant 0 : index
    %c0_15 = arith.constant 0 : index
    %c0_16 = arith.constant 0 : index
    %12 = vector.load %arg4[%c0_14, %c0_15, %c0_16] : memref<3x32x32xbf16, #tpu.memory_space<vmem>>, vector<1x32x32xbf16>
    %13 = vector.shape_cast %12 : vector<1x32x32xbf16> to vector<32x32xbf16>
    %cst_17 = arith.constant dense<0.000000e+00> : vector<32x128xf32>
    %14 = tpu.matmul %13, %10, %cst_17 {dimension_numbers = #tpu.dot_dimension_numbers<[1], [0], [0], [1], [0, 0, 1, 1], [], []>} : vector<32x32xbf16>, vector<32x128xbf16>, vector<32x128xf32> -> vector<32x128xf32>
    %15 = arith.truncf %14 : vector<32x128xf32> to vector<32x128xbf16>
    %c0_18 = arith.constant 0 : index
    %c0_19 = arith.constant 0 : index
    %c0_20 = arith.constant 0 : index
    %16 = vector.load %arg5[%c0_18, %c0_19, %c0_20] : memref<3x128x128xbf16, #tpu.memory_space<vmem>>, vector<1x128x128xbf16>
    %17 = vector.shape_cast %16 : vector<1x128x128xbf16> to vector<128x128xbf16>
    %cst_21 = arith.constant dense<0.000000e+00> : vector<32x128xf32>
    %18 = tpu.matmul %15, %17, %cst_21 {dimension_numbers = #tpu.dot_dimension_numbers<[1], [0], [0], [1], [0, 0, 1, 1], [], []>} : vector<32x128xbf16>, vector<128x128xbf16>, vector<32x128xf32> -> vector<32x128xf32>
    %19 = arith.addf %11, %18 : vector<32x128xf32>
    %c1 = arith.constant 1 : index
    %c0_22 = arith.constant 0 : index
    %c0_23 = arith.constant 0 : index
    %20 = vector.load %arg4[%c1, %c0_22, %c0_23] : memref<3x32x32xbf16, #tpu.memory_space<vmem>>, vector<1x32x32xbf16>
    %21 = vector.shape_cast %20 : vector<1x32x32xbf16> to vector<32x32xbf16>
    %cst_24 = arith.constant dense<0.000000e+00> : vector<32x128xf32>
    %22 = tpu.matmul %21, %10, %cst_24 {dimension_numbers = #tpu.dot_dimension_numbers<[1], [0], [0], [1], [0, 0, 1, 1], [], []>} : vector<32x32xbf16>, vector<32x128xbf16>, vector<32x128xf32> -> vector<32x128xf32>
    %23 = arith.truncf %22 : vector<32x128xf32> to vector<32x128xbf16>
    %c1_25 = arith.constant 1 : index
    %c0_26 = arith.constant 0 : index
    %c0_27 = arith.constant 0 : index
    %24 = vector.load %arg5[%c1_25, %c0_26, %c0_27] : memref<3x128x128xbf16, #tpu.memory_space<vmem>>, vector<1x128x128xbf16>
    %25 = vector.shape_cast %24 : vector<1x128x128xbf16> to vector<128x128xbf16>
    %cst_28 = arith.constant dense<0.000000e+00> : vector<32x128xf32>
    %26 = tpu.matmul %23, %25, %cst_28 {dimension_numbers = #tpu.dot_dimension_numbers<[1], [0], [0], [1], [0, 0, 1, 1], [], []>} : vector<32x128xbf16>, vector<128x128xbf16>, vector<32x128xf32> -> vector<32x128xf32>
    %27 = arith.addf %19, %26 : vector<32x128xf32>
    %c2 = arith.constant 2 : index
    %c0_29 = arith.constant 0 : index
    %c0_30 = arith.constant 0 : index
    %28 = vector.load %arg4[%c2, %c0_29, %c0_30] : memref<3x32x32xbf16, #tpu.memory_space<vmem>>, vector<1x32x32xbf16>
    %29 = vector.shape_cast %28 : vector<1x32x32xbf16> to vector<32x32xbf16>
    %cst_31 = arith.constant dense<0.000000e+00> : vector<32x128xf32>
    %30 = tpu.matmul %29, %10, %cst_31 {dimension_numbers = #tpu.dot_dimension_numbers<[1], [0], [0], [1], [0, 0, 1, 1], [], []>} : vector<32x32xbf16>, vector<32x128xbf16>, vector<32x128xf32> -> vector<32x128xf32>
    %31 = arith.truncf %30 : vector<32x128xf32> to vector<32x128xbf16>
    %c2_32 = arith.constant 2 : index
    %c0_33 = arith.constant 0 : index
    %c0_34 = arith.constant 0 : index
    %32 = vector.load %arg5[%c2_32, %c0_33, %c0_34] : memref<3x128x128xbf16, #tpu.memory_space<vmem>>, vector<1x128x128xbf16>
    %33 = vector.shape_cast %32 : vector<1x128x128xbf16> to vector<128x128xbf16>
    %cst_35 = arith.constant dense<0.000000e+00> : vector<32x128xf32>
    %34 = tpu.matmul %31, %33, %cst_35 {dimension_numbers = #tpu.dot_dimension_numbers<[1], [0], [0], [1], [0, 0, 1, 1], [], []>} : vector<32x128xbf16>, vector<128x128xbf16>, vector<32x128xf32> -> vector<32x128xf32>
    %35 = arith.addf %27, %34 : vector<32x128xf32>
    %cst_36 = arith.constant dense<0.000000e+00> : vector<32x8xf32>
    %36 = tpu.matmul %35, %0, %cst_36 {dimension_numbers = #tpu.dot_dimension_numbers<[1], [0], [0], [1], [0, 0, 1, 1], [], []>} : vector<32x128xf32>, vector<128x8xf32>, vector<32x8xf32> -> vector<32x8xf32>
    %cst_37 = arith.constant dense<0.000000e+00> : vector<8xf32>
    %37 = vector.multi_reduction <add>, %36, %cst_37 [0] : vector<32x8xf32> to vector<8xf32>
    %38 = vector.shape_cast %37 : vector<8xf32> to vector<1x8xf32>
    %39 = arith.mulf %35, %35 : vector<32x128xf32>
    %cst_38 = arith.constant dense<0.000000e+00> : vector<32x8xf32>
    %40 = tpu.matmul %39, %0, %cst_38 {dimension_numbers = #tpu.dot_dimension_numbers<[1], [0], [0], [1], [0, 0, 1, 1], [], []>} : vector<32x128xf32>, vector<128x8xf32>, vector<32x8xf32> -> vector<32x8xf32>
    %cst_39 = arith.constant dense<0.000000e+00> : vector<8xf32>
    %41 = vector.multi_reduction <add>, %40, %cst_39 [0] : vector<32x8xf32> to vector<8xf32>
    %42 = vector.shape_cast %41 : vector<8xf32> to vector<1x8xf32>
    %cst_40 = arith.constant 0.001953125 : f32
    %43 = vector.broadcast %cst_40 : f32 to vector<1x8xf32>
    %44 = arith.mulf %38, %43 : vector<1x8xf32>
    %cst_41 = arith.constant 0.001953125 : f32
    %45 = vector.broadcast %cst_41 : f32 to vector<1x8xf32>
    %46 = arith.mulf %42, %45 : vector<1x8xf32>
    %47 = arith.mulf %44, %44 : vector<1x8xf32>
    %48 = arith.subf %46, %47 : vector<1x8xf32>
    %cst_42 = arith.constant 9.99999974E-6 : f32
    %49 = vector.broadcast %cst_42 : f32 to vector<1x8xf32>
    %50 = arith.addf %48, %49 : vector<1x8xf32>
    %51 = math.rsqrt %50 : vector<1x8xf32>
    %52 = arith.mulf %8, %51 : vector<1x8xf32>
    %53 = arith.mulf %44, %52 : vector<1x8xf32>
    %54 = arith.subf %9, %53 : vector<1x8xf32>
    %55 = vector.shape_cast %52 : vector<1x8xf32> to vector<1x8xf32>
    %56 = vector.broadcast %55 : vector<1x8xf32> to vector<8x8xf32>
    %cst_43 = arith.constant dense<0.000000e+00> : vector<8x128xf32>
    %57 = tpu.matmul %56, %1, %cst_43 {dimension_numbers = #tpu.dot_dimension_numbers<[1], [0], [0], [1], [0, 0, 1, 1], [], []>} : vector<8x8xf32>, vector<8x128xf32>, vector<8x128xf32> -> vector<8x128xf32>
    %58 = vector.extract_strided_slice %57 {offsets = [0, 0], sizes = [1, 128], strides = [1, 1]} : vector<8x128xf32> to vector<1x128xf32>
    %59 = vector.broadcast %58 : vector<1x128xf32> to vector<32x128xf32>
    %60 = arith.mulf %35, %59 : vector<32x128xf32>
    %61 = vector.shape_cast %54 : vector<1x8xf32> to vector<1x8xf32>
    %62 = vector.broadcast %61 : vector<1x8xf32> to vector<8x8xf32>
    %cst_44 = arith.constant dense<0.000000e+00> : vector<8x128xf32>
    %63 = tpu.matmul %62, %1, %cst_44 {dimension_numbers = #tpu.dot_dimension_numbers<[1], [0], [0], [1], [0, 0, 1, 1], [], []>} : vector<8x8xf32>, vector<8x128xf32>, vector<8x128xf32> -> vector<8x128xf32>
    %64 = vector.extract_strided_slice %63 {offsets = [0, 0], sizes = [1, 128], strides = [1, 1]} : vector<8x128xf32> to vector<1x128xf32>
    %65 = vector.broadcast %64 : vector<1x128xf32> to vector<32x128xf32>
    %66 = arith.addf %60, %65 : vector<32x128xf32>
    %cst_45 = arith.constant 0.000000e+00 : f32
    %67 = vector.broadcast %cst_45 : f32 to vector<32x128xf32>
    %68 = arith.maximumf %66, %67 : vector<32x128xf32>
    %69 = arith.addf %7, %68 : vector<32x128xf32>
    %70 = arith.truncf %69 : vector<32x128xf32> to vector<32x128xbf16>
    %cst_46 = arith.constant 0.000000e+00 : f32
    %71 = vector.broadcast %cst_46 : f32 to vector<32x128xf32>
    %c0_47 = arith.constant 0 : index
    %c0_48 = arith.constant 0 : index
    %c0_49 = arith.constant 0 : index
    %72 = vector.load %arg4[%c0_47, %c0_48, %c0_49] : memref<3x32x32xbf16, #tpu.memory_space<vmem>>, vector<1x32x32xbf16>
    %73 = vector.shape_cast %72 : vector<1x32x32xbf16> to vector<32x32xbf16>
    %cst_50 = arith.constant dense<0.000000e+00> : vector<32x128xf32>
    %74 = tpu.matmul %73, %70, %cst_50 {dimension_numbers = #tpu.dot_dimension_numbers<[1], [0], [0], [1], [0, 0, 1, 1], [], []>} : vector<32x32xbf16>, vector<32x128xbf16>, vector<32x128xf32> -> vector<32x128xf32>
    %75 = arith.truncf %74 : vector<32x128xf32> to vector<32x128xbf16>
    %c0_51 = arith.constant 0 : index
    %c0_52 = arith.constant 0 : index
    %c0_53 = arith.constant 0 : index
    %76 = vector.load %arg5[%c0_51, %c0_52, %c0_53] : memref<3x128x128xbf16, #tpu.memory_space<vmem>>, vector<1x128x128xbf16>
    %77 = vector.shape_cast %76 : vector<1x128x128xbf16> to vector<128x128xbf16>
    %cst_54 = arith.constant dense<0.000000e+00> : vector<32x128xf32>
    %78 = tpu.matmul %75, %77, %cst_54 {dimension_numbers = #tpu.dot_dimension_numbers<[1], [0], [0], [1], [0, 0, 1, 1], [], []>} : vector<32x128xbf16>, vector<128x128xbf16>, vector<32x128xf32> -> vector<32x128xf32>
    %79 = arith.addf %71, %78 : vector<32x128xf32>
    %c1_55 = arith.constant 1 : index
    %c0_56 = arith.constant 0 : index
    %c0_57 = arith.constant 0 : index
    %80 = vector.load %arg4[%c1_55, %c0_56, %c0_57] : memref<3x32x32xbf16, #tpu.memory_space<vmem>>, vector<1x32x32xbf16>
    %81 = vector.shape_cast %80 : vector<1x32x32xbf16> to vector<32x32xbf16>
    %cst_58 = arith.constant dense<0.000000e+00> : vector<32x128xf32>
    %82 = tpu.matmul %81, %70, %cst_58 {dimension_numbers = #tpu.dot_dimension_numbers<[1], [0], [0], [1], [0, 0, 1, 1], [], []>} : vector<32x32xbf16>, vector<32x128xbf16>, vector<32x128xf32> -> vector<32x128xf32>
    %83 = arith.truncf %82 : vector<32x128xf32> to vector<32x128xbf16>
    %c1_59 = arith.constant 1 : index
    %c0_60 = arith.constant 0 : index
    %c0_61 = arith.constant 0 : index
    %84 = vector.load %arg5[%c1_59, %c0_60, %c0_61] : memref<3x128x128xbf16, #tpu.memory_space<vmem>>, vector<1x128x128xbf16>
    %85 = vector.shape_cast %84 : vector<1x128x128xbf16> to vector<128x128xbf16>
    %cst_62 = arith.constant dense<0.000000e+00> : vector<32x128xf32>
    %86 = tpu.matmul %83, %85, %cst_62 {dimension_numbers = #tpu.dot_dimension_numbers<[1], [0], [0], [1], [0, 0, 1, 1], [], []>} : vector<32x128xbf16>, vector<128x128xbf16>, vector<32x128xf32> -> vector<32x128xf32>
    %87 = arith.addf %79, %86 : vector<32x128xf32>
    %c2_63 = arith.constant 2 : index
    %c0_64 = arith.constant 0 : index
    %c0_65 = arith.constant 0 : index
    %88 = vector.load %arg4[%c2_63, %c0_64, %c0_65] : memref<3x32x32xbf16, #tpu.memory_space<vmem>>, vector<1x32x32xbf16>
    %89 = vector.shape_cast %88 : vector<1x32x32xbf16> to vector<32x32xbf16>
    %cst_66 = arith.constant dense<0.000000e+00> : vector<32x128xf32>
    %90 = tpu.matmul %89, %70, %cst_66 {dimension_numbers = #tpu.dot_dimension_numbers<[1], [0], [0], [1], [0, 0, 1, 1], [], []>} : vector<32x32xbf16>, vector<32x128xbf16>, vector<32x128xf32> -> vector<32x128xf32>
    %91 = arith.truncf %90 : vector<32x128xf32> to vector<32x128xbf16>
    %c2_67 = arith.constant 2 : index
    %c0_68 = arith.constant 0 : index
    %c0_69 = arith.constant 0 : index
    %92 = vector.load %arg5[%c2_67, %c0_68, %c0_69] : memref<3x128x128xbf16, #tpu.memory_space<vmem>>, vector<1x128x128xbf16>
    %93 = vector.shape_cast %92 : vector<1x128x128xbf16> to vector<128x128xbf16>
    %cst_70 = arith.constant dense<0.000000e+00> : vector<32x128xf32>
    %94 = tpu.matmul %91, %93, %cst_70 {dimension_numbers = #tpu.dot_dimension_numbers<[1], [0], [0], [1], [0, 0, 1, 1], [], []>} : vector<32x128xbf16>, vector<128x128xbf16>, vector<32x128xf32> -> vector<32x128xf32>
    %95 = arith.addf %87, %94 : vector<32x128xf32>
    %cst_71 = arith.constant dense<0.000000e+00> : vector<32x8xf32>
    %96 = tpu.matmul %95, %0, %cst_71 {dimension_numbers = #tpu.dot_dimension_numbers<[1], [0], [0], [1], [0, 0, 1, 1], [], []>} : vector<32x128xf32>, vector<128x8xf32>, vector<32x8xf32> -> vector<32x8xf32>
    %cst_72 = arith.constant dense<0.000000e+00> : vector<8xf32>
    %97 = vector.multi_reduction <add>, %96, %cst_72 [0] : vector<32x8xf32> to vector<8xf32>
    %98 = vector.shape_cast %97 : vector<8xf32> to vector<1x8xf32>
    %99 = arith.mulf %95, %95 : vector<32x128xf32>
    %cst_73 = arith.constant dense<0.000000e+00> : vector<32x8xf32>
    %100 = tpu.matmul %99, %0, %cst_73 {dimension_numbers = #tpu.dot_dimension_numbers<[1], [0], [0], [1], [0, 0, 1, 1], [], []>} : vector<32x128xf32>, vector<128x8xf32>, vector<32x8xf32> -> vector<32x8xf32>
    %cst_74 = arith.constant dense<0.000000e+00> : vector<8xf32>
    %101 = vector.multi_reduction <add>, %100, %cst_74 [0] : vector<32x8xf32> to vector<8xf32>
    %102 = vector.shape_cast %101 : vector<8xf32> to vector<1x8xf32>
    %cst_75 = arith.constant 0.001953125 : f32
    %103 = vector.broadcast %cst_75 : f32 to vector<1x8xf32>
    %104 = arith.mulf %98, %103 : vector<1x8xf32>
    %cst_76 = arith.constant 0.001953125 : f32
    %105 = vector.broadcast %cst_76 : f32 to vector<1x8xf32>
    %106 = arith.mulf %102, %105 : vector<1x8xf32>
    %107 = arith.mulf %104, %104 : vector<1x8xf32>
    %108 = arith.subf %106, %107 : vector<1x8xf32>
    %cst_77 = arith.constant 9.99999974E-6 : f32
    %109 = vector.broadcast %cst_77 : f32 to vector<1x8xf32>
    %110 = arith.addf %108, %109 : vector<1x8xf32>
    %111 = math.rsqrt %110 : vector<1x8xf32>
    %112 = arith.mulf %8, %111 : vector<1x8xf32>
    %113 = arith.mulf %104, %112 : vector<1x8xf32>
    %114 = arith.subf %9, %113 : vector<1x8xf32>
    %115 = vector.shape_cast %112 : vector<1x8xf32> to vector<1x8xf32>
    %116 = vector.broadcast %115 : vector<1x8xf32> to vector<8x8xf32>
    %cst_78 = arith.constant dense<0.000000e+00> : vector<8x128xf32>
    %117 = tpu.matmul %116, %1, %cst_78 {dimension_numbers = #tpu.dot_dimension_numbers<[1], [0], [0], [1], [0, 0, 1, 1], [], []>} : vector<8x8xf32>, vector<8x128xf32>, vector<8x128xf32> -> vector<8x128xf32>
    %118 = vector.extract_strided_slice %117 {offsets = [0, 0], sizes = [1, 128], strides = [1, 1]} : vector<8x128xf32> to vector<1x128xf32>
    %119 = vector.broadcast %118 : vector<1x128xf32> to vector<32x128xf32>
    %120 = arith.mulf %95, %119 : vector<32x128xf32>
    %121 = vector.shape_cast %114 : vector<1x8xf32> to vector<1x8xf32>
    %122 = vector.broadcast %121 : vector<1x8xf32> to vector<8x8xf32>
    %cst_79 = arith.constant dense<0.000000e+00> : vector<8x128xf32>
    %123 = tpu.matmul %122, %1, %cst_79 {dimension_numbers = #tpu.dot_dimension_numbers<[1], [0], [0], [1], [0, 0, 1, 1], [], []>} : vector<8x8xf32>, vector<8x128xf32>, vector<8x128xf32> -> vector<8x128xf32>
    %124 = vector.extract_strided_slice %123 {offsets = [0, 0], sizes = [1, 128], strides = [1, 1]} : vector<8x128xf32> to vector<1x128xf32>
    %125 = vector.broadcast %124 : vector<1x128xf32> to vector<32x128xf32>
    %126 = arith.addf %120, %125 : vector<32x128xf32>
    %cst_80 = arith.constant 0.000000e+00 : f32
    %127 = vector.broadcast %cst_80 : f32 to vector<32x128xf32>
    %128 = arith.maximumf %126, %127 : vector<32x128xf32>
    %129 = arith.addf %7, %128 : vector<32x128xf32>
    %130 = arith.truncf %129 : vector<32x128xf32> to vector<32x128xbf16>
    %cst_81 = arith.constant 0.000000e+00 : f32
    %131 = vector.broadcast %cst_81 : f32 to vector<32x128xf32>
    %c0_82 = arith.constant 0 : index
    %c0_83 = arith.constant 0 : index
    %c0_84 = arith.constant 0 : index
    %132 = vector.load %arg4[%c0_82, %c0_83, %c0_84] : memref<3x32x32xbf16, #tpu.memory_space<vmem>>, vector<1x32x32xbf16>
    %133 = vector.shape_cast %132 : vector<1x32x32xbf16> to vector<32x32xbf16>
    %cst_85 = arith.constant dense<0.000000e+00> : vector<32x128xf32>
    %134 = tpu.matmul %133, %130, %cst_85 {dimension_numbers = #tpu.dot_dimension_numbers<[1], [0], [0], [1], [0, 0, 1, 1], [], []>} : vector<32x32xbf16>, vector<32x128xbf16>, vector<32x128xf32> -> vector<32x128xf32>
    %135 = arith.truncf %134 : vector<32x128xf32> to vector<32x128xbf16>
    %c0_86 = arith.constant 0 : index
    %c0_87 = arith.constant 0 : index
    %c0_88 = arith.constant 0 : index
    %136 = vector.load %arg5[%c0_86, %c0_87, %c0_88] : memref<3x128x128xbf16, #tpu.memory_space<vmem>>, vector<1x128x128xbf16>
    %137 = vector.shape_cast %136 : vector<1x128x128xbf16> to vector<128x128xbf16>
    %cst_89 = arith.constant dense<0.000000e+00> : vector<32x128xf32>
    %138 = tpu.matmul %135, %137, %cst_89 {dimension_numbers = #tpu.dot_dimension_numbers<[1], [0], [0], [1], [0, 0, 1, 1], [], []>} : vector<32x128xbf16>, vector<128x128xbf16>, vector<32x128xf32> -> vector<32x128xf32>
    %139 = arith.addf %131, %138 : vector<32x128xf32>
    %c1_90 = arith.constant 1 : index
    %c0_91 = arith.constant 0 : index
    %c0_92 = arith.constant 0 : index
    %140 = vector.load %arg4[%c1_90, %c0_91, %c0_92] : memref<3x32x32xbf16, #tpu.memory_space<vmem>>, vector<1x32x32xbf16>
    %141 = vector.shape_cast %140 : vector<1x32x32xbf16> to vector<32x32xbf16>
    %cst_93 = arith.constant dense<0.000000e+00> : vector<32x128xf32>
    %142 = tpu.matmul %141, %130, %cst_93 {dimension_numbers = #tpu.dot_dimension_numbers<[1], [0], [0], [1], [0, 0, 1, 1], [], []>} : vector<32x32xbf16>, vector<32x128xbf16>, vector<32x128xf32> -> vector<32x128xf32>
    %143 = arith.truncf %142 : vector<32x128xf32> to vector<32x128xbf16>
    %c1_94 = arith.constant 1 : index
    %c0_95 = arith.constant 0 : index
    %c0_96 = arith.constant 0 : index
    %144 = vector.load %arg5[%c1_94, %c0_95, %c0_96] : memref<3x128x128xbf16, #tpu.memory_space<vmem>>, vector<1x128x128xbf16>
    %145 = vector.shape_cast %144 : vector<1x128x128xbf16> to vector<128x128xbf16>
    %cst_97 = arith.constant dense<0.000000e+00> : vector<32x128xf32>
    %146 = tpu.matmul %143, %145, %cst_97 {dimension_numbers = #tpu.dot_dimension_numbers<[1], [0], [0], [1], [0, 0, 1, 1], [], []>} : vector<32x128xbf16>, vector<128x128xbf16>, vector<32x128xf32> -> vector<32x128xf32>
    %147 = arith.addf %139, %146 : vector<32x128xf32>
    %c2_98 = arith.constant 2 : index
    %c0_99 = arith.constant 0 : index
    %c0_100 = arith.constant 0 : index
    %148 = vector.load %arg4[%c2_98, %c0_99, %c0_100] : memref<3x32x32xbf16, #tpu.memory_space<vmem>>, vector<1x32x32xbf16>
    %149 = vector.shape_cast %148 : vector<1x32x32xbf16> to vector<32x32xbf16>
    %cst_101 = arith.constant dense<0.000000e+00> : vector<32x128xf32>
    %150 = tpu.matmul %149, %130, %cst_101 {dimension_numbers = #tpu.dot_dimension_numbers<[1], [0], [0], [1], [0, 0, 1, 1], [], []>} : vector<32x32xbf16>, vector<32x128xbf16>, vector<32x128xf32> -> vector<32x128xf32>
    %151 = arith.truncf %150 : vector<32x128xf32> to vector<32x128xbf16>
    %c2_102 = arith.constant 2 : index
    %c0_103 = arith.constant 0 : index
    %c0_104 = arith.constant 0 : index
    %152 = vector.load %arg5[%c2_102, %c0_103, %c0_104] : memref<3x128x128xbf16, #tpu.memory_space<vmem>>, vector<1x128x128xbf16>
    %153 = vector.shape_cast %152 : vector<1x128x128xbf16> to vector<128x128xbf16>
    %cst_105 = arith.constant dense<0.000000e+00> : vector<32x128xf32>
    %154 = tpu.matmul %151, %153, %cst_105 {dimension_numbers = #tpu.dot_dimension_numbers<[1], [0], [0], [1], [0, 0, 1, 1], [], []>} : vector<32x128xbf16>, vector<128x128xbf16>, vector<32x128xf32> -> vector<32x128xf32>
    %155 = arith.addf %147, %154 : vector<32x128xf32>
    %cst_106 = arith.constant dense<0.000000e+00> : vector<32x8xf32>
    %156 = tpu.matmul %155, %0, %cst_106 {dimension_numbers = #tpu.dot_dimension_numbers<[1], [0], [0], [1], [0, 0, 1, 1], [], []>} : vector<32x128xf32>, vector<128x8xf32>, vector<32x8xf32> -> vector<32x8xf32>
    %cst_107 = arith.constant dense<0.000000e+00> : vector<8xf32>
    %157 = vector.multi_reduction <add>, %156, %cst_107 [0] : vector<32x8xf32> to vector<8xf32>
    %158 = vector.shape_cast %157 : vector<8xf32> to vector<1x8xf32>
    %159 = arith.mulf %155, %155 : vector<32x128xf32>
    %cst_108 = arith.constant dense<0.000000e+00> : vector<32x8xf32>
    %160 = tpu.matmul %159, %0, %cst_108 {dimension_numbers = #tpu.dot_dimension_numbers<[1], [0], [0], [1], [0, 0, 1, 1], [], []>} : vector<32x128xf32>, vector<128x8xf32>, vector<32x8xf32> -> vector<32x8xf32>
    %cst_109 = arith.constant dense<0.000000e+00> : vector<8xf32>
    %161 = vector.multi_reduction <add>, %160, %cst_109 [0] : vector<32x8xf32> to vector<8xf32>
    %162 = vector.shape_cast %161 : vector<8xf32> to vector<1x8xf32>
    %cst_110 = arith.constant 0.001953125 : f32
    %163 = vector.broadcast %cst_110 : f32 to vector<1x8xf32>
    %164 = arith.mulf %158, %163 : vector<1x8xf32>
    %cst_111 = arith.constant 0.001953125 : f32
    %165 = vector.broadcast %cst_111 : f32 to vector<1x8xf32>
    %166 = arith.mulf %162, %165 : vector<1x8xf32>
    %167 = arith.mulf %164, %164 : vector<1x8xf32>
    %168 = arith.subf %166, %167 : vector<1x8xf32>
    %cst_112 = arith.constant 9.99999974E-6 : f32
    %169 = vector.broadcast %cst_112 : f32 to vector<1x8xf32>
    %170 = arith.addf %168, %169 : vector<1x8xf32>
    %171 = math.rsqrt %170 : vector<1x8xf32>
    %172 = arith.mulf %8, %171 : vector<1x8xf32>
    %173 = arith.mulf %164, %172 : vector<1x8xf32>
    %174 = arith.subf %9, %173 : vector<1x8xf32>
    %175 = vector.shape_cast %172 : vector<1x8xf32> to vector<1x8xf32>
    %176 = vector.broadcast %175 : vector<1x8xf32> to vector<8x8xf32>
    %cst_113 = arith.constant dense<0.000000e+00> : vector<8x128xf32>
    %177 = tpu.matmul %176, %1, %cst_113 {dimension_numbers = #tpu.dot_dimension_numbers<[1], [0], [0], [1], [0, 0, 1, 1], [], []>} : vector<8x8xf32>, vector<8x128xf32>, vector<8x128xf32> -> vector<8x128xf32>
    %178 = vector.extract_strided_slice %177 {offsets = [0, 0], sizes = [1, 128], strides = [1, 1]} : vector<8x128xf32> to vector<1x128xf32>
    %179 = vector.broadcast %178 : vector<1x128xf32> to vector<32x128xf32>
    %180 = arith.mulf %155, %179 : vector<32x128xf32>
    %181 = vector.shape_cast %174 : vector<1x8xf32> to vector<1x8xf32>
    %182 = vector.broadcast %181 : vector<1x8xf32> to vector<8x8xf32>
    %cst_114 = arith.constant dense<0.000000e+00> : vector<8x128xf32>
    %183 = tpu.matmul %182, %1, %cst_114 {dimension_numbers = #tpu.dot_dimension_numbers<[1], [0], [0], [1], [0, 0, 1, 1], [], []>} : vector<8x8xf32>, vector<8x128xf32>, vector<8x128xf32> -> vector<8x128xf32>
    %184 = vector.extract_strided_slice %183 {offsets = [0, 0], sizes = [1, 128], strides = [1, 1]} : vector<8x128xf32> to vector<1x128xf32>
    %185 = vector.broadcast %184 : vector<1x128xf32> to vector<32x128xf32>
    %186 = arith.addf %180, %185 : vector<32x128xf32>
    %cst_115 = arith.constant 0.000000e+00 : f32
    %187 = vector.broadcast %cst_115 : f32 to vector<32x128xf32>
    %188 = arith.maximumf %186, %187 : vector<32x128xf32>
    %c0_116 = arith.constant 0 : index
    %c0_117 = arith.constant 0 : index
    %189 = vector.load %arg9[%c0_116, %c0_117] : memref<1x8xf32, #tpu.memory_space<vmem>>, vector<1x8xf32>
    %c0_118 = arith.constant 0 : index
    %c0_119 = arith.constant 0 : index
    %190 = vector.load %arg10[%c0_118, %c0_119] : memref<1x8xf32, #tpu.memory_space<vmem>>, vector<1x8xf32>
    %191 = arith.truncf %188 : vector<32x128xf32> to vector<32x128xbf16>
    %cst_120 = arith.constant 0.000000e+00 : f32
    %192 = vector.broadcast %cst_120 : f32 to vector<32x128xf32>
    %c0_121 = arith.constant 0 : index
    %c0_122 = arith.constant 0 : index
    %c0_123 = arith.constant 0 : index
    %193 = vector.load %arg4[%c0_121, %c0_122, %c0_123] : memref<3x32x32xbf16, #tpu.memory_space<vmem>>, vector<1x32x32xbf16>
    %194 = vector.shape_cast %193 : vector<1x32x32xbf16> to vector<32x32xbf16>
    %cst_124 = arith.constant dense<0.000000e+00> : vector<32x128xf32>
    %195 = tpu.matmul %194, %191, %cst_124 {dimension_numbers = #tpu.dot_dimension_numbers<[1], [0], [0], [1], [0, 0, 1, 1], [], []>} : vector<32x32xbf16>, vector<32x128xbf16>, vector<32x128xf32> -> vector<32x128xf32>
    %196 = arith.truncf %195 : vector<32x128xf32> to vector<32x128xbf16>
    %c0_125 = arith.constant 0 : index
    %c0_126 = arith.constant 0 : index
    %c0_127 = arith.constant 0 : index
    %197 = vector.load %arg6[%c0_125, %c0_126, %c0_127] : memref<3x128x128xbf16, #tpu.memory_space<vmem>>, vector<1x128x128xbf16>
    %198 = vector.shape_cast %197 : vector<1x128x128xbf16> to vector<128x128xbf16>
    %cst_128 = arith.constant dense<0.000000e+00> : vector<32x128xf32>
    %199 = tpu.matmul %196, %198, %cst_128 {dimension_numbers = #tpu.dot_dimension_numbers<[1], [0], [0], [1], [0, 0, 1, 1], [], []>} : vector<32x128xbf16>, vector<128x128xbf16>, vector<32x128xf32> -> vector<32x128xf32>
    %200 = arith.addf %192, %199 : vector<32x128xf32>
    %c1_129 = arith.constant 1 : index
    %c0_130 = arith.constant 0 : index
    %c0_131 = arith.constant 0 : index
    %201 = vector.load %arg4[%c1_129, %c0_130, %c0_131] : memref<3x32x32xbf16, #tpu.memory_space<vmem>>, vector<1x32x32xbf16>
    %202 = vector.shape_cast %201 : vector<1x32x32xbf16> to vector<32x32xbf16>
    %cst_132 = arith.constant dense<0.000000e+00> : vector<32x128xf32>
    %203 = tpu.matmul %202, %191, %cst_132 {dimension_numbers = #tpu.dot_dimension_numbers<[1], [0], [0], [1], [0, 0, 1, 1], [], []>} : vector<32x32xbf16>, vector<32x128xbf16>, vector<32x128xf32> -> vector<32x128xf32>
    %204 = arith.truncf %203 : vector<32x128xf32> to vector<32x128xbf16>
    %c1_133 = arith.constant 1 : index
    %c0_134 = arith.constant 0 : index
    %c0_135 = arith.constant 0 : index
    %205 = vector.load %arg6[%c1_133, %c0_134, %c0_135] : memref<3x128x128xbf16, #tpu.memory_space<vmem>>, vector<1x128x128xbf16>
    %206 = vector.shape_cast %205 : vector<1x128x128xbf16> to vector<128x128xbf16>
    %cst_136 = arith.constant dense<0.000000e+00> : vector<32x128xf32>
    %207 = tpu.matmul %204, %206, %cst_136 {dimension_numbers = #tpu.dot_dimension_numbers<[1], [0], [0], [1], [0, 0, 1, 1], [], []>} : vector<32x128xbf16>, vector<128x128xbf16>, vector<32x128xf32> -> vector<32x128xf32>
    %208 = arith.addf %200, %207 : vector<32x128xf32>
    %c2_137 = arith.constant 2 : index
    %c0_138 = arith.constant 0 : index
    %c0_139 = arith.constant 0 : index
    %209 = vector.load %arg4[%c2_137, %c0_138, %c0_139] : memref<3x32x32xbf16, #tpu.memory_space<vmem>>, vector<1x32x32xbf16>
    %210 = vector.shape_cast %209 : vector<1x32x32xbf16> to vector<32x32xbf16>
    %cst_140 = arith.constant dense<0.000000e+00> : vector<32x128xf32>
    %211 = tpu.matmul %210, %191, %cst_140 {dimension_numbers = #tpu.dot_dimension_numbers<[1], [0], [0], [1], [0, 0, 1, 1], [], []>} : vector<32x32xbf16>, vector<32x128xbf16>, vector<32x128xf32> -> vector<32x128xf32>
    %212 = arith.truncf %211 : vector<32x128xf32> to vector<32x128xbf16>
    %c2_141 = arith.constant 2 : index
    %c0_142 = arith.constant 0 : index
    %c0_143 = arith.constant 0 : index
    %213 = vector.load %arg6[%c2_141, %c0_142, %c0_143] : memref<3x128x128xbf16, #tpu.memory_space<vmem>>, vector<1x128x128xbf16>
    %214 = vector.shape_cast %213 : vector<1x128x128xbf16> to vector<128x128xbf16>
    %cst_144 = arith.constant dense<0.000000e+00> : vector<32x128xf32>
    %215 = tpu.matmul %212, %214, %cst_144 {dimension_numbers = #tpu.dot_dimension_numbers<[1], [0], [0], [1], [0, 0, 1, 1], [], []>} : vector<32x128xbf16>, vector<128x128xbf16>, vector<32x128xf32> -> vector<32x128xf32>
    %216 = arith.addf %208, %215 : vector<32x128xf32>
    %cst_145 = arith.constant dense<0.000000e+00> : vector<32x8xf32>
    %217 = tpu.matmul %216, %0, %cst_145 {dimension_numbers = #tpu.dot_dimension_numbers<[1], [0], [0], [1], [0, 0, 1, 1], [], []>} : vector<32x128xf32>, vector<128x8xf32>, vector<32x8xf32> -> vector<32x8xf32>
    %cst_146 = arith.constant dense<0.000000e+00> : vector<8xf32>
    %218 = vector.multi_reduction <add>, %217, %cst_146 [0] : vector<32x8xf32> to vector<8xf32>
    %219 = vector.shape_cast %218 : vector<8xf32> to vector<1x8xf32>
    %220 = arith.mulf %216, %216 : vector<32x128xf32>
    %cst_147 = arith.constant dense<0.000000e+00> : vector<32x8xf32>
    %221 = tpu.matmul %220, %0, %cst_147 {dimension_numbers = #tpu.dot_dimension_numbers<[1], [0], [0], [1], [0, 0, 1, 1], [], []>} : vector<32x128xf32>, vector<128x8xf32>, vector<32x8xf32> -> vector<32x8xf32>
    %cst_148 = arith.constant dense<0.000000e+00> : vector<8xf32>
    %222 = vector.multi_reduction <add>, %221, %cst_148 [0] : vector<32x8xf32> to vector<8xf32>
    %223 = vector.shape_cast %222 : vector<8xf32> to vector<1x8xf32>
    %cst_149 = arith.constant 0.001953125 : f32
    %224 = vector.broadcast %cst_149 : f32 to vector<1x8xf32>
    %225 = arith.mulf %219, %224 : vector<1x8xf32>
    %cst_150 = arith.constant 0.001953125 : f32
    %226 = vector.broadcast %cst_150 : f32 to vector<1x8xf32>
    %227 = arith.mulf %223, %226 : vector<1x8xf32>
    %228 = arith.mulf %225, %225 : vector<1x8xf32>
    %229 = arith.subf %227, %228 : vector<1x8xf32>
    %cst_151 = arith.constant 9.99999974E-6 : f32
    %230 = vector.broadcast %cst_151 : f32 to vector<1x8xf32>
    %231 = arith.addf %229, %230 : vector<1x8xf32>
    %232 = math.rsqrt %231 : vector<1x8xf32>
    %233 = arith.mulf %189, %232 : vector<1x8xf32>
    %234 = arith.mulf %225, %233 : vector<1x8xf32>
    %235 = arith.subf %190, %234 : vector<1x8xf32>
    %236 = vector.shape_cast %233 : vector<1x8xf32> to vector<1x8xf32>
    %237 = vector.broadcast %236 : vector<1x8xf32> to vector<8x8xf32>
    %cst_152 = arith.constant dense<0.000000e+00> : vector<8x128xf32>
    %238 = tpu.matmul %237, %1, %cst_152 {dimension_numbers = #tpu.dot_dimension_numbers<[1], [0], [0], [1], [0, 0, 1, 1], [], []>} : vector<8x8xf32>, vector<8x128xf32>, vector<8x128xf32> -> vector<8x128xf32>
    %239 = vector.extract_strided_slice %238 {offsets = [0, 0], sizes = [1, 128], strides = [1, 1]} : vector<8x128xf32> to vector<1x128xf32>
    %240 = vector.broadcast %239 : vector<1x128xf32> to vector<32x128xf32>
    %241 = arith.mulf %216, %240 : vector<32x128xf32>
    %242 = vector.shape_cast %235 : vector<1x8xf32> to vector<1x8xf32>
    %243 = vector.broadcast %242 : vector<1x8xf32> to vector<8x8xf32>
    %cst_153 = arith.constant dense<0.000000e+00> : vector<8x128xf32>
    %244 = tpu.matmul %243, %1, %cst_153 {dimension_numbers = #tpu.dot_dimension_numbers<[1], [0], [0], [1], [0, 0, 1, 1], [], []>} : vector<8x8xf32>, vector<8x128xf32>, vector<8x128xf32> -> vector<8x128xf32>
    %245 = vector.extract_strided_slice %244 {offsets = [0, 0], sizes = [1, 128], strides = [1, 1]} : vector<8x128xf32> to vector<1x128xf32>
    %246 = vector.broadcast %245 : vector<1x128xf32> to vector<32x128xf32>
    %247 = arith.addf %241, %246 : vector<32x128xf32>
    %cst_154 = arith.constant 0.000000e+00 : f32
    %248 = vector.broadcast %cst_154 : f32 to vector<32x128xf32>
    %249 = arith.maximumf %247, %248 : vector<32x128xf32>
    %250 = arith.addf %188, %249 : vector<32x128xf32>
    %251 = arith.truncf %250 : vector<32x128xf32> to vector<32x128xbf16>
    %cst_155 = arith.constant 0.000000e+00 : f32
    %252 = vector.broadcast %cst_155 : f32 to vector<32x128xf32>
    %c0_156 = arith.constant 0 : index
    %c0_157 = arith.constant 0 : index
    %c0_158 = arith.constant 0 : index
    %253 = vector.load %arg4[%c0_156, %c0_157, %c0_158] : memref<3x32x32xbf16, #tpu.memory_space<vmem>>, vector<1x32x32xbf16>
    %254 = vector.shape_cast %253 : vector<1x32x32xbf16> to vector<32x32xbf16>
    %cst_159 = arith.constant dense<0.000000e+00> : vector<32x128xf32>
    %255 = tpu.matmul %254, %251, %cst_159 {dimension_numbers = #tpu.dot_dimension_numbers<[1], [0], [0], [1], [0, 0, 1, 1], [], []>} : vector<32x32xbf16>, vector<32x128xbf16>, vector<32x128xf32> -> vector<32x128xf32>
    %256 = arith.truncf %255 : vector<32x128xf32> to vector<32x128xbf16>
    %c0_160 = arith.constant 0 : index
    %c0_161 = arith.constant 0 : index
    %c0_162 = arith.constant 0 : index
    %257 = vector.load %arg6[%c0_160, %c0_161, %c0_162] : memref<3x128x128xbf16, #tpu.memory_space<vmem>>, vector<1x128x128xbf16>
    %258 = vector.shape_cast %257 : vector<1x128x128xbf16> to vector<128x128xbf16>
    %cst_163 = arith.constant dense<0.000000e+00> : vector<32x128xf32>
    %259 = tpu.matmul %256, %258, %cst_163 {dimension_numbers = #tpu.dot_dimension_numbers<[1], [0], [0], [1], [0, 0, 1, 1], [], []>} : vector<32x128xbf16>, vector<128x128xbf16>, vector<32x128xf32> -> vector<32x128xf32>
    %260 = arith.addf %252, %259 : vector<32x128xf32>
    %c1_164 = arith.constant 1 : index
    %c0_165 = arith.constant 0 : index
    %c0_166 = arith.constant 0 : index
    %261 = vector.load %arg4[%c1_164, %c0_165, %c0_166] : memref<3x32x32xbf16, #tpu.memory_space<vmem>>, vector<1x32x32xbf16>
    %262 = vector.shape_cast %261 : vector<1x32x32xbf16> to vector<32x32xbf16>
    %cst_167 = arith.constant dense<0.000000e+00> : vector<32x128xf32>
    %263 = tpu.matmul %262, %251, %cst_167 {dimension_numbers = #tpu.dot_dimension_numbers<[1], [0], [0], [1], [0, 0, 1, 1], [], []>} : vector<32x32xbf16>, vector<32x128xbf16>, vector<32x128xf32> -> vector<32x128xf32>
    %264 = arith.truncf %263 : vector<32x128xf32> to vector<32x128xbf16>
    %c1_168 = arith.constant 1 : index
    %c0_169 = arith.constant 0 : index
    %c0_170 = arith.constant 0 : index
    %265 = vector.load %arg6[%c1_168, %c0_169, %c0_170] : memref<3x128x128xbf16, #tpu.memory_space<vmem>>, vector<1x128x128xbf16>
    %266 = vector.shape_cast %265 : vector<1x128x128xbf16> to vector<128x128xbf16>
    %cst_171 = arith.constant dense<0.000000e+00> : vector<32x128xf32>
    %267 = tpu.matmul %264, %266, %cst_171 {dimension_numbers = #tpu.dot_dimension_numbers<[1], [0], [0], [1], [0, 0, 1, 1], [], []>} : vector<32x128xbf16>, vector<128x128xbf16>, vector<32x128xf32> -> vector<32x128xf32>
    %268 = arith.addf %260, %267 : vector<32x128xf32>
    %c2_172 = arith.constant 2 : index
    %c0_173 = arith.constant 0 : index
    %c0_174 = arith.constant 0 : index
    %269 = vector.load %arg4[%c2_172, %c0_173, %c0_174] : memref<3x32x32xbf16, #tpu.memory_space<vmem>>, vector<1x32x32xbf16>
    %270 = vector.shape_cast %269 : vector<1x32x32xbf16> to vector<32x32xbf16>
    %cst_175 = arith.constant dense<0.000000e+00> : vector<32x128xf32>
    %271 = tpu.matmul %270, %251, %cst_175 {dimension_numbers = #tpu.dot_dimension_numbers<[1], [0], [0], [1], [0, 0, 1, 1], [], []>} : vector<32x32xbf16>, vector<32x128xbf16>, vector<32x128xf32> -> vector<32x128xf32>
    %272 = arith.truncf %271 : vector<32x128xf32> to vector<32x128xbf16>
    %c2_176 = arith.constant 2 : index
    %c0_177 = arith.constant 0 : index
    %c0_178 = arith.constant 0 : index
    %273 = vector.load %arg6[%c2_176, %c0_177, %c0_178] : memref<3x128x128xbf16, #tpu.memory_space<vmem>>, vector<1x128x128xbf16>
    %274 = vector.shape_cast %273 : vector<1x128x128xbf16> to vector<128x128xbf16>
    %cst_179 = arith.constant dense<0.000000e+00> : vector<32x128xf32>
    %275 = tpu.matmul %272, %274, %cst_179 {dimension_numbers = #tpu.dot_dimension_numbers<[1], [0], [0], [1], [0, 0, 1, 1], [], []>} : vector<32x128xbf16>, vector<128x128xbf16>, vector<32x128xf32> -> vector<32x128xf32>
    %276 = arith.addf %268, %275 : vector<32x128xf32>
    %cst_180 = arith.constant dense<0.000000e+00> : vector<32x8xf32>
    %277 = tpu.matmul %276, %0, %cst_180 {dimension_numbers = #tpu.dot_dimension_numbers<[1], [0], [0], [1], [0, 0, 1, 1], [], []>} : vector<32x128xf32>, vector<128x8xf32>, vector<32x8xf32> -> vector<32x8xf32>
    %cst_181 = arith.constant dense<0.000000e+00> : vector<8xf32>
    %278 = vector.multi_reduction <add>, %277, %cst_181 [0] : vector<32x8xf32> to vector<8xf32>
    %279 = vector.shape_cast %278 : vector<8xf32> to vector<1x8xf32>
    %280 = arith.mulf %276, %276 : vector<32x128xf32>
    %cst_182 = arith.constant dense<0.000000e+00> : vector<32x8xf32>
    %281 = tpu.matmul %280, %0, %cst_182 {dimension_numbers = #tpu.dot_dimension_numbers<[1], [0], [0], [1], [0, 0, 1, 1], [], []>} : vector<32x128xf32>, vector<128x8xf32>, vector<32x8xf32> -> vector<32x8xf32>
    %cst_183 = arith.constant dense<0.000000e+00> : vector<8xf32>
    %282 = vector.multi_reduction <add>, %281, %cst_183 [0] : vector<32x8xf32> to vector<8xf32>
    %283 = vector.shape_cast %282 : vector<8xf32> to vector<1x8xf32>
    %cst_184 = arith.constant 0.001953125 : f32
    %284 = vector.broadcast %cst_184 : f32 to vector<1x8xf32>
    %285 = arith.mulf %279, %284 : vector<1x8xf32>
    %cst_185 = arith.constant 0.001953125 : f32
    %286 = vector.broadcast %cst_185 : f32 to vector<1x8xf32>
    %287 = arith.mulf %283, %286 : vector<1x8xf32>
    %288 = arith.mulf %285, %285 : vector<1x8xf32>
    %289 = arith.subf %287, %288 : vector<1x8xf32>
    %cst_186 = arith.constant 9.99999974E-6 : f32
    %290 = vector.broadcast %cst_186 : f32 to vector<1x8xf32>
    %291 = arith.addf %289, %290 : vector<1x8xf32>
    %292 = math.rsqrt %291 : vector<1x8xf32>
    %293 = arith.mulf %189, %292 : vector<1x8xf32>
    %294 = arith.mulf %285, %293 : vector<1x8xf32>
    %295 = arith.subf %190, %294 : vector<1x8xf32>
    %296 = vector.shape_cast %293 : vector<1x8xf32> to vector<1x8xf32>
    %297 = vector.broadcast %296 : vector<1x8xf32> to vector<8x8xf32>
    %cst_187 = arith.constant dense<0.000000e+00> : vector<8x128xf32>
    %298 = tpu.matmul %297, %1, %cst_187 {dimension_numbers = #tpu.dot_dimension_numbers<[1], [0], [0], [1], [0, 0, 1, 1], [], []>} : vector<8x8xf32>, vector<8x128xf32>, vector<8x128xf32> -> vector<8x128xf32>
    %299 = vector.extract_strided_slice %298 {offsets = [0, 0], sizes = [1, 128], strides = [1, 1]} : vector<8x128xf32> to vector<1x128xf32>
    %300 = vector.broadcast %299 : vector<1x128xf32> to vector<32x128xf32>
    %301 = arith.mulf %276, %300 : vector<32x128xf32>
    %302 = vector.shape_cast %295 : vector<1x8xf32> to vector<1x8xf32>
    %303 = vector.broadcast %302 : vector<1x8xf32> to vector<8x8xf32>
    %cst_188 = arith.constant dense<0.000000e+00> : vector<8x128xf32>
    %304 = tpu.matmul %303, %1, %cst_188 {dimension_numbers = #tpu.dot_dimension_numbers<[1], [0], [0], [1], [0, 0, 1, 1], [], []>} : vector<8x8xf32>, vector<8x128xf32>, vector<8x128xf32> -> vector<8x128xf32>
    %305 = vector.extract_strided_slice %304 {offsets = [0, 0], sizes = [1, 128], strides = [1, 1]} : vector<8x128xf32> to vector<1x128xf32>
    %306 = vector.broadcast %305 : vector<1x128xf32> to vector<32x128xf32>
    %307 = arith.addf %301, %306 : vector<32x128xf32>
    %cst_189 = arith.constant 0.000000e+00 : f32
    %308 = vector.broadcast %cst_189 : f32 to vector<32x128xf32>
    %309 = arith.maximumf %307, %308 : vector<32x128xf32>
    %310 = arith.addf %188, %309 : vector<32x128xf32>
    %311 = arith.truncf %310 : vector<32x128xf32> to vector<32x128xbf16>
    %cst_190 = arith.constant 0.000000e+00 : f32
    %312 = vector.broadcast %cst_190 : f32 to vector<32x128xf32>
    %c0_191 = arith.constant 0 : index
    %c0_192 = arith.constant 0 : index
    %c0_193 = arith.constant 0 : index
    %313 = vector.load %arg4[%c0_191, %c0_192, %c0_193] : memref<3x32x32xbf16, #tpu.memory_space<vmem>>, vector<1x32x32xbf16>
    %314 = vector.shape_cast %313 : vector<1x32x32xbf16> to vector<32x32xbf16>
    %cst_194 = arith.constant dense<0.000000e+00> : vector<32x128xf32>
    %315 = tpu.matmul %314, %311, %cst_194 {dimension_numbers = #tpu.dot_dimension_numbers<[1], [0], [0], [1], [0, 0, 1, 1], [], []>} : vector<32x32xbf16>, vector<32x128xbf16>, vector<32x128xf32> -> vector<32x128xf32>
    %316 = arith.truncf %315 : vector<32x128xf32> to vector<32x128xbf16>
    %c0_195 = arith.constant 0 : index
    %c0_196 = arith.constant 0 : index
    %c0_197 = arith.constant 0 : index
    %317 = vector.load %arg6[%c0_195, %c0_196, %c0_197] : memref<3x128x128xbf16, #tpu.memory_space<vmem>>, vector<1x128x128xbf16>
    %318 = vector.shape_cast %317 : vector<1x128x128xbf16> to vector<128x128xbf16>
    %cst_198 = arith.constant dense<0.000000e+00> : vector<32x128xf32>
    %319 = tpu.matmul %316, %318, %cst_198 {dimension_numbers = #tpu.dot_dimension_numbers<[1], [0], [0], [1], [0, 0, 1, 1], [], []>} : vector<32x128xbf16>, vector<128x128xbf16>, vector<32x128xf32> -> vector<32x128xf32>
    %320 = arith.addf %312, %319 : vector<32x128xf32>
    %c1_199 = arith.constant 1 : index
    %c0_200 = arith.constant 0 : index
    %c0_201 = arith.constant 0 : index
    %321 = vector.load %arg4[%c1_199, %c0_200, %c0_201] : memref<3x32x32xbf16, #tpu.memory_space<vmem>>, vector<1x32x32xbf16>
    %322 = vector.shape_cast %321 : vector<1x32x32xbf16> to vector<32x32xbf16>
    %cst_202 = arith.constant dense<0.000000e+00> : vector<32x128xf32>
    %323 = tpu.matmul %322, %311, %cst_202 {dimension_numbers = #tpu.dot_dimension_numbers<[1], [0], [0], [1], [0, 0, 1, 1], [], []>} : vector<32x32xbf16>, vector<32x128xbf16>, vector<32x128xf32> -> vector<32x128xf32>
    %324 = arith.truncf %323 : vector<32x128xf32> to vector<32x128xbf16>
    %c1_203 = arith.constant 1 : index
    %c0_204 = arith.constant 0 : index
    %c0_205 = arith.constant 0 : index
    %325 = vector.load %arg6[%c1_203, %c0_204, %c0_205] : memref<3x128x128xbf16, #tpu.memory_space<vmem>>, vector<1x128x128xbf16>
    %326 = vector.shape_cast %325 : vector<1x128x128xbf16> to vector<128x128xbf16>
    %cst_206 = arith.constant dense<0.000000e+00> : vector<32x128xf32>
    %327 = tpu.matmul %324, %326, %cst_206 {dimension_numbers = #tpu.dot_dimension_numbers<[1], [0], [0], [1], [0, 0, 1, 1], [], []>} : vector<32x128xbf16>, vector<128x128xbf16>, vector<32x128xf32> -> vector<32x128xf32>
    %328 = arith.addf %320, %327 : vector<32x128xf32>
    %c2_207 = arith.constant 2 : index
    %c0_208 = arith.constant 0 : index
    %c0_209 = arith.constant 0 : index
    %329 = vector.load %arg4[%c2_207, %c0_208, %c0_209] : memref<3x32x32xbf16, #tpu.memory_space<vmem>>, vector<1x32x32xbf16>
    %330 = vector.shape_cast %329 : vector<1x32x32xbf16> to vector<32x32xbf16>
    %cst_210 = arith.constant dense<0.000000e+00> : vector<32x128xf32>
    %331 = tpu.matmul %330, %311, %cst_210 {dimension_numbers = #tpu.dot_dimension_numbers<[1], [0], [0], [1], [0, 0, 1, 1], [], []>} : vector<32x32xbf16>, vector<32x128xbf16>, vector<32x128xf32> -> vector<32x128xf32>
    %332 = arith.truncf %331 : vector<32x128xf32> to vector<32x128xbf16>
    %c2_211 = arith.constant 2 : index
    %c0_212 = arith.constant 0 : index
    %c0_213 = arith.constant 0 : index
    %333 = vector.load %arg6[%c2_211, %c0_212, %c0_213] : memref<3x128x128xbf16, #tpu.memory_space<vmem>>, vector<1x128x128xbf16>
    %334 = vector.shape_cast %333 : vector<1x128x128xbf16> to vector<128x128xbf16>
    %cst_214 = arith.constant dense<0.000000e+00> : vector<32x128xf32>
    %335 = tpu.matmul %332, %334, %cst_214 {dimension_numbers = #tpu.dot_dimension_numbers<[1], [0], [0], [1], [0, 0, 1, 1], [], []>} : vector<32x128xbf16>, vector<128x128xbf16>, vector<32x128xf32> -> vector<32x128xf32>
    %336 = arith.addf %328, %335 : vector<32x128xf32>
    %cst_215 = arith.constant dense<0.000000e+00> : vector<32x8xf32>
    %337 = tpu.matmul %336, %0, %cst_215 {dimension_numbers = #tpu.dot_dimension_numbers<[1], [0], [0], [1], [0, 0, 1, 1], [], []>} : vector<32x128xf32>, vector<128x8xf32>, vector<32x8xf32> -> vector<32x8xf32>
    %cst_216 = arith.constant dense<0.000000e+00> : vector<8xf32>
    %338 = vector.multi_reduction <add>, %337, %cst_216 [0] : vector<32x8xf32> to vector<8xf32>
    %339 = vector.shape_cast %338 : vector<8xf32> to vector<1x8xf32>
    %340 = arith.mulf %336, %336 : vector<32x128xf32>
    %cst_217 = arith.constant dense<0.000000e+00> : vector<32x8xf32>
    %341 = tpu.matmul %340, %0, %cst_217 {dimension_numbers = #tpu.dot_dimension_numbers<[1], [0], [0], [1], [0, 0, 1, 1], [], []>} : vector<32x128xf32>, vector<128x8xf32>, vector<32x8xf32> -> vector<32x8xf32>
    %cst_218 = arith.constant dense<0.000000e+00> : vector<8xf32>
    %342 = vector.multi_reduction <add>, %341, %cst_218 [0] : vector<32x8xf32> to vector<8xf32>
    %343 = vector.shape_cast %342 : vector<8xf32> to vector<1x8xf32>
    %cst_219 = arith.constant 0.001953125 : f32
    %344 = vector.broadcast %cst_219 : f32 to vector<1x8xf32>
    %345 = arith.mulf %339, %344 : vector<1x8xf32>
    %cst_220 = arith.constant 0.001953125 : f32
    %346 = vector.broadcast %cst_220 : f32 to vector<1x8xf32>
    %347 = arith.mulf %343, %346 : vector<1x8xf32>
    %348 = arith.mulf %345, %345 : vector<1x8xf32>
    %349 = arith.subf %347, %348 : vector<1x8xf32>
    %cst_221 = arith.constant 9.99999974E-6 : f32
    %350 = vector.broadcast %cst_221 : f32 to vector<1x8xf32>
    %351 = arith.addf %349, %350 : vector<1x8xf32>
    %352 = math.rsqrt %351 : vector<1x8xf32>
    %353 = arith.mulf %189, %352 : vector<1x8xf32>
    %354 = arith.mulf %345, %353 : vector<1x8xf32>
    %355 = arith.subf %190, %354 : vector<1x8xf32>
    %356 = vector.shape_cast %353 : vector<1x8xf32> to vector<1x8xf32>
    %357 = vector.broadcast %356 : vector<1x8xf32> to vector<8x8xf32>
    %cst_222 = arith.constant dense<0.000000e+00> : vector<8x128xf32>
    %358 = tpu.matmul %357, %1, %cst_222 {dimension_numbers = #tpu.dot_dimension_numbers<[1], [0], [0], [1], [0, 0, 1, 1], [], []>} : vector<8x8xf32>, vector<8x128xf32>, vector<8x128xf32> -> vector<8x128xf32>
    %359 = vector.extract_strided_slice %358 {offsets = [0, 0], sizes = [1, 128], strides = [1, 1]} : vector<8x128xf32> to vector<1x128xf32>
    %360 = vector.broadcast %359 : vector<1x128xf32> to vector<32x128xf32>
    %361 = arith.mulf %336, %360 : vector<32x128xf32>
    %362 = vector.shape_cast %355 : vector<1x8xf32> to vector<1x8xf32>
    %363 = vector.broadcast %362 : vector<1x8xf32> to vector<8x8xf32>
    %cst_223 = arith.constant dense<0.000000e+00> : vector<8x128xf32>
    %364 = tpu.matmul %363, %1, %cst_223 {dimension_numbers = #tpu.dot_dimension_numbers<[1], [0], [0], [1], [0, 0, 1, 1], [], []>} : vector<8x8xf32>, vector<8x128xf32>, vector<8x128xf32> -> vector<8x128xf32>
    %365 = vector.extract_strided_slice %364 {offsets = [0, 0], sizes = [1, 128], strides = [1, 1]} : vector<8x128xf32> to vector<1x128xf32>
    %366 = vector.broadcast %365 : vector<1x128xf32> to vector<32x128xf32>
    %367 = arith.addf %361, %366 : vector<32x128xf32>
    %cst_224 = arith.constant 0.000000e+00 : f32
    %368 = vector.broadcast %cst_224 : f32 to vector<32x128xf32>
    %369 = arith.maximumf %367, %368 : vector<32x128xf32>
    %370 = arith.addf %7, %369 : vector<32x128xf32>
    %c0_225 = arith.constant 0 : index
    %c0_226 = arith.constant 0 : index
    %371 = vector.load %arg13[%c0_225, %c0_226] : memref<32x128xf32, #tpu.memory_space<vmem>>, vector<32x128xf32>
    tpu.vector_store %arg13[%c0_225, %c0_226], %370 {strides = array<i32>} : memref<32x128xf32, #tpu.memory_space<vmem>>, vector<32x128xf32>,
    return
  }
  func.func @transform_0(%arg0: i32) -> (i32, i32) {
    %c0_i32 = arith.constant 0 : i32
    %c0_i32_0 = arith.constant 0 : i32
    %c0_i32_1 = arith.constant 0 : i32
    return %c0_i32, %c0_i32_0 : i32, i32
  }
  func.func @transform_1(%arg0: i32) -> (i32, i32) {
    %c0_i32 = arith.constant 0 : i32
    %c0_i32_0 = arith.constant 0 : i32
    %c0_i32_1 = arith.constant 0 : i32
    return %c0_i32, %c0_i32_0 : i32, i32
  }
  func.func @transform_2(%arg0: i32) -> (i32, i32) {
    %c0_i32 = arith.constant 0 : i32
    %c0_i32_0 = arith.constant 0 : i32
    %c0_i32_1 = arith.constant 0 : i32
    return %c0_i32, %c0_i32_0 : i32, i32
  }
  func.func @transform_3(%arg0: i32) -> (i32, i32, i32) {
    %c0_i32 = arith.constant 0 : i32
    %c0_i32_0 = arith.constant 0 : i32
    %c0_i32_1 = arith.constant 0 : i32
    %c0_i32_2 = arith.constant 0 : i32
    return %c0_i32, %c0_i32_0, %c0_i32_1 : i32, i32, i32
  }
  func.func @transform_4(%arg0: i32) -> (i32, i32, i32) {
    %c0_i32 = arith.constant 0 : i32
    %c0_i32_0 = arith.constant 0 : i32
    %c0_i32_1 = arith.constant 0 : i32
    %c0_i32_2 = arith.constant 0 : i32
    return %c0_i32, %c0_i32_0, %c0_i32_1 : i32, i32, i32
  }
  func.func @transform_5(%arg0: i32) -> (i32, i32, i32) {
    %c0_i32 = arith.constant 0 : i32
    %c0_i32_0 = arith.constant 0 : i32
    %c0_i32_1 = arith.constant 0 : i32
    %c0_i32_2 = arith.constant 0 : i32
    return %c0_i32, %c0_i32_0, %c0_i32_1 : i32, i32, i32
  }
  func.func @transform_6(%arg0: i32) -> (i32, i32) {
    %c0_i32 = arith.constant 0 : i32
    %c0_i32_0 = arith.constant 0 : i32
    %c0_i32_1 = arith.constant 0 : i32
    return %c0_i32, %c0_i32_0 : i32, i32
  }
  func.func @transform_7(%arg0: i32) -> (i32, i32) {
    %c0_i32 = arith.constant 0 : i32
    %c0_i32_0 = arith.constant 0 : i32
    %c0_i32_1 = arith.constant 0 : i32
    return %c0_i32, %c0_i32_0 : i32, i32
  }
  func.func @transform_8(%arg0: i32) -> (i32, i32) {
    %c0_i32 = arith.constant 0 : i32
    %c0_i32_0 = arith.constant 0 : i32
    %c0_i32_1 = arith.constant 0 : i32
    return %c0_i32, %c0_i32_0 : i32, i32
  }
  func.func @transform_9(%arg0: i32) -> (i32, i32) {
    %c0_i32 = arith.constant 0 : i32
    %c0_i32_0 = arith.constant 0 : i32
    %c0_i32_1 = arith.constant 0 : i32
    return %c0_i32, %c0_i32_0 : i32, i32
  }
  func.func @transform_10(%arg0: i32) -> (i32, i32) {
    %c0_i32 = arith.constant 0 : i32
    %c0_i32_0 = arith.constant 0 : i32
    %c0_i32_1 = arith.constant 0 : i32
    return %c0_i32, %c0_i32_0 : i32, i32
  }
  func.func @transform_11(%arg0: i32) -> (i32, i32) {
    %c0_i32 = arith.constant 0 : i32
    %c0_i32_0 = arith.constant 0 : i32
    %c0_i32_1 = arith.constant 0 : i32
    return %c0_i32, %c0_i32_0 : i32, i32
  }
  func.func @transform_12(%arg0: i32) -> (i32, i32) {
    %c0_i32 = arith.constant 0 : i32
    %c0_i32_0 = arith.constant 0 : i32
    %c0_i32_1 = arith.constant 0 : i32
    return %c0_i32, %c0_i32_0 : i32, i32
  }
}

</mosaic_0001>

<bundles_post_ra>
// kernel: tile.8
= control target key start
LH: loop header
LB: loop body
LE: loop exit
PB: predicated region body
PF: predicated region fallthrough
CT: control target
= control target key end

     0   :  { %s28_s0 = inlined_call_operand.vmem [shape: f32[8], index: 0, kind: input, shape index: {}]   ;;  %s29_s1 = inlined_call_operand.vmem [shape: f32[16,8], index: 1, kind: output, shape index: {}]  }
   0x1   :  { %v4_v0 = vld [vmem:[%s28_s0] ss:$0 sm:$0xff] }
   0x2   :  { %5 = vst [vmem:[%s29_s1] sm:$0xff] %v4_v0  ;;  %8 = vst [vmem:[%s29_s1 + $0x8] sm:$0xff] %v4_v0 }

// kernel: tile.9
= control target key start
LH: loop header
LB: loop body
LE: loop exit
PB: predicated region body
PF: predicated region fallthrough
CT: control target
= control target key end

     0   :  { %s131_s10 = smov 120   ;;  %s132_s11 = smov 104   ;;  %vm3_vm0 = vcmask 64512   ;;  %vm9_vm1 = vcmask 1048512   ;;  %vm15_vm2 = vcmask 982912   ;;  %vm21_vm3 = vcmask 917312   ;;  %s207_s0 = inlined_call_operand.vmem [shape: f32[16,8], index: 0, kind: input, shape index: {}]   ;;  %s208_s1 = inlined_call_operand.vmem [shape: f32[1,128], index: 1, kind: output, shape index: {}]  }
   0x1   :  { %v101_v0 = vld [vmem:[%s207_s0 + $0xf] sm:$0x1]   ;;  %v103_v1 = vld [vmem:[%s207_s0 + $0xd] sm:$0x1]   ;;  %v102_v2 = vld [vmem:[%s207_s0 + $0xe] sm:$0x1]  }
   0x2   :  { %7 = vrot.lane.b32.xlu0 %v101_v0, %s131_s10  ;;  %19 = vrot.lane.b32.xlu1 %v103_v1, %s132_s11  ;;  %v104_v3 = vld [vmem:[%s207_s0 + $0xc] sm:$0x1]   ;;  %s133_s16 = smov 112   ;;  %s134_s17 = smov 96   ;;  %v105_v4 = vld [vmem:[%s207_s0 + $0xb] sm:$0x1]  }
   0x3   :  { %v106_v5 = vld [vmem:[%s207_s0 + $0xa] sm:$0x1]   ;;  %v2_v6 = vld [vmem:[%s207_s0] sm:$0x1]   ;;  %s135_s24 = smov 88   ;;  %s136_s25 = smov 80  }
   0x4   :  { %4 = vst.msk [vmem:[#allocation0] sm:$0x1] %vm3_vm0, %v2_v6   ;;  %v107_v7 = vld [vmem:[%s207_s0 + $0x9] sm:$0x1]   ;;  %v108_v8 = vld [vmem:[%s207_s0 + $0x8] sm:$0x1]  }
   0x5   :  { %s137_s30 = smov 72   ;;  %s138_s2 = smov 64   ;;  %v109_v9 = vld [vmem:[%s207_s0 + $0x7] sm:$0x1]   ;;  %v110_v10 = vld [vmem:[%s207_s0 + $0x6] sm:$0x1]  }
   0x6   :  { %13 = vrot.lane.b32.xlu0 %v102_v2, %s133_s16  ;;  %25 = vrot.lane.b32.xlu1 %v104_v3, %s134_s17  ;;  %s139_s7 = smov 56   ;;  %s140_s8 = smov 48   ;;  %v111_v11 = vld [vmem:[%s207_s0 + $0x5] sm:$0x1]   ;;  %v112_v12 = vld [vmem:[%s207_s0 + $0x4] sm:$0x1]  }
   0x7   :  { %s141_s13 = smov 40   ;;  %s142_s14 = smov 32   ;;  %v113_v13 = vld [vmem:[%s207_s0 + $0x3] sm:$0x1]   ;;  %v114_v14 = vld [vmem:[%s207_s0 + $0x2] sm:$0x1]  }
   0x8   :  { %s143_s19 = smov 24   ;;  %s144_s20 = smov 16   ;;  %v115_v15 = vld [vmem:[%s207_s0 + $0x1] sm:$0x1]   ;;  %vm27_vm4 = vcmask 851712   ;;  %vm33_vm5 = vcmask 786112  }
   0x9   :  { %s145_s0 = smov 8   ;;  %vm39_vm6 = vcmask 720512   ;;  %vm45_vm7 = vcmask 654912   ;;  %vm51_vm8 = vcmask 589312   ;;  %vm57_vm9 = vcmask 523712  }
   0xa   :  { %31 = vrot.lane.b32.xlu0 %v105_v4, %s135_s24  ;;  %37 = vrot.lane.b32.xlu1 %v106_v5, %s136_s25  ;;  %vm63_vm10 = vcmask 458112   ;;  %vm69_vm11 = vcmask 392512   ;;  %vm75_vm12 = vcmask 326912   ;;  %vm81_vm13 = vcmask 261312  }
   0xb   :  { %vm87_vm14 = vcmask 195712   ;;  %vm93_vm15 = vcmask 130112  }
   0xe   :  { %43 = vrot.lane.b32.xlu0 %v107_v7, %s137_s30  ;;  %49 = vrot.lane.b32.xlu1 %v108_v8, %s138_s2 }
  0x12   :  { %55 = vrot.lane.b32.xlu0 %v109_v9, %s139_s7  ;;  %61 = vrot.lane.b32.xlu1 %v110_v10, %s140_s8 }
  0x16   :  { %67 = vrot.lane.b32.xlu0 %v111_v11, %s141_s13  ;;  %73 = vrot.lane.b32.xlu1 %v112_v12, %s142_s14 }
  0x1a   :  { %79 = vrot.lane.b32.xlu0 %v113_v13, %s143_s19  ;;  %85 = vrot.lane.b32.xlu1 %v114_v14, %s144_s20 }
  0x1e   :  { %91 = vrot.lane.b32.xlu0 %v115_v15, %s145_s0 }
  0x74   :  { %v8_v16 = vpop.permute.xlu0 %7   ;;  %v20_v17 = vpop.permute.xlu1 %19  }
  0x75   :  { %10 = vst.msk [vmem:[#allocation0] sm:$0x1] %vm9_vm1, %v8_v16  }
  0x78   :  { %v14_v18 = vpop.permute.xlu0 %13   ;;  %v26_v19 = vpop.permute.xlu1 %25  }
  0x79   :  { %16 = vst.msk [vmem:[#allocation0] sm:$0x1] %vm15_vm2, %v14_v18  }
  0x7a   :  { %22 = vst.msk [vmem:[#allocation0] sm:$0x1] %vm21_vm3, %v20_v17  }
  0x7b   :  { %28 = vst.msk [vmem:[#allocation0] sm:$0x1] %vm27_vm4, %v26_v19  }
  0x7c   :  { %v32_v20 = vpop.permute.xlu0 %31   ;;  %v38_v21 = vpop.permute.xlu1 %37  }
  0x7d   :  { %34 = vst.msk [vmem:[#allocation0] sm:$0x1] %vm33_vm5, %v32_v20  }
  0x7e   :  { %40 = vst.msk [vmem:[#allocation0] sm:$0x1] %vm39_vm6, %v38_v21  }
  0x80   :  { %v44_v22 = vpop.permute.xlu0 %43   ;;  %v50_v23 = vpop.permute.xlu1 %49  }
  0x81   :  { %46 = vst.msk [vmem:[#allocation0] sm:$0x1] %vm45_vm7, %v44_v22  }
  0x82   :  { %52 = vst.msk [vmem:[#allocation0] sm:$0x1] %vm51_vm8, %v50_v23  }
  0x84   :  { %v56_v24 = vpop.permute.xlu0 %55   ;;  %v62_v25 = vpop.permute.xlu1 %61  }
  0x85   :  { %58 = vst.msk [vmem:[#allocation0] sm:$0x1] %vm57_vm9, %v56_v24  }
  0x86   :  { %64 = vst.msk [vmem:[#allocation0] sm:$0x1] %vm63_vm10, %v62_v25  }
  0x88   :  { %v68_v26 = vpop.permute.xlu0 %67   ;;  %v74_v27 = vpop.permute.xlu1 %73  }
  0x89   :  { %70 = vst.msk [vmem:[#allocation0] sm:$0x1] %vm69_vm11, %v68_v26  }
  0x8a   :  { %76 = vst.msk [vmem:[#allocation0] sm:$0x1] %vm75_vm12, %v74_v27  }
  0x8c   :  { %v80_v28 = vpop.permute.xlu0 %79   ;;  %v86_v29 = vpop.permute.xlu1 %85  }
  0x8d   :  { %82 = vst.msk [vmem:[#allocation0] sm:$0x1] %vm81_vm13, %v80_v28  }
  0x8e   :  { %88 = vst.msk [vmem:[#allocation0] sm:$0x1] %vm87_vm14, %v86_v29  }
  0x90   :  { %v92_v30 = vpop.permute.xlu0 %91  }
  0x91   :  { %94 = vst.msk [vmem:[#allocation0] sm:$0x1] %vm93_vm15, %v92_v30  }
  0x98   :  { %v98_v31 = vld [vmem:[#allocation0] sm:$0x1] }
  0x99   :  { %100 = vst [vmem:[%s208_s1] sm:$0x1] %v98_v31 }

// kernel: rrcnn_block.1
= control target key start
LH: loop header
LB: loop body
LE: loop exit
PB: predicated region body
PF: predicated region fallthrough
CT: control target
= control target key end

     0   :  { %vm112_vm0 = vcmask 523264   ;;  %vm186_vm1 = vcmask 261120   ;;  %vm7044_vm2 = vmmov 0   ;;  %vm818_vm3 = vcmask 64512   ;;  %s8432_s1 = inlined_call_operand.vmem [shape: bf16[64,128], index: 1, kind: input, shape index: {}]   ;;  %s8433_s0 = inlined_call_operand.vmem [shape: bf16[32,64], index: 0, kind: input, shape index: {}]   ;;  %s8434_s3 = inlined_call_operand.vmem [shape: bf16[3,32,32], index: 3, kind: input, shape index: {}]   ;;  %s8435_s4 = inlined_call_operand.vmem [shape: bf16[3,128,128], index: 4, kind: input, shape index: {}]   ;;  %s8436_s2 = inlined_call_operand.vmem [shape: f32[1,128], index: 2, kind: input, shape index: {}]   ;;  %s8437_s10 = inlined_call_operand.vmem [shape: f32[128,8], index: 10, kind: input, shape index: {}]   ;;  %s8438_s11 = inlined_call_operand.vmem [shape: f32[8,128], index: 11, kind: input, shape index: {}]   ;;  %s8439_s6 = inlined_call_operand.vmem [shape: f32[1,8], index: 6, kind: input, shape index: {}]   ;;  %s8440_s7 = inlined_call_operand.vmem [shape: f32[1,8], index: 7, kind: input, shape index: {}]   ;;  %s8441_s5 = inlined_call_operand.vmem [shape: bf16[3,128,128], index: 5, kind: input, shape index: {}]   ;;  %s8442_s8 = inlined_call_operand.vmem [shape: f32[1,8], index: 8, kind: input, shape index: {}]   ;;  %s8443_s9 = inlined_call_operand.vmem [shape: f32[1,8], index: 9, kind: input, shape index: {}]   ;;  %s8444_s12 = inlined_call_operand.vmem [shape: f32[32,128], index: 12, kind: output, shape index: {}]  }
   0x1   :  { %v6957_v0 = vld [vmem:[%s8432_s1] sm:$0xff]   ;;  %v6958_v1 = vld [vmem:[%s8432_s1 + $0x8] sm:$0xff]   ;;  %v6959_v2 = vld [vmem:[%s8432_s1 + $0x10] sm:$0xff]  }
   0x2   :  { %5491 = vmatprep.subr.bf16.mxu0 %v6957_v0  ;;  %v6961_v3 = vld [vmem:[%s8433_s0] sm:$0xff]   ;;  %v6960_v4 = vld [vmem:[%s8432_s1 + $0x18] sm:$0xff]   ;;  %v6962_v5 = vld [vmem:[%s8433_s0 + $0x8] sm:$0xff]  }
   0x3   :  { %5492 = vmatpush3.bf16.msra.mxu0 %v6957_v0  ;;  %5499 = vmatprep.mubr.msk.bf16.mxu0 %vm112_vm0, %v6961_v3  ;;  %v7131_v6 = vld [vmem:[%s8434_s3] sm:$0xff]   ;;  %v7143_v8 = vld [vmem:[%s8435_s4 + $0x48] sm:$0xff]   ;;  %v7151_v9 = vld [vmem:[%s8435_s4 + $0x50] sm:$0xff]  }
   0x4   :  { %5493 = vmatprep.subr.bf16.mxu0 %v6958_v1  ;;  %5507 = vmatprep.mubr.msk.bf16.mxu1 %vm186_vm1, %v7131_v6  ;;  %v7138_v7 = vld [vmem:[%s8435_s4 + $0x40] sm:$0xff]   ;;  %v7156_v10 = vld [vmem:[%s8435_s4 + $0x58] sm:$0xff]   ;;  %v7188_v23 = vld [vmem:[%s8434_s3 + $0x8] sm:$0xff]  }
   0x5   :  { %v7163_v11 = vld [vmem:[%s8435_s4 + $0x60] sm:$0xff]   ;;  %v7193_v24 = vld [vmem:[%s8434_s3 + $0x10] sm:$0xff]   ;;  %v7202_v25 = vld [vmem:[%s8434_s3 + $0x18] sm:$0xff]  }
   0x6   :  { %v4786_v13 = vld [vmem:[%s8436_s2] ss:$0 sm:$0xff]  ;;  %v7216_v27 = vld [vmem:[%s8434_s3 + $0x28] sm:$0xff]   ;;  %v7230_v29 = vld [vmem:[%s8435_s4 + $0x70] sm:$0xff]  }
   0x7   :  { %5494 = vmatpush3.bf16.msra.mxu0 %v6958_v1  ;;  %v7207_v26 = vld [vmem:[%s8434_s3 + $0x20] sm:$0xff]   ;;  %v7223_v28 = vld [vmem:[%s8435_s4 + $0x68] sm:$0xff]   ;;  %v7237_v30 = vld [vmem:[%s8435_s4 + $0x78] sm:$0xff]  }
   0x8   :  { %5495 = vmatprep.subr.bf16.mxu0 %v6959_v2  ;;  %8485 = vst [vmem:[#allocation6_spill] sm:$0xff] %v7237_v30  ;;  %v7244_v31 = vld [vmem:[%s8435_s4] sm:$0xff]   ;;  %v43_v33 = vld [vmem:[%s8437_s10 + $0x8] sm:$0xff]  ;;  %v44_v34 = vld [vmem:[%s8437_s10 + $0x10] sm:$0xff] }
   0x9   :  { %v42_v32 = vld [vmem:[%s8437_s10] sm:$0xff]  ;;  %v45_v36 = vld [vmem:[%s8437_s10 + $0x18] sm:$0xff]  ;;  %v47_v39 = vld [vmem:[%s8437_s10 + $0x28] sm:$0xff] }
   0xa   :  { %v7256_v35 = vpack.c.bf16 %v43_v33, %v42_v32  ;;  %v7261_v37 = vpack.c.bf16 %v45_v36, %v44_v34  ;;  %v46_v38 = vld [vmem:[%s8437_s10 + $0x20] sm:$0xff]  ;;  %v48_v41 = vld [vmem:[%s8437_s10 + $0x30] sm:$0xff]  ;;  %v49_v42 = vld [vmem:[%s8437_s10 + $0x38] sm:$0xff] }
   0xb   :  { %5496 = vmatpush3.bf16.msra.mxu0 %v6959_v2  ;;  %v7272_v40 = vpack.c.bf16 %v47_v39, %v46_v38  ;;  %v7282_v43 = vpack.c.bf16 %v49_v42, %v48_v41  ;;  %v50_v44 = vld [vmem:[%s8437_s10 + $0x40] sm:$0xff]  ;;  %v51_v45 = vld [vmem:[%s8437_s10 + $0x48] sm:$0xff]  ;;  %v52_v47 = vld [vmem:[%s8437_s10 + $0x50] sm:$0xff] }
   0xc   :  { %5497 = vmatprep.subr.bf16.mxu0 %v6960_v4  ;;  %v7292_v46 = vpack.c.bf16 %v51_v45, %v50_v44  ;;  %v53_v48 = vld [vmem:[%s8437_s10 + $0x58] sm:$0xff]  ;;  %v54_v50 = vld [vmem:[%s8437_s10 + $0x60] sm:$0xff]  ;;  %v55_v51 = vld [vmem:[%s8437_s10 + $0x68] sm:$0xff] }
   0xd   :  { %v7302_v49 = vpack.c.bf16 %v53_v48, %v52_v47  ;;  %v7312_v52 = vpack.c.bf16 %v55_v51, %v54_v50  ;;  %v56_v53 = vld [vmem:[%s8437_s10 + $0x70] sm:$0xff]  ;;  %v57_v54 = vld [vmem:[%s8437_s10 + $0x78] sm:$0xff]  ;;  %v7352_v32 = vld [vmem:[%s8435_s4 + $0x20] sm:$0xff]  }
   0xe   :  { %v7322_v55 = vpack.c.bf16 %v57_v54, %v56_v53  ;;  %v7359_v33 = vld [vmem:[%s8435_s4 + $0x28] sm:$0xff]   ;;  %v7366_v34 = vld [vmem:[%s8435_s4 + $0x30] sm:$0xff]   ;;  %v7373_v36 = vld [vmem:[%s8435_s4 + $0x38] sm:$0xff]   ;;  %v8445_v54 = vmov 0.0  }
   0xf   :  { %5498 = vmatpush3.bf16.msra.mxu0 %v6960_v4  ;;  %v7331_v4 = vld [vmem:[%s8435_s4 + $0x8] sm:$0xff]   ;;  %v7380_v38 = vld [vmem:[%s8435_s4 + $0x80] sm:$0xff]   ;;  %v7394_v41 = vld [vmem:[%s8435_s4 + $0x90] sm:$0xff]  }
  0x10   :  { %5519 = vmatprep.subr.bf16.mxu0 %v7138_v7  ;;  %v7387_v39 = vld [vmem:[%s8435_s4 + $0x88] sm:$0xff]   ;;  %v7401_v42 = vld [vmem:[%s8435_s4 + $0x98] sm:$0xff]   ;;  %v7408_v44 = vld [vmem:[%s8435_s4 + $0xa0] sm:$0xff]  }
  0x11   :  { %v7415_v45 = vld [vmem:[%s8435_s4 + $0xa8] sm:$0xff]   ;;  %v7422_v47 = vld [vmem:[%s8435_s4 + $0xb0] sm:$0xff]   ;;  %v7429_v48 = vld [vmem:[%s8435_s4 + $0xb8] sm:$0xff]  }
  0x12   :  { %5500 = vmatmul.mubr.msk.bf16.vlgmr.msra.gmra.mrb[0].mxu0 %vm112_vm0, %v6962_v5  ;;  %8486 = vst [vmem:[#allocation7_spill] sm:$0xff] %v7422_v47  ;;  %8487 = vst [vmem:[#allocation8_spill] sm:$0xff] %v7429_v48 }
  0x13   :  { %5520 = vmatpush3.bf16.msra.mxu0 %v7138_v7 }
  0x14   :  { %5521 = vmatprep.subr.bf16.mxu0 %v7143_v8 }
  0x17   :  { %5522 = vmatpush3.bf16.msra.mxu0 %v7143_v8 }
  0x18   :  { %5523 = vmatprep.subr.bf16.mxu0 %v7151_v9 }
  0x1b   :  { %5524 = vmatpush3.bf16.msra.mxu0 %v7151_v9 }
  0x1c   :  { %5525 = vmatprep.subr.bf16.mxu0 %v7156_v10 }
  0x1f   :  { %5526 = vmatpush3.bf16.msra.mxu0 %v7156_v10 }
  0x20   :  { %5527 = vmatprep.subr.bf16.mxu0 %v7163_v11 }
  0x23   :  { %5528 = vmatpush3.bf16.msra.mxu0 %v7163_v11 }
  0x24   :  { %5529 = vmatprep.subr.bf16.mxu0 %v7223_v28 }
  0x27   :  { %5530 = vmatpush3.bf16.msra.mxu0 %v7223_v28 }
  0x28   :  { %5531 = vmatprep.subr.bf16.mxu0 %v7230_v29 }
  0x2b   :  { %5532 = vmatpush3.bf16.msra.mxu0 %v7230_v29 }
  0x2c   :  { %5533 = vmatprep.subr.bf16.mxu0 %v7237_v30 }
  0x2f   :  { %5534 = vmatpush3.bf16.msra.mxu0 %v7237_v30 }
  0x30   :  { %5539 = vmatprep.subr.bf16.mxu0 %v7244_v31 }
  0xe5   :  { %v5501_v12 = vpop.f32.mrb[0].mxu0 }
  0xe6   :  { %v153_v14 = vpop.f32.mrb[1].mxu0  ;;  %v7179_v20 = vadd.f32 %v5501_v12, %v4786_v13  ;;  %v7338_v12 = vld [vmem:[%s8435_s4 + $0x10] sm:$0xff]  }
  0xe7   :  { %v5502_v15 = vpop.f32.mrb[2].mxu0  ;;  %v7173_v17 = vadd.f32 %v4786_v13, %v153_v14 }
  0xe8   :  { %v156_v16 = vpop.f32.mrb[3].mxu0  ;;  %v7175_v18 = vadd.f32 %v5502_v15, %v4786_v13  ;;  %8484 = vst [vmem:[#allocation5_spill] sm:$0xff] %v7179_v20 }
  0xe9   :  { %8481 = vst [vmem:[#allocation2_spill] sm:$0xff] %v7173_v17  ;;  %v7177_v19 = vadd.f32 %v4786_v13, %v156_v16 }
  0xea   :  { %8482 = vst [vmem:[#allocation3_spill] sm:$0xff] %v7175_v18  ;;  %v171_v22 = vpack.c.bf16 %v7175_v18, %v7179_v20 }
  0xeb   :  { %8483 = vst [vmem:[#allocation4_spill] sm:$0xff] %v7177_v19  ;;  %v170_v21 = vpack.c.bf16 %v7177_v19, %v7173_v17 }
  0xed   :  { %5503 = vmatprep.subr.bf16.mxu1 %v170_v21 }
  0xee   :  { %5504 = vmatpush3.bf16.msra.mxu1 %v170_v21 }
  0xef   :  { %5505 = vmatprep.subr.bf16.mxu1 %v171_v22 }
  0xf2   :  { %5506 = vmatpush3.bf16.msra.mxu1 %v171_v22 }
  0xf3   :  { %5511 = vmatprep.subr.bf16.mxu1 %v170_v21 }
  0xf5   :  { %5508 = vmatmul.mubr.msk.bf16.vlgmr.msra.gmra.mrb[0].mxu1 %vm186_vm1, %v7188_v23 }
  0xf6   :  { %5512 = vmatpush3.bf16.msra.mxu1 %v170_v21  ;;  %5515 = vmatprep.mubr.msk.bf16.mxu1 %vm186_vm1, %v7193_v24 }
  0xf7   :  { %5513 = vmatprep.subr.bf16.mxu1 %v171_v22 }
  0xfa   :  { %5514 = vmatpush3.bf16.msra.mxu1 %v171_v22 }
  0xfb   :  { %5559 = vmatprep.subr.bf16.mxu1 %v170_v21 }
  0xfd   :  { %5516 = vmatmul.mubr.msk.bf16.vlgmr.msra.gmra.mrb[4].mxu1 %vm186_vm1, %v7202_v25 }
  0xfe   :  { %5560 = vmatpush3.bf16.msra.mxu1 %v170_v21  ;;  %5563 = vmatprep.mubr.msk.bf16.mxu1 %vm186_vm1, %v7207_v26 }
  0xff   :  { %5561 = vmatprep.subr.bf16.mxu1 %v171_v22 }
 0x102   :  { %5562 = vmatpush3.bf16.msra.mxu1 %v171_v22  ;;  %v7345_v22 = vld [vmem:[%s8435_s4 + $0x18] sm:$0xff]  }
 0x103   :  { %6524 = vmatprep.subr.bf16.mxu1 %v7256_v35 }
 0x105   :  { %5564 = vmatmul.mubr.msk.bf16.vlgmr.msra.gmra.mrb[8].mxu1 %vm186_vm1, %v7216_v27 }
 0x106   :  { %6526 = vmatpush3.bf16.msra.mxu1 %v7256_v35 }
 0x107   :  { %6528 = vmatprep.subr.bf16.mxu1 %v7261_v37 }
 0x10a   :  { %6530 = vmatpush3.bf16.msra.mxu1 %v7261_v37 }
 0x10b   :  { %6532 = vmatprep.subr.bf16.mxu1 %v7272_v40 }
 0x10e   :  { %6534 = vmatpush3.bf16.msra.mxu1 %v7272_v40 }
 0x10f   :  { %6536 = vmatprep.subr.bf16.mxu1 %v7282_v43 }
 0x112   :  { %6538 = vmatpush3.bf16.msra.mxu1 %v7282_v43 }
 0x113   :  { %6540 = vmatprep.subr.bf16.mxu1 %v7292_v46 }
 0x116   :  { %6542 = vmatpush3.bf16.msra.mxu1 %v7292_v46 }
 0x117   :  { %6544 = vmatprep.subr.bf16.mxu1 %v7302_v49 }
 0x11a   :  { %6546 = vmatpush3.bf16.msra.mxu1 %v7302_v49 }
 0x11b   :  { %6548 = vmatprep.subr.bf16.mxu1 %v7312_v52 }
 0x11e   :  { %6550 = vmatpush3.bf16.msra.mxu1 %v7312_v52 }
 0x11f   :  { %6552 = vmatprep.subr.bf16.mxu1 %v7322_v55 }
 0x122   :  { %6554 = vmatpush3.bf16.msra.mxu1 %v7322_v55 }
 0x123   :  { %6556 = vmatprep.subr.bf16.mxu1 %v7256_v35 }
 0x1c8   :  { %v5509_v56 = vpop.f32.mrb[0].mxu1 }
 0x1c9   :  { %v227_v57 = vpop.f32.mrb[1].mxu1 }
 0x1ca   :  { %v5510_v58 = vpop.f32.mrb[2].mxu1 }
 0x1cb   :  { %v243_v59 = vpack.c.bf16 %v5510_v58, %v5509_v56  ;;  %v230_v60 = vpop.f32.mrb[3].mxu1  ;;  %v7490_v56 = vld [vmem:[%s8438_s11] sm:$0xff] }
 0x1cc   :  { %v242_v61 = vpack.c.bf16 %v230_v60, %v227_v57 }
 0x1d0   :  { %v5517_v62 = vpop.f32.mrb[4].mxu1 }
 0x1d1   :  { %v315_v63 = vpop.f32.mrb[5].mxu1 }
 0x1d2   :  { %v5518_v0 = vpop.f32.mrb[6].mxu1 }
 0x1d3   :  { %v331_v1 = vpack.c.bf16 %v5518_v0, %v5517_v62  ;;  %v318_v2 = vpop.f32.mrb[7].mxu1 }
 0x1d4   :  { %v330_v3 = vpack.c.bf16 %v318_v2, %v315_v63 }
 0x1d6   :  { %5535 = vmatprep.mubr.bf16.mxu0 %v330_v3 }
 0x1d7   :  { %5536 = vmatmul.mubr.bf16.vlgmr.msra.gmra.mrb[4].mxu0 %v331_v1 }
 0x1d8   :  { %5540 = vmatpush3.bf16.msra.mxu0 %v7244_v31  ;;  %5555 = vmatprep.mubr.bf16.mxu0 %v242_v61  ;;  %v5565_v5 = vpop.f32.mrb[8].mxu1 }
 0x1d9   :  { %5541 = vmatprep.subr.bf16.mxu0 %v7331_v4  ;;  %v598_v13 = vpop.f32.mrb[9].mxu1 }
 0x1da   :  { %v5566_v14 = vpop.f32.mrb[10].mxu1 }
 0x1db   :  { %v614_v15 = vpack.c.bf16 %v5566_v14, %v5565_v5  ;;  %v601_v16 = vpop.f32.mrb[11].mxu1 }
 0x1dc   :  { %5542 = vmatpush3.bf16.msra.mxu0 %v7331_v4  ;;  %v613_v21 = vpack.c.bf16 %v601_v16, %v598_v13 }
 0x1dd   :  { %5543 = vmatprep.subr.bf16.mxu0 %v7338_v12 }
 0x1e0   :  { %5544 = vmatpush3.bf16.msra.mxu0 %v7338_v12 }
 0x1e1   :  { %5545 = vmatprep.subr.bf16.mxu0 %v7345_v22 }
 0x1e4   :  { %5546 = vmatpush3.bf16.msra.mxu0 %v7345_v22 }
 0x1e5   :  { %5547 = vmatprep.subr.bf16.mxu0 %v7352_v32 }
 0x1e8   :  { %5548 = vmatpush3.bf16.msra.mxu0 %v7352_v32 }
 0x1e9   :  { %5549 = vmatprep.subr.bf16.mxu0 %v7359_v33 }
 0x1ec   :  { %5550 = vmatpush3.bf16.msra.mxu0 %v7359_v33 }
 0x1ed   :  { %5551 = vmatprep.subr.bf16.mxu0 %v7366_v34 }
 0x1f0   :  { %5552 = vmatpush3.bf16.msra.mxu0 %v7366_v34 }
 0x1f1   :  { %5553 = vmatprep.subr.bf16.mxu0 %v7373_v36 }
 0x1f4   :  { %5554 = vmatpush3.bf16.msra.mxu0 %v7373_v36 }
 0x1f5   :  { %5567 = vmatprep.subr.bf16.mxu0 %v7380_v38 }
 0x1f7   :  { %5556 = vmatmul.mubr.bf16.vlgmr.msra.gmra.mrb[4].mxu0 %v243_v59 }
 0x1f8   :  { %5568 = vmatpush3.bf16.msra.mxu0 %v7380_v38  ;;  %5583 = vmatprep.mubr.bf16.mxu0 %v613_v21 }
 0x1f9   :  { %5569 = vmatprep.subr.bf16.mxu0 %v7387_v39 }
 0x1fc   :  { %5570 = vmatpush3.bf16.msra.mxu0 %v7387_v39 }
 0x1fd   :  { %5571 = vmatprep.subr.bf16.mxu0 %v7394_v41 }
 0x200   :  { %5572 = vmatpush3.bf16.msra.mxu0 %v7394_v41 }
 0x201   :  { %5573 = vmatprep.subr.bf16.mxu0 %v7401_v42 }
 0x204   :  { %5574 = vmatpush3.bf16.msra.mxu0 %v7401_v42 }
 0x205   :  { %5575 = vmatprep.subr.bf16.mxu0 %v7408_v44 }
 0x208   :  { %5576 = vmatpush3.bf16.msra.mxu0 %v7408_v44 }
 0x209   :  { %5577 = vmatprep.subr.bf16.mxu0 %v7415_v45 }
 0x20c   :  { %5578 = vmatpush3.bf16.msra.mxu0 %v7415_v45 }
 0x20d   :  { %5579 = vmatprep.subr.bf16.mxu0 %v7422_v47 }
 0x210   :  { %5580 = vmatpush3.bf16.msra.mxu0 %v7422_v47 }
 0x211   :  { %5581 = vmatprep.subr.bf16.mxu0 %v7429_v48 }
 0x214   :  { %5582 = vmatpush3.bf16.msra.mxu0 %v7429_v48 }
 0x215   :  { %5689 = vmatprep.subr.bf16.mxu0 %v7138_v7 }
 0x217   :  { %5584 = vmatmul.mubr.bf16.vlgmr.msra.gmra.mrb[4].mxu0 %v614_v15 }
 0x218   :  { %5690 = vmatpush3.bf16.msra.mxu0 %v7138_v7 }
 0x219   :  { %5691 = vmatprep.subr.bf16.mxu0 %v7143_v8 }
 0x21c   :  { %5692 = vmatpush3.bf16.msra.mxu0 %v7143_v8 }
 0x21d   :  { %5693 = vmatprep.subr.bf16.mxu0 %v7151_v9 }
 0x220   :  { %5694 = vmatpush3.bf16.msra.mxu0 %v7151_v9 }
 0x221   :  { %5695 = vmatprep.subr.bf16.mxu0 %v7156_v10 }
 0x224   :  { %5696 = vmatpush3.bf16.msra.mxu0 %v7156_v10 }
 0x225   :  { %5697 = vmatprep.subr.bf16.mxu0 %v7163_v11 }
 0x228   :  { %5698 = vmatpush3.bf16.msra.mxu0 %v7163_v11 }
 0x229   :  { %5699 = vmatprep.subr.bf16.mxu0 %v7223_v28 }
 0x22c   :  { %5700 = vmatpush3.bf16.msra.mxu0 %v7223_v28 }
 0x22d   :  { %5701 = vmatprep.subr.bf16.mxu0 %v7230_v29 }
 0x230   :  { %5702 = vmatpush3.bf16.msra.mxu0 %v7230_v29 }
 0x231   :  { %5703 = vmatprep.subr.bf16.mxu0 %v7237_v30 }
 0x234   :  { %5704 = vmatpush3.bf16.msra.mxu0 %v7237_v30 }
 0x235   :  { %5709 = vmatprep.subr.bf16.mxu0 %v7244_v31 }
 0x2ea   :  { %v7451_v7 = vpop.f32.mrb[4].mxu0 }
 0x2eb   :  { %v7453_v8 = vpop.f32.mrb[5].mxu0  ;;  %v834_v51 = vmul.f32 %v7451_v7, %v7451_v7 }
 0x2ec   :  { %v7455_v9 = vpop.f32.mrb[6].mxu0  ;;  %5619 = vmatprep.mubr.f32.mxu1 %v7453_v8  ;;  %v832_v11 = vmul.f32 %v7453_v8, %v7453_v8 }
 0x2ed   :  { %v7458_v10 = vpop.f32.mrb[7].mxu0  ;;  %v835_v53 = vmul.f32 %v7455_v9, %v7455_v9 }
 0x2ee   :  { %5620 = vmatmul.mubr.f32.vlgmr.msra.gmra.mrb[12].mxu1 %v7458_v10  ;;  %v833_v50 = vmul.f32 %v7458_v10, %v7458_v10 }
 0x2ef   :  { %6558 = vmatpush3.bf16.msra.mxu1 %v7256_v35  ;;  %5622 = vmatprep.mubr.f32.mxu1 %v7451_v7 }
 0x2f0   :  { %6560 = vmatprep.subr.bf16.mxu1 %v7261_v37 }
 0x2f2   :  { %5623 = vmatmul.mubr.f32.gmra.mrb[14].mxu1 %v7455_v9 }
 0x2f3   :  { %6562 = vmatpush3.bf16.msra.mxu1 %v7261_v37  ;;  %5657 = vmatprep.mubr.f32.mxu1 %v832_v11 }
 0x2f4   :  { %6564 = vmatprep.subr.bf16.mxu1 %v7272_v40 }
 0x2f7   :  { %6566 = vmatpush3.bf16.msra.mxu1 %v7272_v40 }
 0x2f8   :  { %6568 = vmatprep.subr.bf16.mxu1 %v7282_v43 }
 0x2fb   :  { %6570 = vmatpush3.bf16.msra.mxu1 %v7282_v43 }
 0x2fc   :  { %6572 = vmatprep.subr.bf16.mxu1 %v7292_v46 }
 0x2ff   :  { %6574 = vmatpush3.bf16.msra.mxu1 %v7292_v46 }
 0x300   :  { %6576 = vmatprep.subr.bf16.mxu1 %v7302_v49 }
 0x303   :  { %6578 = vmatpush3.bf16.msra.mxu1 %v7302_v49 }
 0x304   :  { %6580 = vmatprep.subr.bf16.mxu1 %v7312_v52 }
 0x307   :  { %6582 = vmatpush3.bf16.msra.mxu1 %v7312_v52 }
 0x308   :  { %6584 = vmatprep.subr.bf16.mxu1 %v7322_v55 }
 0x30b   :  { %6586 = vmatpush3.bf16.msra.mxu1 %v7322_v55 }
 0x30c   :  { %5663 = vmatprep.subr.mxu1 %v8445_v54 }
 0x30e   :  { %5658 = vmatmul.mubr.f32.vlgmr.msra.gmra.mrb[16].mxu1 %v833_v50 }
 0x30f   :  { %5660 = vmatprep.mubr.f32.mxu1 %v834_v51  ;;  %5664 = vmatpush3.msra.mxu1 %v7490_v56 }
 0x310   :  { %5668 = vmatprep.subr.mxu1 %v8445_v54 }
 0x312   :  { %5661 = vmatmul.mubr.f32.gmra.mrb[18].mxu1 %v835_v53 }
 0x313   :  { %5665 = vmatprep.mubr.msk.f32.mxu1 %vm7044_vm2, %v8445_v54 }
 0x3c1   :  { %v5621_v57 = vpop.f32.mrb[12].mxu1 }
 0x3c2   :  { %v820_v58 = vsel %vm818_vm3, %v5621_v57, 0.0  ;;  %v799_v59 = vpop.f32.mrb[13].mxu1 }
 0x3c3   :  { %v819_v60 = vsel %vm818_vm3, %v799_v59, 0.0 }
 0x3c4   :  { %v821_v61 = vadd.f32 %v820_v58, %v819_v60 }
 0x3c5   :  { %v5624_v62 = vpop.f32.mrb[14].mxu1 }
 0x3c6   :  { %v809_v63 = vpop.f32.mrb[15].mxu1  ;;  %v824_v2 = vsel %vm818_vm3, %v5624_v62, 0.0 }
 0x3c7   :  { %v822_v0 = vsel %vm818_vm3, %v809_v63, 0.0 }
 0x3c8   :  { %v823_v1 = vadd.f32 %v822_v0, %v821_v61 }
 0x3ca   :  { %v825_v3 = vadd.f32 %v824_v2, %v823_v1 }
 0x3cc   :  { %v826_v5 = vrot.slane %v825_v3, 4 }
 0x3ce   :  { %v827_v13 = vadd.f32 %v826_v5, %v825_v3 }
 0x3d0   :  { %v828_v11 = vrot.slane %v827_v13, 2 }
 0x3d2   :  { %v829_v58 = vadd.f32 %v828_v11, %v827_v13  ;;  %v7507_v11 = vld [vmem:[%s8439_s6] sm:$0x1] }
 0x3d4   :  { %v830_v62 = vrot.slane %v829_v58, 1 }
 0x3d6   :  { %v831_v1 = vadd.f32 %v830_v62, %v829_v58  ;;  %v7515_v58 = vld [vmem:[%s8440_s7] sm:$0x1] }
 0x3d8   :  { %v934_v5 = vmul.f32 0.001953125, %v831_v1 }
 0x3da   :  { %v936_v54 = vmul.f32 %v934_v5, %v934_v5 }
 0x3e1   :  { %v5659_v14 = vpop.f32.mrb[16].mxu1 }
 0x3e2   :  { %v922_v15 = vsel %vm818_vm3, %v5659_v14, 0.0  ;;  %v902_v16 = vpop.f32.mrb[17].mxu1 }
 0x3e3   :  { %v921_v21 = vsel %vm818_vm3, %v902_v16, 0.0 }
 0x3e4   :  { %v923_v50 = vadd.f32 %v922_v15, %v921_v21 }
 0x3e5   :  { %v5662_v51 = vpop.f32.mrb[18].mxu1 }
 0x3e6   :  { %v912_v53 = vpop.f32.mrb[19].mxu1  ;;  %v926_v60 = vsel %vm818_vm3, %v5662_v51, 0.0 }
 0x3e7   :  { %v924_v57 = vsel %vm818_vm3, %v912_v53, 0.0  ;;  %v944_v53 = vlaneseq }
 0x3e8   :  { %v925_v59 = vadd.f32 %v924_v57, %v923_v50 }
 0x3e9   :  { %v945_v13 = vshrl.u32 %v944_v53, 7 }
 0x3ea   :  { %v927_v61 = vadd.f32 %v926_v60, %v925_v59  ;;  %v8488_v60 = vmov 0.0  }
 0x3eb   :  { %v7509_v50 = vsub.s32 0, %v945_v13 }
 0x3ec   :  { %v928_v63 = vrot.slane %v927_v61, 4 }
 0x3ee   :  { %v929_v0 = vadd.f32 %v928_v63, %v927_v61 }
 0x3f0   :  { %v930_v2 = vrot.slane %v929_v0, 2 }
 0x3f2   :  { %v931_v3 = vadd.f32 %v930_v2, %v929_v0 }
 0x3f4   :  { %v932_v14 = vrot.slane %v931_v3, 1 }
 0x3f6   :  { %v933_v16 = vadd.f32 %v932_v14, %v931_v3 }
 0x3f8   :  { %v935_v15 = vmul.f32 0.001953125, %v933_v16 }
 0x3fa   :  { %v937_v21 = vsub.f32 %v935_v15, %v936_v54 }
 0x3fc   :  { %v938_v30 = vadd.f32 1e-05, %v937_v21 }
 0x3fe   :  { %7017 = vrsqrt.f32 %v938_v30 }
 0x408   :  { %v7018_v51 = vpop.eup %7017 }
 0x409   :  { %v940_v57 = vmul.f32 %v7018_v51, %v7507_v11 }
 0x40b   :  { %v947_v54 = vrot.slane %v940_v57, %v7509_v50  ;;  %v941_v30 = vmul.f32 %v940_v57, %v934_v5 }
 0x40d   :  { %5666 = vmatmul.mubr.msk.f32.vlgmr.msra.gmra.mrb[20].mxu1 %vm818_vm3, %v947_v54  ;;  %v942_v59 = vsub.f32 %v7515_v58, %v941_v30 }
 0x40e   :  { %5669 = vmatpush3.msra.mxu1 %v7490_v56  ;;  %5670 = vmatprep.mubr.msk.f32.mxu1 %vm7044_vm2, %v8488_v60 }
 0x40f   :  { %v1032_v61 = vrot.slane %v942_v59, %v7509_v50 }
 0x411   :  { %5671 = vmatmul.mubr.msk.f32.vlgmr.msra.gmra.mrb[22].mxu1 %vm818_vm3, %v1032_v61 }
 0x412   :  { %5677 = vmatprep.mubr.msk.bf16.mxu1 %vm186_vm1, %v7131_v6 }
 0x4e0   :  { %v1016_v62 = vpop.f32.mrb[20].mxu1 }
 0x4e1   :  { %v1023_v63 = vrot.slane %v1016_v62, %v7509_v50  ;;  %v5667_v0 = vpop.f32.mrb[21].mxu1 }
 0x4e3   :  { %v1024_v1 = vmul.f32 %v1023_v63, %v7453_v8  ;;  %v1025_v2 = vmul.f32 %v1023_v63, %v7458_v10  ;;  %v1026_v3 = vmul.f32 %v7451_v7, %v1023_v63  ;;  %v1027_v5 = vmul.f32 %v7455_v9, %v1023_v63 }
 0x4e4   :  { %v1101_v14 = vpop.f32.mrb[22].mxu1 }
 0x4e5   :  { %v1108_v16 = vrot.slane %v1101_v14, %v7509_v50  ;;  %v5672_v15 = vpop.f32.mrb[23].mxu1 }
 0x4e7   :  { %v1109_v21 = vadd.f32 %v1108_v16, %v1024_v1  ;;  %v1110_v53 = vadd.f32 %v1108_v16, %v1025_v2  ;;  %v1111_v13 = vadd.f32 %v1108_v16, %v1026_v3  ;;  %v1112_v6 = vadd.f32 %v1108_v16, %v1027_v5 }
 0x4e9   :  { %v1113_v51 = vmax.f32 %v1109_v21, 0.0  ;;  %v1114_v57 = vmax.f32 %v1110_v53, 0.0  ;;  %v1115_v54 = vmax.f32 %v1111_v13, 0.0  ;;  %v1116_v30 = vmax.f32 %v1112_v6, 0.0 }
 0x4eb   :  { %v1117_v8 = vadd.f32 %v1113_v51, %v7173_v17  ;;  %v1118_v10 = vadd.f32 %v1114_v57, %v7177_v19  ;;  %v1119_v7 = vadd.f32 %v1115_v54, %v7179_v20  ;;  %v1120_v9 = vadd.f32 %v1116_v30, %v7175_v18 }
 0x4ed   :  { %v1121_v59 = vpack.c.bf16 %v1118_v10, %v1117_v8  ;;  %v1122_v61 = vpack.c.bf16 %v1120_v9, %v1119_v7 }
 0x4ef   :  { %5673 = vmatprep.subr.bf16.mxu1 %v1121_v59 }
 0x4f0   :  { %5674 = vmatpush3.bf16.msra.mxu1 %v1121_v59 }
 0x4f1   :  { %5675 = vmatprep.subr.bf16.mxu1 %v1122_v61 }
 0x4f4   :  { %5676 = vmatpush3.bf16.msra.mxu1 %v1122_v61 }
 0x4f5   :  { %5681 = vmatprep.subr.bf16.mxu1 %v1121_v59 }
 0x4f7   :  { %5678 = vmatmul.mubr.msk.bf16.vlgmr.msra.gmra.mrb[24].mxu1 %vm186_vm1, %v7188_v23 }
 0x4f8   :  { %5682 = vmatpush3.bf16.msra.mxu1 %v1121_v59  ;;  %5685 = vmatprep.mubr.msk.bf16.mxu1 %vm186_vm1, %v7193_v24 }
 0x4f9   :  { %5683 = vmatprep.subr.bf16.mxu1 %v1122_v61 }
 0x4fc   :  { %5684 = vmatpush3.bf16.msra.mxu1 %v1122_v61 }
 0x4fd   :  { %5729 = vmatprep.subr.bf16.mxu1 %v1121_v59 }
 0x4ff   :  { %5686 = vmatmul.mubr.msk.bf16.vlgmr.msra.gmra.mrb[28].mxu1 %vm186_vm1, %v7202_v25 }
 0x500   :  { %5730 = vmatpush3.bf16.msra.mxu1 %v1121_v59  ;;  %5733 = vmatprep.mubr.msk.bf16.mxu1 %vm186_vm1, %v7207_v26 }
 0x501   :  { %5731 = vmatprep.subr.bf16.mxu1 %v1122_v61 }
 0x504   :  { %5732 = vmatpush3.bf16.msra.mxu1 %v1122_v61 }
 0x505   :  { %6588 = vmatprep.subr.bf16.mxu1 %v7256_v35 }
 0x507   :  { %5734 = vmatmul.mubr.msk.bf16.vlgmr.msra.gmra.mrb[32].mxu1 %vm186_vm1, %v7216_v27 }
 0x508   :  { %6590 = vmatpush3.bf16.msra.mxu1 %v7256_v35 }
 0x509   :  { %6592 = vmatprep.subr.bf16.mxu1 %v7261_v37 }
 0x50c   :  { %6594 = vmatpush3.bf16.msra.mxu1 %v7261_v37 }
 0x50d   :  { %6596 = vmatprep.subr.bf16.mxu1 %v7272_v40 }
 0x510   :  { %6598 = vmatpush3.bf16.msra.mxu1 %v7272_v40 }
 0x511   :  { %6600 = vmatprep.subr.bf16.mxu1 %v7282_v43 }
 0x514   :  { %6602 = vmatpush3.bf16.msra.mxu1 %v7282_v43 }
 0x515   :  { %6604 = vmatprep.subr.bf16.mxu1 %v7292_v46 }
 0x518   :  { %6606 = vmatpush3.bf16.msra.mxu1 %v7292_v46 }
 0x519   :  { %6608 = vmatprep.subr.bf16.mxu1 %v7302_v49 }
 0x51c   :  { %6610 = vmatpush3.bf16.msra.mxu1 %v7302_v49 }
 0x51d   :  { %6612 = vmatprep.subr.bf16.mxu1 %v7312_v52 }
 0x520   :  { %6614 = vmatpush3.bf16.msra.mxu1 %v7312_v52 }
 0x521   :  { %6616 = vmatprep.subr.bf16.mxu1 %v7322_v55 }
 0x524   :  { %6618 = vmatpush3.bf16.msra.mxu1 %v7322_v55 }
 0x525   :  { %6620 = vmatprep.subr.bf16.mxu1 %v7256_v35 }
 0x5ca   :  { %v5679_v62 = vpop.f32.mrb[24].mxu1 }
 0x5cb   :  { %v1157_v63 = vpop.f32.mrb[25].mxu1 }
 0x5cc   :  { %v5680_v0 = vpop.f32.mrb[26].mxu1 }
 0x5cd   :  { %v1173_v1 = vpack.c.bf16 %v5680_v0, %v5679_v62  ;;  %v1160_v2 = vpop.f32.mrb[27].mxu1 }
 0x5ce   :  { %v1172_v3 = vpack.c.bf16 %v1160_v2, %v1157_v63 }
 0x5d2   :  { %v5687_v5 = vpop.f32.mrb[28].mxu1 }
 0x5d3   :  { %v1208_v14 = vpop.f32.mrb[29].mxu1 }
 0x5d4   :  { %v5688_v16 = vpop.f32.mrb[30].mxu1 }
 0x5d5   :  { %v1224_v15 = vpack.c.bf16 %v5688_v16, %v5687_v5  ;;  %v1211_v21 = vpop.f32.mrb[31].mxu1 }
 0x5d6   :  { %v1223_v53 = vpack.c.bf16 %v1211_v21, %v1208_v14 }
 0x5d8   :  { %5705 = vmatprep.mubr.bf16.mxu0 %v1223_v53 }
 0x5d9   :  { %5706 = vmatmul.mubr.bf16.vlgmr.msra.gmra.mrb[8].mxu0 %v1224_v15 }
 0x5da   :  { %5710 = vmatpush3.bf16.msra.mxu0 %v7244_v31  ;;  %5725 = vmatprep.mubr.bf16.mxu0 %v1172_v3  ;;  %v5735_v13 = vpop.f32.mrb[32].mxu1 }
 0x5db   :  { %5711 = vmatprep.subr.bf16.mxu0 %v7331_v4  ;;  %v1357_v6 = vpop.f32.mrb[33].mxu1 }
 0x5dc   :  { %v5736_v51 = vpop.f32.mrb[34].mxu1 }
 0x5dd   :  { %v1373_v57 = vpack.c.bf16 %v5736_v51, %v5735_v13  ;;  %v1360_v54 = vpop.f32.mrb[35].mxu1 }
 0x5de   :  { %5712 = vmatpush3.bf16.msra.mxu0 %v7331_v4  ;;  %v1372_v30 = vpack.c.bf16 %v1360_v54, %v1357_v6 }
 0x5df   :  { %5713 = vmatprep.subr.bf16.mxu0 %v7338_v12 }
 0x5e2   :  { %5714 = vmatpush3.bf16.msra.mxu0 %v7338_v12 }
 0x5e3   :  { %5715 = vmatprep.subr.bf16.mxu0 %v7345_v22 }
 0x5e6   :  { %5716 = vmatpush3.bf16.msra.mxu0 %v7345_v22 }
 0x5e7   :  { %5717 = vmatprep.subr.bf16.mxu0 %v7352_v32 }
 0x5ea   :  { %5718 = vmatpush3.bf16.msra.mxu0 %v7352_v32 }
 0x5eb   :  { %5719 = vmatprep.subr.bf16.mxu0 %v7359_v33 }
 0x5ee   :  { %5720 = vmatpush3.bf16.msra.mxu0 %v7359_v33 }
 0x5ef   :  { %5721 = vmatprep.subr.bf16.mxu0 %v7366_v34 }
 0x5f2   :  { %5722 = vmatpush3.bf16.msra.mxu0 %v7366_v34 }
 0x5f3   :  { %5723 = vmatprep.subr.bf16.mxu0 %v7373_v36 }
 0x5f6   :  { %5724 = vmatpush3.bf16.msra.mxu0 %v7373_v36 }
 0x5f7   :  { %5737 = vmatprep.subr.bf16.mxu0 %v7380_v38 }
 0x5f9   :  { %5726 = vmatmul.mubr.bf16.vlgmr.msra.gmra.mrb[8].mxu0 %v1173_v1 }
 0x5fa   :  { %5738 = vmatpush3.bf16.msra.mxu0 %v7380_v38  ;;  %5753 = vmatprep.mubr.bf16.mxu0 %v1372_v30 }
 0x5fb   :  { %5739 = vmatprep.subr.bf16.mxu0 %v7387_v39 }
 0x5fe   :  { %5740 = vmatpush3.bf16.msra.mxu0 %v7387_v39 }
 0x5ff   :  { %5741 = vmatprep.subr.bf16.mxu0 %v7394_v41 }
 0x602   :  { %5742 = vmatpush3.bf16.msra.mxu0 %v7394_v41 }
 0x603   :  { %5743 = vmatprep.subr.bf16.mxu0 %v7401_v42 }
 0x606   :  { %5744 = vmatpush3.bf16.msra.mxu0 %v7401_v42 }
 0x607   :  { %5745 = vmatprep.subr.bf16.mxu0 %v7408_v44 }
 0x60a   :  { %5746 = vmatpush3.bf16.msra.mxu0 %v7408_v44 }
 0x60b   :  { %5747 = vmatprep.subr.bf16.mxu0 %v7415_v45 }
 0x60e   :  { %5748 = vmatpush3.bf16.msra.mxu0 %v7415_v45 }
 0x60f   :  { %5749 = vmatprep.subr.bf16.mxu0 %v7422_v47 }
 0x612   :  { %5750 = vmatpush3.bf16.msra.mxu0 %v7422_v47 }
 0x613   :  { %5751 = vmatprep.subr.bf16.mxu0 %v7429_v48 }
 0x616   :  { %5752 = vmatpush3.bf16.msra.mxu0 %v7429_v48 }
 0x619   :  { %5754 = vmatmul.mubr.bf16.vlgmr.msra.gmra.mrb[8].mxu0 %v1373_v57 }
 0x61a   :  { %5903 = vmatprep.mubr.msk.bf16.mxu0 %vm186_vm1, %v7207_v26 }
 0x6ec   :  { %v7597_v8 = vpop.f32.mrb[8].mxu0 }
 0x6ed   :  { %v7599_v10 = vpop.f32.mrb[9].mxu0  ;;  %v1527_v61 = vmul.f32 %v7597_v8, %v7597_v8 }
 0x6ee   :  { %v7601_v7 = vpop.f32.mrb[10].mxu0  ;;  %5789 = vmatprep.mubr.f32.mxu1 %v7599_v10  ;;  %v1525_v26 = vmul.f32 %v7599_v10, %v7599_v10 }
 0x6ef   :  { %v7604_v9 = vpop.f32.mrb[11].mxu0  ;;  %v1528_v62 = vmul.f32 %v7601_v7, %v7601_v7 }
 0x6f0   :  { %5790 = vmatmul.mubr.f32.vlgmr.msra.gmra.mrb[36].mxu1 %v7604_v9  ;;  %v1526_v59 = vmul.f32 %v7604_v9, %v7604_v9 }
 0x6f1   :  { %6622 = vmatpush3.bf16.msra.mxu1 %v7256_v35  ;;  %5792 = vmatprep.mubr.f32.mxu1 %v7597_v8 }
 0x6f2   :  { %6624 = vmatprep.subr.bf16.mxu1 %v7261_v37 }
 0x6f4   :  { %5793 = vmatmul.mubr.f32.gmra.mrb[38].mxu1 %v7601_v7 }
 0x6f5   :  { %6626 = vmatpush3.bf16.msra.mxu1 %v7261_v37  ;;  %5827 = vmatprep.mubr.f32.mxu1 %v1525_v26 }
 0x6f6   :  { %6628 = vmatprep.subr.bf16.mxu1 %v7272_v40 }
 0x6f9   :  { %6630 = vmatpush3.bf16.msra.mxu1 %v7272_v40 }
 0x6fa   :  { %6632 = vmatprep.subr.bf16.mxu1 %v7282_v43 }
 0x6fd   :  { %6634 = vmatpush3.bf16.msra.mxu1 %v7282_v43 }
 0x6fe   :  { %6636 = vmatprep.subr.bf16.mxu1 %v7292_v46 }
 0x701   :  { %6638 = vmatpush3.bf16.msra.mxu1 %v7292_v46 }
 0x702   :  { %6640 = vmatprep.subr.bf16.mxu1 %v7302_v49 }
 0x705   :  { %6642 = vmatpush3.bf16.msra.mxu1 %v7302_v49 }
 0x706   :  { %6644 = vmatprep.subr.bf16.mxu1 %v7312_v52 }
 0x709   :  { %6646 = vmatpush3.bf16.msra.mxu1 %v7312_v52 }
 0x70a   :  { %6648 = vmatprep.subr.bf16.mxu1 %v7322_v55 }
 0x70d   :  { %6650 = vmatpush3.bf16.msra.mxu1 %v7322_v55 }
 0x70e   :  { %5833 = vmatprep.subr.mxu1 %v8488_v60 }
 0x710   :  { %5828 = vmatmul.mubr.f32.vlgmr.msra.gmra.mrb[40].mxu1 %v1526_v59 }
 0x711   :  { %5830 = vmatprep.mubr.f32.mxu1 %v1527_v61  ;;  %5834 = vmatpush3.msra.mxu1 %v7490_v56 }
 0x712   :  { %5838 = vmatprep.subr.mxu1 %v8488_v60 }
 0x714   :  { %5831 = vmatmul.mubr.f32.gmra.mrb[42].mxu1 %v1528_v62 }
 0x715   :  { %5835 = vmatprep.mubr.msk.f32.mxu1 %vm7044_vm2, %v8488_v60 }
 0x7c3   :  { %v5791_v63 = vpop.f32.mrb[36].mxu1 }
 0x7c4   :  { %v1513_v0 = vsel %vm818_vm3, %v5791_v63, 0.0  ;;  %v1493_v1 = vpop.f32.mrb[37].mxu1 }
 0x7c5   :  { %v1512_v2 = vsel %vm818_vm3, %v1493_v1, 0.0 }
 0x7c6   :  { %v1514_v3 = vadd.f32 %v1513_v0, %v1512_v2 }
 0x7c7   :  { %v5794_v5 = vpop.f32.mrb[38].mxu1 }
 0x7c8   :  { %v1503_v14 = vpop.f32.mrb[39].mxu1  ;;  %v1517_v21 = vsel %vm818_vm3, %v5794_v5, 0.0 }
 0x7c9   :  { %v1515_v16 = vsel %vm818_vm3, %v1503_v14, 0.0 }
 0x7ca   :  { %v1516_v15 = vadd.f32 %v1515_v16, %v1514_v3 }
 0x7cc   :  { %v1518_v53 = vadd.f32 %v1517_v21, %v1516_v15 }
 0x7ce   :  { %v1519_v13 = vrot.slane %v1518_v53, 4 }
 0x7d0   :  { %v1520_v6 = vadd.f32 %v1519_v13, %v1518_v53 }
 0x7d2   :  { %v1521_v26 = vrot.slane %v1520_v6, 2 }
 0x7d4   :  { %v1522_v0 = vadd.f32 %v1521_v26, %v1520_v6 }
 0x7d6   :  { %v1523_v5 = vrot.slane %v1522_v0, 1 }
 0x7d8   :  { %v1524_v15 = vadd.f32 %v1523_v5, %v1522_v0 }
 0x7da   :  { %v1627_v13 = vmul.f32 0.001953125, %v1524_v15 }
 0x7dc   :  { %v1629_v48 = vmul.f32 %v1627_v13, %v1627_v13 }
 0x7e3   :  { %v5829_v51 = vpop.f32.mrb[40].mxu1 }
 0x7e4   :  { %v1615_v57 = vsel %vm818_vm3, %v5829_v51, 0.0  ;;  %v1595_v54 = vpop.f32.mrb[41].mxu1 }
 0x7e5   :  { %v1614_v30 = vsel %vm818_vm3, %v1595_v54, 0.0 }
 0x7e6   :  { %v1616_v59 = vadd.f32 %v1615_v57, %v1614_v30 }
 0x7e7   :  { %v5832_v61 = vpop.f32.mrb[42].mxu1 }
 0x7e8   :  { %v1605_v62 = vpop.f32.mrb[43].mxu1  ;;  %v1619_v2 = vsel %vm818_vm3, %v5832_v61, 0.0 }
 0x7e9   :  { %v1617_v63 = vsel %vm818_vm3, %v1605_v62, 0.0 }
 0x7ea   :  { %v1618_v1 = vadd.f32 %v1617_v63, %v1616_v59 }
 0x7ec   :  { %v1620_v3 = vadd.f32 %v1619_v2, %v1618_v1 }
 0x7ee   :  { %v1621_v14 = vrot.slane %v1620_v3, 4 }
 0x7f0   :  { %v1622_v16 = vadd.f32 %v1621_v14, %v1620_v3 }
 0x7f2   :  { %v1623_v21 = vrot.slane %v1622_v16, 2 }
 0x7f4   :  { %v1624_v53 = vadd.f32 %v1623_v21, %v1622_v16 }
 0x7f6   :  { %v1625_v51 = vrot.slane %v1624_v53, 1 }
 0x7f8   :  { %v1626_v54 = vadd.f32 %v1625_v51, %v1624_v53 }
 0x7fa   :  { %v1628_v57 = vmul.f32 0.001953125, %v1626_v54 }
 0x7fc   :  { %v1630_v30 = vsub.f32 %v1628_v57, %v1629_v48 }
 0x7fe   :  { %v1631_v47 = vadd.f32 1e-05, %v1630_v30 }
 0x800   :  { %7019 = vrsqrt.f32 %v1631_v47  ;;  %v7657_v47 = vld [vmem:[%s8434_s3] sm:$0xff]  }
 0x80a   :  { %v7020_v62 = vpop.eup %7019 }
 0x80b   :  { %v1633_v6 = vmul.f32 %v7020_v62, %v7507_v11 }
 0x80d   :  { %v1640_v26 = vrot.slane %v1633_v6, %v7509_v50  ;;  %v1634_v59 = vmul.f32 %v1633_v6, %v1627_v13 }
 0x80f   :  { %5836 = vmatmul.mubr.msk.f32.vlgmr.msra.gmra.mrb[44].mxu1 %vm818_vm3, %v1640_v26  ;;  %v1635_v61 = vsub.f32 %v7515_v58, %v1634_v59 }
 0x810   :  { %5839 = vmatpush3.msra.mxu1 %v7490_v56  ;;  %5840 = vmatprep.mubr.msk.f32.mxu1 %vm7044_vm2, %v8488_v60 }
 0x811   :  { %v1725_v63 = vrot.slane %v1635_v61, %v7509_v50  ;;  %v7030_v61 = vld [vmem:[%s8435_s4 + $0x40] sm:$0xff]  }
 0x813   :  { %5841 = vmatmul.mubr.msk.f32.vlgmr.msra.gmra.mrb[46].mxu1 %vm818_vm3, %v1725_v63  ;;  %v8489_v63 = vld [vmem:[#allocation6_spill] sm:$0xff] }
 0x814   :  { %5847 = vmatprep.mubr.msk.bf16.mxu1 %vm186_vm1, %v7657_v47 }
 0x8e2   :  { %v1709_v48 = vpop.f32.mrb[44].mxu1 }
 0x8e3   :  { %v1716_v0 = vrot.slane %v1709_v48, %v7509_v50  ;;  %v5837_v1 = vpop.f32.mrb[45].mxu1 }
 0x8e5   :  { %v1717_v2 = vmul.f32 %v1716_v0, %v7599_v10  ;;  %v1718_v3 = vmul.f32 %v1716_v0, %v7604_v9  ;;  %v1719_v5 = vmul.f32 %v7597_v8, %v1716_v0  ;;  %v1720_v14 = vmul.f32 %v7601_v7, %v1716_v0 }
 0x8e6   :  { %v1794_v16 = vpop.f32.mrb[46].mxu1 }
 0x8e7   :  { %v1801_v15 = vrot.slane %v1794_v16, %v7509_v50  ;;  %v5842_v21 = vpop.f32.mrb[47].mxu1 }
 0x8e9   :  { %v1802_v53 = vadd.f32 %v1801_v15, %v1717_v2  ;;  %v1803_v13 = vadd.f32 %v1801_v15, %v1718_v3  ;;  %v1804_v51 = vadd.f32 %v1801_v15, %v1719_v5  ;;  %v1805_v54 = vadd.f32 %v1801_v15, %v1720_v14 }
 0x8eb   :  { %v1806_v57 = vmax.f32 %v1802_v53, 0.0  ;;  %v1807_v30 = vmax.f32 %v1803_v13, 0.0  ;;  %v1808_v62 = vmax.f32 %v1804_v51, 0.0  ;;  %v1809_v6 = vmax.f32 %v1805_v54, 0.0 }
 0x8ed   :  { %v1810_v10 = vadd.f32 %v1806_v57, %v7173_v17  ;;  %v1811_v9 = vadd.f32 %v1807_v30, %v7177_v19  ;;  %v1812_v8 = vadd.f32 %v1808_v62, %v7179_v20  ;;  %v1813_v7 = vadd.f32 %v1809_v6, %v7175_v18 }
 0x8ef   :  { %v1814_v26 = vpack.c.bf16 %v1811_v9, %v1810_v10  ;;  %v1815_v59 = vpack.c.bf16 %v1813_v7, %v1812_v8 }
 0x8f1   :  { %5843 = vmatprep.subr.bf16.mxu1 %v1814_v26  ;;  %5899 = vmatprep.subr.bf16.mxu0 %v1814_v26 }
 0x8f2   :  { %5844 = vmatpush3.bf16.msra.mxu1 %v1814_v26  ;;  %5900 = vmatpush3.bf16.msra.mxu0 %v1814_v26 }
 0x8f3   :  { %5845 = vmatprep.subr.bf16.mxu1 %v1815_v59  ;;  %5901 = vmatprep.subr.bf16.mxu0 %v1815_v59 }
 0x8f6   :  { %5846 = vmatpush3.bf16.msra.mxu1 %v1815_v59  ;;  %5902 = vmatpush3.bf16.msra.mxu0 %v1815_v59 }
 0x8f7   :  { %5851 = vmatprep.subr.bf16.mxu1 %v1814_v26  ;;  %6652 = vmatprep.subr.bf16.mxu0 %v7256_v35 }
 0x8f9   :  { %5848 = vmatmul.mubr.msk.bf16.vlgmr.msra.gmra.mrb[48].mxu1 %vm186_vm1, %v7188_v23  ;;  %5904 = vmatmul.mubr.msk.bf16.vlgmr.msra.gmra.mrb[12].mxu0 %vm186_vm1, %v7216_v27  ;;  %v7031_v23 = vld [vmem:[%s8435_s4 + $0x48] sm:$0xff]   ;;  %v7034_v27 = vld [vmem:[%s8435_s4 + $0x60] sm:$0xff]  }
 0x8fa   :  { %5852 = vmatpush3.bf16.msra.mxu1 %v1814_v26  ;;  %5855 = vmatprep.mubr.msk.bf16.mxu1 %vm186_vm1, %v7193_v24  ;;  %v7032_v24 = vld [vmem:[%s8435_s4 + $0x50] sm:$0xff]  }
 0x8fb   :  { %5853 = vmatprep.subr.bf16.mxu1 %v1815_v59  ;;  %6654 = vmatpush3.bf16.msra.mxu0 %v7256_v35 }
 0x8fc   :  { %6656 = vmatprep.subr.bf16.mxu0 %v7261_v37 }
 0x8fe   :  { %5854 = vmatpush3.bf16.msra.mxu1 %v1815_v59 }
 0x8ff   :  { %5859 = vmatprep.subr.bf16.mxu1 %v7030_v61  ;;  %6658 = vmatpush3.bf16.msra.mxu0 %v7261_v37 }
 0x900   :  { %6660 = vmatprep.subr.bf16.mxu0 %v7272_v40 }
 0x901   :  { %5856 = vmatmul.mubr.msk.bf16.vlgmr.msra.gmra.mrb[52].mxu1 %vm186_vm1, %v7202_v25  ;;  %v7033_v25 = vld [vmem:[%s8435_s4 + $0x58] sm:$0xff]  }
 0x902   :  { %5860 = vmatpush3.bf16.msra.mxu1 %v7030_v61 }
 0x903   :  { %5861 = vmatprep.subr.bf16.mxu1 %v7031_v23  ;;  %6662 = vmatpush3.bf16.msra.mxu0 %v7272_v40 }
 0x904   :  { %6664 = vmatprep.subr.bf16.mxu0 %v7282_v43 }
 0x906   :  { %5862 = vmatpush3.bf16.msra.mxu1 %v7031_v23 }
 0x907   :  { %5863 = vmatprep.subr.bf16.mxu1 %v7032_v24  ;;  %6666 = vmatpush3.bf16.msra.mxu0 %v7282_v43 }
 0x908   :  { %6668 = vmatprep.subr.bf16.mxu0 %v7292_v46 }
 0x90a   :  { %5864 = vmatpush3.bf16.msra.mxu1 %v7032_v24 }
 0x90b   :  { %5865 = vmatprep.subr.bf16.mxu1 %v7033_v25  ;;  %6670 = vmatpush3.bf16.msra.mxu0 %v7292_v46 }
 0x90c   :  { %6672 = vmatprep.subr.bf16.mxu0 %v7302_v49 }
 0x90e   :  { %5866 = vmatpush3.bf16.msra.mxu1 %v7033_v25 }
 0x90f   :  { %5867 = vmatprep.subr.bf16.mxu1 %v7034_v27  ;;  %6674 = vmatpush3.bf16.msra.mxu0 %v7302_v49 }
 0x910   :  { %6676 = vmatprep.subr.bf16.mxu0 %v7312_v52 }
 0x912   :  { %5868 = vmatpush3.bf16.msra.mxu1 %v7034_v27 }
 0x913   :  { %5869 = vmatprep.subr.bf16.mxu1 %v7223_v28  ;;  %6678 = vmatpush3.bf16.msra.mxu0 %v7312_v52 }
 0x914   :  { %6680 = vmatprep.subr.bf16.mxu0 %v7322_v55 }
 0x916   :  { %5870 = vmatpush3.bf16.msra.mxu1 %v7223_v28 }
 0x917   :  { %5871 = vmatprep.subr.bf16.mxu1 %v7230_v29  ;;  %6682 = vmatpush3.bf16.msra.mxu0 %v7322_v55 }
 0x918   :  { %6684 = vmatprep.subr.bf16.mxu0 %v7256_v35 }
 0x91a   :  { %5872 = vmatpush3.bf16.msra.mxu1 %v7230_v29 }
 0x91b   :  { %5873 = vmatprep.subr.bf16.mxu1 %v8489_v63 }
 0x91e   :  { %5874 = vmatpush3.bf16.msra.mxu1 %v8489_v63 }
 0x91f   :  { %5879 = vmatprep.subr.bf16.mxu1 %v7244_v31  ;;  %v7035_v31 = vld [vmem:[%s8435_s4] sm:$0xff]  }
 0x9cc   :  { %v5849_v48 = vpop.f32.mrb[48].mxu1  ;;  %v5905_v0 = vpop.f32.mrb[12].mxu0 }
 0x9cd   :  { %v1850_v1 = vpop.f32.mrb[49].mxu1  ;;  %v2050_v2 = vpop.f32.mrb[13].mxu0 }
 0x9ce   :  { %v5850_v3 = vpop.f32.mrb[50].mxu1  ;;  %v5906_v28 = vpop.f32.mrb[14].mxu0 }
 0x9cf   :  { %v1866_v5 = vpack.c.bf16 %v5850_v3, %v5849_v48  ;;  %v1853_v14 = vpop.f32.mrb[51].mxu1  ;;  %v2066_v16 = vpack.c.bf16 %v5906_v28, %v5905_v0  ;;  %v2053_v15 = vpop.f32.mrb[15].mxu0 }
 0x9d0   :  { %v1865_v21 = vpack.c.bf16 %v1853_v14, %v1850_v1  ;;  %v2065_v53 = vpack.c.bf16 %v2053_v15, %v2050_v2 }
 0x9d4   :  { %v5857_v13 = vpop.f32.mrb[52].mxu1 }
 0x9d5   :  { %v1901_v29 = vpop.f32.mrb[53].mxu1 }
 0x9d6   :  { %v5858_v51 = vpop.f32.mrb[54].mxu1 }
 0x9d7   :  { %v1917_v54 = vpack.c.bf16 %v5858_v51, %v5857_v13  ;;  %v1904_v57 = vpop.f32.mrb[55].mxu1 }
 0x9d8   :  { %v1916_v30 = vpack.c.bf16 %v1904_v57, %v1901_v29 }
 0x9da   :  { %5875 = vmatprep.mubr.bf16.mxu1 %v1916_v30 }
 0x9db   :  { %5876 = vmatmul.mubr.bf16.vlgmr.msra.gmra.mrb[56].mxu1 %v1917_v54 }
 0x9dc   :  { %5880 = vmatpush3.bf16.msra.mxu1 %v7035_v31  ;;  %5895 = vmatprep.mubr.bf16.mxu1 %v1865_v21 }
 0x9dd   :  { %5881 = vmatprep.subr.bf16.mxu1 %v7331_v4 }
 0x9e0   :  { %5882 = vmatpush3.bf16.msra.mxu1 %v7331_v4  ;;  %v8490_v4 = vld [vmem:[#allocation7_spill] sm:$0xff] }
 0x9e1   :  { %5883 = vmatprep.subr.bf16.mxu1 %v7338_v12 }
 0x9e4   :  { %5884 = vmatpush3.bf16.msra.mxu1 %v7338_v12  ;;  %v8491_v12 = vld [vmem:[#allocation8_spill] sm:$0xff] }
 0x9e5   :  { %5885 = vmatprep.subr.bf16.mxu1 %v7345_v22 }
 0x9e8   :  { %5886 = vmatpush3.bf16.msra.mxu1 %v7345_v22  ;;  %v7754_v22 = vld [vmem:[%s8434_s3 + $0x10] sm:$0xff]  }
 0x9e9   :  { %5887 = vmatprep.subr.bf16.mxu1 %v7352_v32  ;;  %8492 = vst [vmem:[#allocation6_spill] sm:$0xff] %v7754_v22 }
 0x9ec   :  { %5888 = vmatpush3.bf16.msra.mxu1 %v7352_v32 }
 0x9ed   :  { %5889 = vmatprep.subr.bf16.mxu1 %v7359_v33 }
 0x9f0   :  { %5890 = vmatpush3.bf16.msra.mxu1 %v7359_v33 }
 0x9f1   :  { %5891 = vmatprep.subr.bf16.mxu1 %v7366_v34 }
 0x9f4   :  { %5892 = vmatpush3.bf16.msra.mxu1 %v7366_v34 }
 0x9f5   :  { %5893 = vmatprep.subr.bf16.mxu1 %v7373_v36 }
 0x9f8   :  { %5894 = vmatpush3.bf16.msra.mxu1 %v7373_v36 }
 0x9f9   :  { %5907 = vmatprep.subr.bf16.mxu1 %v7380_v38 }
 0x9fb   :  { %5896 = vmatmul.mubr.bf16.vlgmr.msra.gmra.mrb[56].mxu1 %v1866_v5 }
 0x9fc   :  { %5908 = vmatpush3.bf16.msra.mxu1 %v7380_v38  ;;  %5923 = vmatprep.mubr.bf16.mxu1 %v2065_v53 }
 0x9fd   :  { %5909 = vmatprep.subr.bf16.mxu1 %v7387_v39 }
 0xa00   :  { %5910 = vmatpush3.bf16.msra.mxu1 %v7387_v39 }
 0xa01   :  { %5911 = vmatprep.subr.bf16.mxu1 %v7394_v41 }
 0xa04   :  { %5912 = vmatpush3.bf16.msra.mxu1 %v7394_v41 }
 0xa05   :  { %5913 = vmatprep.subr.bf16.mxu1 %v7401_v42 }
 0xa08   :  { %5914 = vmatpush3.bf16.msra.mxu1 %v7401_v42 }
 0xa09   :  { %5915 = vmatprep.subr.bf16.mxu1 %v7408_v44 }
 0xa0c   :  { %5916 = vmatpush3.bf16.msra.mxu1 %v7408_v44 }
 0xa0d   :  { %5917 = vmatprep.subr.bf16.mxu1 %v7415_v45 }
 0xa10   :  { %5918 = vmatpush3.bf16.msra.mxu1 %v7415_v45 }
 0xa11   :  { %5919 = vmatprep.subr.bf16.mxu1 %v8490_v4 }
 0xa14   :  { %5920 = vmatpush3.bf16.msra.mxu1 %v8490_v4 }
 0xa15   :  { %5921 = vmatprep.subr.bf16.mxu1 %v8491_v12 }
 0xa18   :  { %5922 = vmatpush3.bf16.msra.mxu1 %v8491_v12 }
 0xa1b   :  { %5924 = vmatmul.mubr.bf16.vlgmr.msra.gmra.mrb[56].mxu1 %v2066_v16 }
 0xa1c   :  { %6025 = vmatprep.mubr.msk.bf16.mxu1 %vm186_vm1, %v7754_v22 }
 0xaee   :  { %v7758_v32 = vpop.f32.mrb[56].mxu1 }
 0xaef   :  { %v7760_v33 = vpop.f32.mrb[57].mxu1  ;;  %v2220_v41 = vmul.f32 %v7758_v32, %v7758_v32 }
 0xaf0   :  { %v7762_v34 = vpop.f32.mrb[58].mxu1  ;;  %5959 = vmatprep.mubr.f32.mxu0 %v7760_v33  ;;  %v2218_v38 = vmul.f32 %v7760_v33, %v7760_v33 }
 0xaf1   :  { %v7765_v36 = vpop.f32.mrb[59].mxu1  ;;  %v2221_v42 = vmul.f32 %v7762_v34, %v7762_v34 }
 0xaf2   :  { %5960 = vmatmul.mubr.f32.vlgmr.msra.gmra.mrb[16].mxu0 %v7765_v36  ;;  %v2219_v39 = vmul.f32 %v7765_v36, %v7765_v36 }
 0xaf3   :  { %6686 = vmatpush3.bf16.msra.mxu0 %v7256_v35  ;;  %5962 = vmatprep.mubr.f32.mxu0 %v7758_v32 }
 0xaf4   :  { %6688 = vmatprep.subr.bf16.mxu0 %v7261_v37 }
 0xaf6   :  { %5963 = vmatmul.mubr.f32.gmra.mrb[18].mxu0 %v7762_v34 }
 0xaf7   :  { %6690 = vmatpush3.bf16.msra.mxu0 %v7261_v37  ;;  %5997 = vmatprep.mubr.f32.mxu0 %v2218_v38 }
 0xaf8   :  { %6692 = vmatprep.subr.bf16.mxu0 %v7272_v40 }
 0xafb   :  { %6694 = vmatpush3.bf16.msra.mxu0 %v7272_v40 }
 0xafc   :  { %6696 = vmatprep.subr.bf16.mxu0 %v7282_v43 }
 0xaff   :  { %6698 = vmatpush3.bf16.msra.mxu0 %v7282_v43 }
 0xb00   :  { %6700 = vmatprep.subr.bf16.mxu0 %v7292_v46 }
 0xb03   :  { %6702 = vmatpush3.bf16.msra.mxu0 %v7292_v46 }
 0xb04   :  { %6704 = vmatprep.subr.bf16.mxu0 %v7302_v49 }
 0xb07   :  { %6706 = vmatpush3.bf16.msra.mxu0 %v7302_v49 }
 0xb08   :  { %6708 = vmatprep.subr.bf16.mxu0 %v7312_v52 }
 0xb0b   :  { %6710 = vmatpush3.bf16.msra.mxu0 %v7312_v52 }
 0xb0c   :  { %6712 = vmatprep.subr.bf16.mxu0 %v7322_v55 }
 0xb0f   :  { %6714 = vmatpush3.bf16.msra.mxu0 %v7322_v55 }
 0xb10   :  { %6003 = vmatprep.subr.mxu0 %v8488_v60 }
 0xb12   :  { %5998 = vmatmul.mubr.f32.vlgmr.msra.gmra.mrb[20].mxu0 %v2219_v39 }
 0xb13   :  { %6000 = vmatprep.mubr.f32.mxu0 %v2220_v41  ;;  %6004 = vmatpush3.msra.mxu0 %v7490_v56 }
 0xb14   :  { %6008 = vmatprep.subr.mxu0 %v8488_v60 }
 0xb16   :  { %6001 = vmatmul.mubr.f32.gmra.mrb[22].mxu0 %v2221_v42 }
 0xb17   :  { %6005 = vmatprep.mubr.msk.f32.mxu0 %vm7044_vm2, %v8488_v60 }
 0xbc5   :  { %v5961_v44 = vpop.f32.mrb[16].mxu0 }
 0xbc6   :  { %v2206_v45 = vsel %vm818_vm3, %v5961_v44, 0.0  ;;  %v2186_v62 = vpop.f32.mrb[17].mxu0 }
 0xbc7   :  { %v2205_v6 = vsel %vm818_vm3, %v2186_v62, 0.0 }
 0xbc8   :  { %v2207_v10 = vadd.f32 %v2206_v45, %v2205_v6 }
 0xbc9   :  { %v5964_v9 = vpop.f32.mrb[18].mxu0 }
 0xbca   :  { %v2196_v8 = vpop.f32.mrb[19].mxu0  ;;  %v2210_v59 = vsel %vm818_vm3, %v5964_v9, 0.0 }
 0xbcb   :  { %v2208_v7 = vsel %vm818_vm3, %v2196_v8, 0.0 }
 0xbcc   :  { %v2209_v26 = vadd.f32 %v2208_v7, %v2207_v10 }
 0xbce   :  { %v2211_v61 = vadd.f32 %v2210_v59, %v2209_v26 }
 0xbd0   :  { %v2212_v23 = vrot.slane %v2211_v61, 4 }
 0xbd2   :  { %v2213_v24 = vadd.f32 %v2212_v23, %v2211_v61 }
 0xbd4   :  { %v2214_v0 = vrot.slane %v2213_v24, 2 }
 0xbd6   :  { %v2215_v5 = vadd.f32 %v2214_v0, %v2213_v24 }
 0xbd8   :  { %v2216_v21 = vrot.slane %v2215_v5, 1 }
 0xbda   :  { %v2217_v29 = vadd.f32 %v2216_v21, %v2215_v5  ;;  %v7872_v5 = vld [vmem:[%s8441_s5 + $0x50] sm:$0xff]   ;;  %v7905_v21 = vld [vmem:[%s8441_s5 + $0x68] sm:$0xff]  }
 0xbdc   :  { %v2320_v57 = vmul.f32 0.001953125, %v2217_v29  ;;  %v7939_v29 = vld [vmem:[%s8441_s5] sm:$0xff]  }
 0xbde   :  { %v2322_v4 = vmul.f32 %v2320_v57, %v2320_v57 }
 0xbe5   :  { %v5999_v25 = vpop.f32.mrb[20].mxu0 }
 0xbe6   :  { %v2308_v27 = vsel %vm818_vm3, %v5999_v25, 0.0  ;;  %v2288_v63 = vpop.f32.mrb[21].mxu0 }
 0xbe7   :  { %v2307_v48 = vsel %vm818_vm3, %v2288_v63, 0.0 }
 0xbe8   :  { %v2309_v1 = vadd.f32 %v2308_v27, %v2307_v48 }
 0xbe9   :  { %v6002_v2 = vpop.f32.mrb[22].mxu0 }
 0xbea   :  { %v2298_v3 = vpop.f32.mrb[23].mxu0  ;;  %v2312_v16 = vsel %vm818_vm3, %v6002_v2, 0.0  ;;  %v7849_v2 = vld [vmem:[%s8434_s3 + $0x18] sm:$0xff]  }
 0xbeb   :  { %v2310_v28 = vsel %vm818_vm3, %v2298_v3, 0.0  ;;  %v7856_v3 = vld [vmem:[%s8434_s3 + $0x8] sm:$0xff]  }
 0xbec   :  { %v2311_v14 = vadd.f32 %v2310_v28, %v2309_v1  ;;  %v7844_v1 = vld [vmem:[%s8441_s5 + $0x48] sm:$0xff]   ;;  %v7863_v28 = vld [vmem:[%s8434_s3 + $0x20] sm:$0xff]  }
 0xbee   :  { %v2313_v15 = vadd.f32 %v2312_v16, %v2311_v14  ;;  %v7880_v14 = vld [vmem:[%s8441_s5 + $0x58] sm:$0xff]   ;;  %v7885_v16 = vld [vmem:[%s8434_s3 + $0x28] sm:$0xff]  }
 0xbf0   :  { %v2314_v53 = vrot.slane %v2313_v15, 4 }
 0xbf2   :  { %v2315_v13 = vadd.f32 %v2314_v53, %v2313_v15  ;;  %v7896_v15 = vld [vmem:[%s8441_s5 + $0x60] sm:$0xff]   ;;  %v7914_v53 = vld [vmem:[%s8441_s5 + $0x70] sm:$0xff]  }
 0xbf4   :  { %v2316_v51 = vrot.slane %v2315_v13, 2 }
 0xbf6   :  { %v2317_v54 = vadd.f32 %v2316_v51, %v2315_v13  ;;  %v7932_v13 = vld [vmem:[%s8441_s5 + $0x78] sm:$0xff]  }
 0xbf8   :  { %v2318_v30 = vrot.slane %v2317_v54, 1 }
 0xbfa   :  { %v2319_v31 = vadd.f32 %v2318_v30, %v2317_v54 }
 0xbfc   :  { %v2321_v12 = vmul.f32 0.001953125, %v2319_v31 }
 0xbfe   :  { %v2323_v38 = vsub.f32 %v2321_v12, %v2322_v4 }
 0xc00   :  { %v2324_v39 = vadd.f32 1e-05, %v2323_v38 }
 0xc02   :  { %7021 = vrsqrt.f32 %v2324_v39 }
 0xc0c   :  { %v7022_v41 = vpop.eup %7021 }
 0xc0d   :  { %v2326_v42 = vmul.f32 %v7022_v41, %v7507_v11 }
 0xc0f   :  { %v2333_v44 = vrot.slane %v2326_v42, %v7509_v50  ;;  %v2327_v45 = vmul.f32 %v2326_v42, %v2320_v57 }
 0xc11   :  { %6006 = vmatmul.mubr.msk.f32.vlgmr.msra.gmra.mrb[24].mxu0 %vm818_vm3, %v2333_v44  ;;  %v2328_v62 = vsub.f32 %v7515_v58, %v2327_v45  ;;  %v7945_v45 = vld [vmem:[%s8441_s5 + $0x8] sm:$0xff]  }
 0xc12   :  { %6009 = vmatpush3.msra.mxu0 %v7490_v56  ;;  %6010 = vmatprep.mubr.msk.f32.mxu0 %vm7044_vm2, %v8488_v60 }
 0xc13   :  { %v2418_v6 = vrot.slane %v2328_v62, %v7509_v50 }
 0xc15   :  { %6011 = vmatmul.mubr.msk.f32.vlgmr.msra.gmra.mrb[26].mxu0 %vm818_vm3, %v2418_v6  ;;  %v7952_v6 = vld [vmem:[%s8441_s5 + $0x10] sm:$0xff]  }
 0xc16   :  { %6017 = vmatprep.mubr.msk.bf16.mxu0 %vm186_vm1, %v7657_v47 }
 0xce4   :  { %v2402_v11 = vpop.f32.mrb[24].mxu0 }
 0xce5   :  { %v2409_v10 = vrot.slane %v2402_v11, %v7509_v50  ;;  %v6007_v9 = vpop.f32.mrb[25].mxu0 }
 0xce7   :  { %v2410_v8 = vmul.f32 %v2409_v10, %v7760_v33  ;;  %v2411_v58 = vmul.f32 %v2409_v10, %v7765_v36  ;;  %v2412_v56 = vmul.f32 %v7758_v32, %v2409_v10  ;;  %v2413_v7 = vmul.f32 %v7762_v34, %v2409_v10  ;;  %v7838_v36 = vld [vmem:[%s8441_s5 + $0x40] sm:$0xff]  }
 0xce8   :  { %v2487_v26 = vpop.f32.mrb[26].mxu0 }
 0xce9   :  { %v2494_v59 = vrot.slane %v2487_v26, %v7509_v50  ;;  %v6012_v61 = vpop.f32.mrb[27].mxu0  ;;  %v7973_v26 = vld [vmem:[%s8441_s5 + $0x28] sm:$0xff]  }
 0xcea   :  { %v7987_v61 = vld [vmem:[%s8441_s5 + $0x38] sm:$0xff]  }
 0xceb   :  { %v2495_v23 = vadd.f32 %v2494_v59, %v2410_v8  ;;  %v2496_v24 = vadd.f32 %v2494_v59, %v2411_v58  ;;  %v2497_v25 = vadd.f32 %v2494_v59, %v2412_v56  ;;  %v2498_v27 = vadd.f32 %v2494_v59, %v2413_v7  ;;  %v7959_v56 = vld [vmem:[%s8441_s5 + $0x18] sm:$0xff]   ;;  %v7966_v7 = vld [vmem:[%s8441_s5 + $0x20] sm:$0xff]   ;;  %v7980_v59 = vld [vmem:[%s8441_s5 + $0x30] sm:$0xff]  }
 0xced   :  { %v7823_v63 = vmax.f32 %v2495_v23, 0.0  ;;  %v7825_v48 = vmax.f32 %v2496_v24, 0.0  ;;  %v7827_v0 = vmax.f32 %v2497_v25, 0.0  ;;  %v7829_v33 = vmax.f32 %v2498_v27, 0.0  ;;  %v7994_v23 = vld [vmem:[%s8441_s5 + $0x80] sm:$0xff]   ;;  %v8001_v24 = vld [vmem:[%s8441_s5 + $0x88] sm:$0xff]  }
 0xcee   :  { %8493 = vst [vmem:[#allocation7_spill] sm:$0xff] %v7994_v23  ;;  %8494 = vst [vmem:[#allocation8_spill] sm:$0xff] %v8001_v24  ;;  %v8008_v25 = vld [vmem:[%s8441_s5 + $0x90] sm:$0xff]   ;;  %v8015_v27 = vld [vmem:[%s8441_s5 + $0x98] sm:$0xff]  }
 0xcef   :  { %v2505_v32 = vpack.c.bf16 %v7825_v48, %v7823_v63  ;;  %v2506_v34 = vpack.c.bf16 %v7829_v33, %v7827_v0  ;;  %8495 = vst [vmem:[#allocation9_spill] sm:$0xff] %v8008_v25  ;;  %8496 = vst [vmem:[#allocation10_spill] sm:$0xff] %v8015_v27 }
 0xcf1   :  { %6013 = vmatprep.subr.bf16.mxu0 %v2505_v32  ;;  %6021 = vmatprep.subr.bf16.mxu1 %v2505_v32 }
 0xcf2   :  { %6014 = vmatpush3.bf16.msra.mxu0 %v2505_v32  ;;  %6022 = vmatpush3.bf16.msra.mxu1 %v2505_v32 }
 0xcf3   :  { %6015 = vmatprep.subr.bf16.mxu0 %v2506_v34  ;;  %6023 = vmatprep.subr.bf16.mxu1 %v2506_v34 }
 0xcf6   :  { %6016 = vmatpush3.bf16.msra.mxu0 %v2506_v34  ;;  %6024 = vmatpush3.bf16.msra.mxu1 %v2506_v34 }
 0xcf7   :  { %6069 = vmatprep.subr.bf16.mxu1 %v2505_v32  ;;  %6029 = vmatprep.subr.bf16.mxu0 %v7838_v36 }
 0xcf9   :  { %6026 = vmatmul.mubr.msk.bf16.vlgmr.msra.gmra.mrb[60].mxu1 %vm186_vm1, %v7849_v2  ;;  %6018 = vmatmul.mubr.msk.bf16.vlgmr.msra.gmra.mrb[28].mxu0 %vm186_vm1, %v7856_v3 }
 0xcfa   :  { %6070 = vmatpush3.bf16.msra.mxu1 %v2505_v32  ;;  %6073 = vmatprep.mubr.msk.bf16.mxu1 %vm186_vm1, %v7863_v28  ;;  %v8022_v32 = vld [vmem:[%s8441_s5 + $0xa0] sm:$0xff]  }
 0xcfb   :  { %6071 = vmatprep.subr.bf16.mxu1 %v2506_v34  ;;  %6030 = vmatpush3.bf16.msra.mxu0 %v7838_v36  ;;  %8497 = vst [vmem:[#allocation11_spill] sm:$0xff] %v8022_v32 }
 0xcfc   :  { %6031 = vmatprep.subr.bf16.mxu0 %v7844_v1 }
 0xcfe   :  { %6072 = vmatpush3.bf16.msra.mxu1 %v2506_v34  ;;  %v8029_v34 = vld [vmem:[%s8441_s5 + $0xa8] sm:$0xff]  }
 0xcff   :  { %6032 = vmatpush3.bf16.msra.mxu0 %v7844_v1  ;;  %6716 = vmatprep.subr.bf16.mxu1 %v7256_v35  ;;  %8498 = vst [vmem:[#allocation12_spill] sm:$0xff] %v8029_v34 }
 0xd00   :  { %6033 = vmatprep.subr.bf16.mxu0 %v7872_v5 }
 0xd01   :  { %6074 = vmatmul.mubr.msk.bf16.vlgmr.msra.gmra.mrb[64].mxu1 %vm186_vm1, %v7885_v16 }
 0xd02   :  { %6718 = vmatpush3.bf16.msra.mxu1 %v7256_v35 }
 0xd03   :  { %6034 = vmatpush3.bf16.msra.mxu0 %v7872_v5  ;;  %6720 = vmatprep.subr.bf16.mxu1 %v7261_v37 }
 0xd04   :  { %6035 = vmatprep.subr.bf16.mxu0 %v7880_v14 }
 0xd06   :  { %6722 = vmatpush3.bf16.msra.mxu1 %v7261_v37 }
 0xd07   :  { %6036 = vmatpush3.bf16.msra.mxu0 %v7880_v14  ;;  %6724 = vmatprep.subr.bf16.mxu1 %v7272_v40 }
 0xd08   :  { %6037 = vmatprep.subr.bf16.mxu0 %v7896_v15 }
 0xd0a   :  { %6726 = vmatpush3.bf16.msra.mxu1 %v7272_v40 }
 0xd0b   :  { %6038 = vmatpush3.bf16.msra.mxu0 %v7896_v15  ;;  %6728 = vmatprep.subr.bf16.mxu1 %v7282_v43 }
 0xd0c   :  { %6039 = vmatprep.subr.bf16.mxu0 %v7905_v21 }
 0xd0e   :  { %6730 = vmatpush3.bf16.msra.mxu1 %v7282_v43 }
 0xd0f   :  { %6040 = vmatpush3.bf16.msra.mxu0 %v7905_v21  ;;  %6732 = vmatprep.subr.bf16.mxu1 %v7292_v46 }
 0xd10   :  { %6041 = vmatprep.subr.bf16.mxu0 %v7914_v53 }
 0xd12   :  { %6734 = vmatpush3.bf16.msra.mxu1 %v7292_v46 }
 0xd13   :  { %6042 = vmatpush3.bf16.msra.mxu0 %v7914_v53  ;;  %6736 = vmatprep.subr.bf16.mxu1 %v7302_v49 }
 0xd14   :  { %6043 = vmatprep.subr.bf16.mxu0 %v7932_v13 }
 0xd16   :  { %6738 = vmatpush3.bf16.msra.mxu1 %v7302_v49 }
 0xd17   :  { %6740 = vmatprep.subr.bf16.mxu1 %v7312_v52  ;;  %6044 = vmatpush3.bf16.msra.mxu0 %v7932_v13 }
 0xd18   :  { %6049 = vmatprep.subr.bf16.mxu0 %v7939_v29 }
 0xd1a   :  { %6742 = vmatpush3.bf16.msra.mxu1 %v7312_v52 }
 0xd1b   :  { %6744 = vmatprep.subr.bf16.mxu1 %v7322_v55 }
 0xd1e   :  { %6746 = vmatpush3.bf16.msra.mxu1 %v7322_v55 }
 0xd1f   :  { %6748 = vmatprep.subr.bf16.mxu1 %v7256_v35 }
 0xdcc   :  { %v6027_v51 = vpop.f32.mrb[60].mxu1  ;;  %v6019_v54 = vpop.f32.mrb[28].mxu0 }
 0xdcd   :  { %v2608_v57 = vpop.f32.mrb[61].mxu1  ;;  %v2541_v30 = vpop.f32.mrb[29].mxu0 }
 0xdce   :  { %v6028_v31 = vpop.f32.mrb[62].mxu1  ;;  %v6020_v4 = vpop.f32.mrb[30].mxu0 }
 0xdcf   :  { %v2624_v12 = vpack.c.bf16 %v6028_v31, %v6027_v51  ;;  %v2611_v38 = vpop.f32.mrb[63].mxu1  ;;  %v2557_v39 = vpack.c.bf16 %v6020_v4, %v6019_v54  ;;  %v2544_v41 = vpop.f32.mrb[31].mxu0  ;;  %v8036_v51 = vld [vmem:[%s8441_s5 + $0xb0] sm:$0xff]   ;;  %v8043_v54 = vld [vmem:[%s8441_s5 + $0xb8] sm:$0xff]  }
 0xdd0   :  { %v2623_v42 = vpack.c.bf16 %v2611_v38, %v2608_v57  ;;  %v2556_v44 = vpack.c.bf16 %v2544_v41, %v2541_v30  ;;  %8499 = vst [vmem:[#allocation13_spill] sm:$0xff] %v8036_v51  ;;  %8500 = vst [vmem:[#allocation14_spill] sm:$0xff] %v8043_v54  ;;  %v8087_v41 = vld [vmem:[%s8438_s11] sm:$0xff] }
 0xdd2   :  { %6045 = vmatprep.mubr.bf16.mxu0 %v2623_v42 }
 0xdd3   :  { %6046 = vmatmul.mubr.bf16.vlgmr.msra.gmra.mrb[32].mxu0 %v2624_v12 }
 0xdd4   :  { %6050 = vmatpush3.bf16.msra.mxu0 %v7939_v29  ;;  %6065 = vmatprep.mubr.bf16.mxu0 %v2556_v44  ;;  %v6075_v62 = vpop.f32.mrb[64].mxu1 }
 0xdd5   :  { %6051 = vmatprep.subr.bf16.mxu0 %v7945_v45  ;;  %v2870_v11 = vpop.f32.mrb[65].mxu1 }
 0xdd6   :  { %v6076_v10 = vpop.f32.mrb[66].mxu1 }
 0xdd7   :  { %v2886_v9 = vpack.c.bf16 %v6076_v10, %v6075_v62  ;;  %v2873_v8 = vpop.f32.mrb[67].mxu1 }
 0xdd8   :  { %6052 = vmatpush3.bf16.msra.mxu0 %v7945_v45  ;;  %v2885_v58 = vpack.c.bf16 %v2873_v8, %v2870_v11 }
 0xdd9   :  { %6053 = vmatprep.subr.bf16.mxu0 %v7952_v6 }
 0xddc   :  { %6054 = vmatpush3.bf16.msra.mxu0 %v7952_v6 }
 0xddd   :  { %6055 = vmatprep.subr.bf16.mxu0 %v7959_v56 }
 0xde0   :  { %6056 = vmatpush3.bf16.msra.mxu0 %v7959_v56 }
 0xde1   :  { %6057 = vmatprep.subr.bf16.mxu0 %v7966_v7 }
 0xde4   :  { %6058 = vmatpush3.bf16.msra.mxu0 %v7966_v7 }
 0xde5   :  { %6059 = vmatprep.subr.bf16.mxu0 %v7973_v26 }
 0xde8   :  { %6060 = vmatpush3.bf16.msra.mxu0 %v7973_v26 }
 0xde9   :  { %6061 = vmatprep.subr.bf16.mxu0 %v7980_v59 }
 0xdec   :  { %6062 = vmatpush3.bf16.msra.mxu0 %v7980_v59 }
 0xded   :  { %6063 = vmatprep.subr.bf16.mxu0 %v7987_v61 }
 0xdf0   :  { %6064 = vmatpush3.bf16.msra.mxu0 %v7987_v61 }
 0xdf1   :  { %6077 = vmatprep.subr.bf16.mxu0 %v7994_v23 }
 0xdf3   :  { %6066 = vmatmul.mubr.bf16.vlgmr.msra.gmra.mrb[32].mxu0 %v2557_v39 }
 0xdf4   :  { %6078 = vmatpush3.bf16.msra.mxu0 %v7994_v23  ;;  %6093 = vmatprep.mubr.bf16.mxu0 %v2885_v58 }
 0xdf5   :  { %6079 = vmatprep.subr.bf16.mxu0 %v8001_v24 }
 0xdf8   :  { %6080 = vmatpush3.bf16.msra.mxu0 %v8001_v24 }
 0xdf9   :  { %6081 = vmatprep.subr.bf16.mxu0 %v8008_v25 }
 0xdfc   :  { %6082 = vmatpush3.bf16.msra.mxu0 %v8008_v25 }
 0xdfd   :  { %6083 = vmatprep.subr.bf16.mxu0 %v8015_v27 }
 0xe00   :  { %6084 = vmatpush3.bf16.msra.mxu0 %v8015_v27 }
 0xe01   :  { %6085 = vmatprep.subr.bf16.mxu0 %v8022_v32 }
 0xe04   :  { %6086 = vmatpush3.bf16.msra.mxu0 %v8022_v32 }
 0xe05   :  { %6087 = vmatprep.subr.bf16.mxu0 %v8029_v34 }
 0xe08   :  { %6088 = vmatpush3.bf16.msra.mxu0 %v8029_v34 }
 0xe09   :  { %6089 = vmatprep.subr.bf16.mxu0 %v8036_v51 }
 0xe0c   :  { %6090 = vmatpush3.bf16.msra.mxu0 %v8036_v51 }
 0xe0d   :  { %6091 = vmatprep.subr.bf16.mxu0 %v8043_v54 }
 0xe10   :  { %6092 = vmatpush3.bf16.msra.mxu0 %v8043_v54 }
 0xe13   :  { %6094 = vmatmul.mubr.bf16.vlgmr.msra.gmra.mrb[32].mxu0 %v2886_v9 }
 0xe14   :  { %6195 = vmatprep.mubr.msk.bf16.mxu0 %vm186_vm1, %v7754_v22 }
 0xee6   :  { %v8050_v57 = vpop.f32.mrb[32].mxu0 }
 0xee7   :  { %v8052_v30 = vpop.f32.mrb[33].mxu0  ;;  %v3105_v39 = vmul.f32 %v8050_v57, %v8050_v57 }
 0xee8   :  { %v8054_v31 = vpop.f32.mrb[34].mxu0  ;;  %6129 = vmatprep.mubr.f32.mxu1 %v8052_v30  ;;  %v3103_v12 = vmul.f32 %v8052_v30, %v8052_v30 }
 0xee9   :  { %v8057_v4 = vpop.f32.mrb[35].mxu0  ;;  %v3106_v42 = vmul.f32 %v8054_v31, %v8054_v31 }
 0xeea   :  { %6130 = vmatmul.mubr.f32.vlgmr.msra.gmra.mrb[68].mxu1 %v8057_v4  ;;  %v3104_v38 = vmul.f32 %v8057_v4, %v8057_v4 }
 0xeeb   :  { %6750 = vmatpush3.bf16.msra.mxu1 %v7256_v35  ;;  %6132 = vmatprep.mubr.f32.mxu1 %v8050_v57 }
 0xeec   :  { %6752 = vmatprep.subr.bf16.mxu1 %v7261_v37 }
 0xeee   :  { %6133 = vmatmul.mubr.f32.gmra.mrb[70].mxu1 %v8054_v31 }
 0xeef   :  { %6754 = vmatpush3.bf16.msra.mxu1 %v7261_v37  ;;  %6167 = vmatprep.mubr.f32.mxu1 %v3103_v12 }
 0xef0   :  { %6756 = vmatprep.subr.bf16.mxu1 %v7272_v40 }
 0xef3   :  { %6758 = vmatpush3.bf16.msra.mxu1 %v7272_v40 }
 0xef4   :  { %6760 = vmatprep.subr.bf16.mxu1 %v7282_v43 }
 0xef7   :  { %6762 = vmatpush3.bf16.msra.mxu1 %v7282_v43 }
 0xef8   :  { %6764 = vmatprep.subr.bf16.mxu1 %v7292_v46 }
 0xefb   :  { %6766 = vmatpush3.bf16.msra.mxu1 %v7292_v46 }
 0xefc   :  { %6768 = vmatprep.subr.bf16.mxu1 %v7302_v49 }
 0xeff   :  { %6770 = vmatpush3.bf16.msra.mxu1 %v7302_v49 }
 0xf00   :  { %6772 = vmatprep.subr.bf16.mxu1 %v7312_v52 }
 0xf03   :  { %6774 = vmatpush3.bf16.msra.mxu1 %v7312_v52 }
 0xf04   :  { %6776 = vmatprep.subr.bf16.mxu1 %v7322_v55 }
 0xf07   :  { %6778 = vmatpush3.bf16.msra.mxu1 %v7322_v55 }
 0xf08   :  { %6173 = vmatprep.subr.mxu1 %v8488_v60 }
 0xf0a   :  { %6168 = vmatmul.mubr.f32.vlgmr.msra.gmra.mrb[72].mxu1 %v3104_v38 }
 0xf0b   :  { %6170 = vmatprep.mubr.f32.mxu1 %v3105_v39  ;;  %6174 = vmatpush3.msra.mxu1 %v8087_v41 }
 0xf0c   :  { %6178 = vmatprep.subr.mxu1 %v8488_v60 }
 0xf0e   :  { %6171 = vmatmul.mubr.f32.gmra.mrb[74].mxu1 %v3106_v42 }
 0xf0f   :  { %6175 = vmatprep.mubr.msk.f32.mxu1 %vm7044_vm2, %v8488_v60 }
 0xfbd   :  { %v6131_v44 = vpop.f32.mrb[68].mxu1 }
 0xfbe   :  { %v3091_v62 = vsel %vm818_vm3, %v6131_v44, 0.0  ;;  %v3071_v11 = vpop.f32.mrb[69].mxu1 }
 0xfbf   :  { %v3090_v10 = vsel %vm818_vm3, %v3071_v11, 0.0 }
 0xfc0   :  { %v3092_v9 = vadd.f32 %v3091_v62, %v3090_v10 }
 0xfc1   :  { %v6134_v8 = vpop.f32.mrb[70].mxu1 }
 0xfc2   :  { %v3081_v58 = vpop.f32.mrb[71].mxu1  ;;  %v3095_v39 = vsel %vm818_vm3, %v6134_v8, 0.0 }
 0xfc3   :  { %v3093_v12 = vsel %vm818_vm3, %v3081_v58, 0.0 }
 0xfc4   :  { %v3094_v38 = vadd.f32 %v3093_v12, %v3092_v9 }
 0xfc6   :  { %v3096_v18 = vadd.f32 %v3095_v39, %v3094_v38 }
 0xfc8   :  { %v3097_v20 = vrot.slane %v3096_v18, 4 }
 0xfca   :  { %v3098_v42 = vadd.f32 %v3097_v20, %v3096_v18 }
 0xfcc   :  { %v3099_v54 = vrot.slane %v3098_v42, 2 }
 0xfce   :  { %v3100_v34 = vadd.f32 %v3099_v54, %v3098_v42 }
 0xfd0   :  { %v3101_v12 = vrot.slane %v3100_v34, 1 }
 0xfd2   :  { %v3102_v20 = vadd.f32 %v3101_v12, %v3100_v34  ;;  %v8112_v34 = vld [vmem:[%s8443_s9] sm:$0x1] }
 0xfd4   :  { %v3205_v32 = vmul.f32 0.001953125, %v3102_v20 }
 0xfd6   :  { %v3207_v25 = vmul.f32 %v3205_v32, %v3205_v32 }
 0xfdd   :  { %v6169_v19 = vpop.f32.mrb[72].mxu1 }
 0xfde   :  { %v3193_v17 = vsel %vm818_vm3, %v6169_v19, 0.0  ;;  %v3173_v22 = vpop.f32.mrb[73].mxu1 }
 0xfdf   :  { %v3192_v44 = vsel %vm818_vm3, %v3173_v22, 0.0 }
 0xfe0   :  { %v3194_v51 = vadd.f32 %v3193_v17, %v3192_v44 }
 0xfe1   :  { %v6172_v11 = vpop.f32.mrb[74].mxu1 }
 0xfe2   :  { %v3183_v62 = vpop.f32.mrb[75].mxu1  ;;  %v3197_v9 = vsel %vm818_vm3, %v6172_v11, 0.0 }
 0xfe3   :  { %v3195_v10 = vsel %vm818_vm3, %v3183_v62, 0.0 }
 0xfe4   :  { %v3196_v58 = vadd.f32 %v3195_v10, %v3194_v51  ;;  %v8106_v51 = vld [vmem:[%s8442_s8] sm:$0x1] }
 0xfe6   :  { %v3198_v8 = vadd.f32 %v3197_v9, %v3196_v58 }
 0xfe8   :  { %v3199_v38 = vrot.slane %v3198_v8, 4 }
 0xfea   :  { %v3200_v18 = vadd.f32 %v3199_v38, %v3198_v8 }
 0xfec   :  { %v3201_v39 = vrot.slane %v3200_v18, 2 }
 0xfee   :  { %v3202_v19 = vadd.f32 %v3201_v39, %v3200_v18 }
 0xff0   :  { %v3203_v27 = vrot.slane %v3202_v19, 1 }
 0xff2   :  { %v3204_v22 = vadd.f32 %v3203_v27, %v3202_v19 }
 0xff4   :  { %v3206_v17 = vmul.f32 0.001953125, %v3204_v22 }
 0xff6   :  { %v3208_v44 = vsub.f32 %v3206_v17, %v3207_v25 }
 0xff8   :  { %v3209_v24 = vadd.f32 1e-05, %v3208_v44 }
 0xffa   :  { %7023 = vrsqrt.f32 %v3209_v24 }
0x1004   :  { %v7024_v54 = vpop.eup %7023 }
0x1005   :  { %v3211_v42 = vmul.f32 %v7024_v54, %v8106_v51 }
0x1007   :  { %v3218_v27 = vrot.slane %v3211_v42, %v7509_v50  ;;  %v3212_v11 = vmul.f32 %v3211_v42, %v3205_v32 }
0x1009   :  { %6176 = vmatmul.mubr.msk.f32.vlgmr.msra.gmra.mrb[76].mxu1 %vm818_vm3, %v3218_v27  ;;  %v3213_v24 = vsub.f32 %v8112_v34, %v3212_v11 }
0x100a   :  { %6179 = vmatpush3.msra.mxu1 %v8087_v41  ;;  %6180 = vmatprep.mubr.msk.f32.mxu1 %vm7044_vm2, %v8488_v60 }
0x100b   :  { %v3303_v25 = vrot.slane %v3213_v24, %v7509_v50 }
0x100d   :  { %6181 = vmatmul.mubr.msk.f32.vlgmr.msra.gmra.mrb[78].mxu1 %vm818_vm3, %v3303_v25 }
0x100e   :  { %6187 = vmatprep.mubr.msk.bf16.mxu1 %vm186_vm1, %v7657_v47 }
0x10dc   :  { %v3287_v62 = vpop.f32.mrb[76].mxu1 }
0x10dd   :  { %v3294_v10 = vrot.slane %v3287_v62, %v7509_v50  ;;  %v6177_v32 = vpop.f32.mrb[77].mxu1 }
0x10df   :  { %v3295_v58 = vmul.f32 %v3294_v10, %v8052_v30  ;;  %v3296_v9 = vmul.f32 %v3294_v10, %v8057_v4  ;;  %v3297_v8 = vmul.f32 %v8050_v57, %v3294_v10  ;;  %v3298_v12 = vmul.f32 %v8054_v31, %v3294_v10 }
0x10e0   :  { %v3372_v38 = vpop.f32.mrb[78].mxu1 }
0x10e1   :  { %v3379_v18 = vrot.slane %v3372_v38, %v7509_v50  ;;  %v6182_v20 = vpop.f32.mrb[79].mxu1 }
0x10e3   :  { %v3380_v39 = vadd.f32 %v3379_v18, %v3295_v58  ;;  %v3381_v19 = vadd.f32 %v3379_v18, %v3296_v9  ;;  %v3382_v22 = vadd.f32 %v3379_v18, %v3297_v8  ;;  %v3383_v47 = vadd.f32 %v3379_v18, %v3298_v12 }
0x10e5   :  { %v3384_v17 = vmax.f32 %v3380_v39, 0.0  ;;  %v3385_v44 = vmax.f32 %v3381_v19, 0.0  ;;  %v3386_v54 = vmax.f32 %v3382_v22, 0.0  ;;  %v3387_v42 = vmax.f32 %v3383_v47, 0.0 }
0x10e7   :  { %v3388_v30 = vadd.f32 %v3384_v17, %v7823_v63  ;;  %v3389_v4 = vadd.f32 %v3385_v44, %v7825_v48  ;;  %v3390_v57 = vadd.f32 %v3386_v54, %v7827_v0  ;;  %v3391_v31 = vadd.f32 %v3387_v42, %v7829_v33  ;;  %v8501_v54 = vld [vmem:[#allocation8_spill] sm:$0xff]  ;;  %v8502_v42 = vld [vmem:[#allocation9_spill] sm:$0xff] }
0x10e9   :  { %v3392_v27 = vpack.c.bf16 %v3389_v4, %v3388_v30  ;;  %v3393_v11 = vpack.c.bf16 %v3391_v31, %v3390_v57  ;;  %v8503_v30 = vld [vmem:[#allocation10_spill] sm:$0xff]  ;;  %v8504_v4 = vld [vmem:[#allocation11_spill] sm:$0xff]  ;;  %v8505_v57 = vld [vmem:[#allocation12_spill] sm:$0xff] }
0x10ea   :  { %v8506_v31 = vld [vmem:[#allocation13_spill] sm:$0xff] }
0x10eb   :  { %6183 = vmatprep.subr.bf16.mxu1 %v3392_v27  ;;  %6191 = vmatprep.subr.bf16.mxu0 %v3392_v27 }
0x10ec   :  { %6184 = vmatpush3.bf16.msra.mxu1 %v3392_v27  ;;  %6192 = vmatpush3.bf16.msra.mxu0 %v3392_v27 }
0x10ed   :  { %6185 = vmatprep.subr.bf16.mxu1 %v3393_v11  ;;  %6193 = vmatprep.subr.bf16.mxu0 %v3393_v11 }
0x10f0   :  { %6186 = vmatpush3.bf16.msra.mxu1 %v3393_v11  ;;  %6194 = vmatpush3.bf16.msra.mxu0 %v3393_v11 }
0x10f1   :  { %6239 = vmatprep.subr.bf16.mxu0 %v3392_v27  ;;  %6199 = vmatprep.subr.bf16.mxu1 %v7838_v36 }
0x10f3   :  { %6196 = vmatmul.mubr.msk.bf16.vlgmr.msra.gmra.mrb[36].mxu0 %vm186_vm1, %v7849_v2  ;;  %6188 = vmatmul.mubr.msk.bf16.vlgmr.msra.gmra.mrb[80].mxu1 %vm186_vm1, %v7856_v3 }
0x10f4   :  { %6240 = vmatpush3.bf16.msra.mxu0 %v3392_v27  ;;  %6243 = vmatprep.mubr.msk.bf16.mxu0 %vm186_vm1, %v7863_v28  ;;  %v8507_v27 = vld [vmem:[#allocation14_spill] sm:$0xff] }
0x10f5   :  { %6241 = vmatprep.subr.bf16.mxu0 %v3393_v11  ;;  %6200 = vmatpush3.bf16.msra.mxu1 %v7838_v36 }
0x10f6   :  { %6201 = vmatprep.subr.bf16.mxu1 %v7844_v1 }
0x10f8   :  { %6242 = vmatpush3.bf16.msra.mxu0 %v3393_v11  ;;  %v8508_v11 = vld [vmem:[#allocation6_spill] sm:$0xff] }
0x10f9   :  { %6202 = vmatpush3.bf16.msra.mxu1 %v7844_v1  ;;  %6780 = vmatprep.subr.bf16.mxu0 %v7256_v35 }
0x10fa   :  { %6203 = vmatprep.subr.bf16.mxu1 %v7872_v5 }
0x10fb   :  { %6244 = vmatmul.mubr.msk.bf16.vlgmr.msra.gmra.mrb[40].mxu0 %vm186_vm1, %v7885_v16 }
0x10fc   :  { %6782 = vmatpush3.bf16.msra.mxu0 %v7256_v35 }
0x10fd   :  { %6204 = vmatpush3.bf16.msra.mxu1 %v7872_v5  ;;  %6784 = vmatprep.subr.bf16.mxu0 %v7261_v37 }
0x10fe   :  { %6205 = vmatprep.subr.bf16.mxu1 %v7880_v14 }
0x1100   :  { %6786 = vmatpush3.bf16.msra.mxu0 %v7261_v37 }
0x1101   :  { %6206 = vmatpush3.bf16.msra.mxu1 %v7880_v14  ;;  %6788 = vmatprep.subr.bf16.mxu0 %v7272_v40 }
0x1102   :  { %6207 = vmatprep.subr.bf16.mxu1 %v7896_v15 }
0x1104   :  { %6790 = vmatpush3.bf16.msra.mxu0 %v7272_v40 }
0x1105   :  { %6208 = vmatpush3.bf16.msra.mxu1 %v7896_v15  ;;  %6792 = vmatprep.subr.bf16.mxu0 %v7282_v43 }
0x1106   :  { %6209 = vmatprep.subr.bf16.mxu1 %v7905_v21 }
0x1108   :  { %6794 = vmatpush3.bf16.msra.mxu0 %v7282_v43 }
0x1109   :  { %6210 = vmatpush3.bf16.msra.mxu1 %v7905_v21  ;;  %6796 = vmatprep.subr.bf16.mxu0 %v7292_v46 }
0x110a   :  { %6211 = vmatprep.subr.bf16.mxu1 %v7914_v53 }
0x110c   :  { %6798 = vmatpush3.bf16.msra.mxu0 %v7292_v46 }
0x110d   :  { %6212 = vmatpush3.bf16.msra.mxu1 %v7914_v53  ;;  %6800 = vmatprep.subr.bf16.mxu0 %v7302_v49 }
0x110e   :  { %6213 = vmatprep.subr.bf16.mxu1 %v7932_v13 }
0x1110   :  { %6802 = vmatpush3.bf16.msra.mxu0 %v7302_v49 }
0x1111   :  { %6214 = vmatpush3.bf16.msra.mxu1 %v7932_v13  ;;  %6804 = vmatprep.subr.bf16.mxu0 %v7312_v52 }
0x1112   :  { %6219 = vmatprep.subr.bf16.mxu1 %v7939_v29 }
0x1114   :  { %6806 = vmatpush3.bf16.msra.mxu0 %v7312_v52 }
0x1115   :  { %6808 = vmatprep.subr.bf16.mxu0 %v7322_v55 }
0x1118   :  { %6810 = vmatpush3.bf16.msra.mxu0 %v7322_v55 }
0x1119   :  { %6812 = vmatprep.subr.bf16.mxu0 %v7256_v35 }
0x11c6   :  { %v6197_v24 = vpop.f32.mrb[36].mxu0  ;;  %v6189_v25 = vpop.f32.mrb[80].mxu1 }
0x11c7   :  { %v3479_v62 = vpop.f32.mrb[37].mxu0  ;;  %v3428_v10 = vpop.f32.mrb[81].mxu1 }
0x11c8   :  { %v6198_v32 = vpop.f32.mrb[38].mxu0  ;;  %v6190_v58 = vpop.f32.mrb[82].mxu1 }
0x11c9   :  { %v3495_v9 = vpack.c.bf16 %v6198_v32, %v6197_v24  ;;  %v3482_v8 = vpop.f32.mrb[39].mxu0  ;;  %v3444_v12 = vpack.c.bf16 %v6190_v58, %v6189_v25  ;;  %v3431_v38 = vpop.f32.mrb[83].mxu1 }
0x11ca   :  { %v3494_v18 = vpack.c.bf16 %v3482_v8, %v3479_v62  ;;  %v3443_v20 = vpack.c.bf16 %v3431_v38, %v3428_v10 }
0x11cc   :  { %6215 = vmatprep.mubr.bf16.mxu1 %v3494_v18 }
0x11cd   :  { %6216 = vmatmul.mubr.bf16.vlgmr.msra.gmra.mrb[84].mxu1 %v3495_v9 }
0x11ce   :  { %6220 = vmatpush3.bf16.msra.mxu1 %v7939_v29  ;;  %6235 = vmatprep.mubr.bf16.mxu1 %v3443_v20  ;;  %v6245_v39 = vpop.f32.mrb[40].mxu0 }
0x11cf   :  { %6221 = vmatprep.subr.bf16.mxu1 %v7945_v45  ;;  %v3628_v19 = vpop.f32.mrb[41].mxu0 }
0x11d0   :  { %v6246_v22 = vpop.f32.mrb[42].mxu0 }
0x11d1   :  { %v3644_v47 = vpack.c.bf16 %v6246_v22, %v6245_v39  ;;  %v3631_v17 = vpop.f32.mrb[43].mxu0 }
0x11d2   :  { %6222 = vmatpush3.bf16.msra.mxu1 %v7945_v45  ;;  %v3643_v44 = vpack.c.bf16 %v3631_v17, %v3628_v19 }
0x11d3   :  { %6223 = vmatprep.subr.bf16.mxu1 %v7952_v6 }
0x11d6   :  { %6224 = vmatpush3.bf16.msra.mxu1 %v7952_v6 }
0x11d7   :  { %6225 = vmatprep.subr.bf16.mxu1 %v7959_v56 }
0x11da   :  { %6226 = vmatpush3.bf16.msra.mxu1 %v7959_v56 }
0x11db   :  { %6227 = vmatprep.subr.bf16.mxu1 %v7966_v7 }
0x11de   :  { %6228 = vmatpush3.bf16.msra.mxu1 %v7966_v7 }
0x11df   :  { %6229 = vmatprep.subr.bf16.mxu1 %v7973_v26 }
0x11e2   :  { %6230 = vmatpush3.bf16.msra.mxu1 %v7973_v26 }
0x11e3   :  { %6231 = vmatprep.subr.bf16.mxu1 %v7980_v59 }
0x11e6   :  { %6232 = vmatpush3.bf16.msra.mxu1 %v7980_v59 }
0x11e7   :  { %6233 = vmatprep.subr.bf16.mxu1 %v7987_v61 }
0x11ea   :  { %6234 = vmatpush3.bf16.msra.mxu1 %v7987_v61 }
0x11eb   :  { %6247 = vmatprep.subr.bf16.mxu1 %v7994_v23 }
0x11ed   :  { %6236 = vmatmul.mubr.bf16.vlgmr.msra.gmra.mrb[84].mxu1 %v3444_v12 }
0x11ee   :  { %6248 = vmatpush3.bf16.msra.mxu1 %v7994_v23  ;;  %6263 = vmatprep.mubr.bf16.mxu1 %v3643_v44 }
0x11ef   :  { %6249 = vmatprep.subr.bf16.mxu1 %v8501_v54 }
0x11f2   :  { %6250 = vmatpush3.bf16.msra.mxu1 %v8501_v54 }
0x11f3   :  { %6251 = vmatprep.subr.bf16.mxu1 %v8502_v42 }
0x11f6   :  { %6252 = vmatpush3.bf16.msra.mxu1 %v8502_v42 }
0x11f7   :  { %6253 = vmatprep.subr.bf16.mxu1 %v8503_v30 }
0x11fa   :  { %6254 = vmatpush3.bf16.msra.mxu1 %v8503_v30 }
0x11fb   :  { %6255 = vmatprep.subr.bf16.mxu1 %v8504_v4 }
0x11fe   :  { %6256 = vmatpush3.bf16.msra.mxu1 %v8504_v4 }
0x11ff   :  { %6257 = vmatprep.subr.bf16.mxu1 %v8505_v57 }
0x1202   :  { %6258 = vmatpush3.bf16.msra.mxu1 %v8505_v57 }
0x1203   :  { %6259 = vmatprep.subr.bf16.mxu1 %v8506_v31 }
0x1206   :  { %6260 = vmatpush3.bf16.msra.mxu1 %v8506_v31 }
0x1207   :  { %6261 = vmatprep.subr.bf16.mxu1 %v8507_v27 }
0x120a   :  { %6262 = vmatpush3.bf16.msra.mxu1 %v8507_v27 }
0x120d   :  { %6264 = vmatmul.mubr.bf16.vlgmr.msra.gmra.mrb[84].mxu1 %v3644_v47 }
0x120e   :  { %6365 = vmatprep.mubr.msk.bf16.mxu1 %vm186_vm1, %v8508_v11 }
0x12e0   :  { %v8209_v24 = vpop.f32.mrb[84].mxu1 }
0x12e1   :  { %v8211_v25 = vpop.f32.mrb[85].mxu1  ;;  %v3798_v9 = vmul.f32 %v8209_v24, %v8209_v24 }
0x12e2   :  { %v8213_v62 = vpop.f32.mrb[86].mxu1  ;;  %6299 = vmatprep.mubr.f32.mxu0 %v8211_v25  ;;  %v3796_v32 = vmul.f32 %v8211_v25, %v8211_v25 }
0x12e3   :  { %v8216_v10 = vpop.f32.mrb[87].mxu1  ;;  %v3799_v8 = vmul.f32 %v8213_v62, %v8213_v62 }
0x12e4   :  { %6300 = vmatmul.mubr.f32.vlgmr.msra.gmra.mrb[44].mxu0 %v8216_v10  ;;  %v3797_v58 = vmul.f32 %v8216_v10, %v8216_v10 }
0x12e5   :  { %6814 = vmatpush3.bf16.msra.mxu0 %v7256_v35  ;;  %6302 = vmatprep.mubr.f32.mxu0 %v8209_v24 }
0x12e6   :  { %6816 = vmatprep.subr.bf16.mxu0 %v7261_v37 }
0x12e8   :  { %6303 = vmatmul.mubr.f32.gmra.mrb[46].mxu0 %v8213_v62 }
0x12e9   :  { %6818 = vmatpush3.bf16.msra.mxu0 %v7261_v37  ;;  %6337 = vmatprep.mubr.f32.mxu0 %v3796_v32 }
0x12ea   :  { %6820 = vmatprep.subr.bf16.mxu0 %v7272_v40 }
0x12ed   :  { %6822 = vmatpush3.bf16.msra.mxu0 %v7272_v40 }
0x12ee   :  { %6824 = vmatprep.subr.bf16.mxu0 %v7282_v43 }
0x12f1   :  { %6826 = vmatpush3.bf16.msra.mxu0 %v7282_v43 }
0x12f2   :  { %6828 = vmatprep.subr.bf16.mxu0 %v7292_v46 }
0x12f5   :  { %6830 = vmatpush3.bf16.msra.mxu0 %v7292_v46 }
0x12f6   :  { %6832 = vmatprep.subr.bf16.mxu0 %v7302_v49 }
0x12f9   :  { %6834 = vmatpush3.bf16.msra.mxu0 %v7302_v49 }
0x12fa   :  { %6836 = vmatprep.subr.bf16.mxu0 %v7312_v52 }
0x12fd   :  { %6838 = vmatpush3.bf16.msra.mxu0 %v7312_v52 }
0x12fe   :  { %6840 = vmatprep.subr.bf16.mxu0 %v7322_v55 }
0x1301   :  { %6842 = vmatpush3.bf16.msra.mxu0 %v7322_v55 }
0x1302   :  { %6343 = vmatprep.subr.mxu0 %v8488_v60 }
0x1304   :  { %6338 = vmatmul.mubr.f32.vlgmr.msra.gmra.mrb[48].mxu0 %v3797_v58 }
0x1305   :  { %6340 = vmatprep.mubr.f32.mxu0 %v3798_v9  ;;  %6344 = vmatpush3.msra.mxu0 %v8087_v41 }
0x1306   :  { %6348 = vmatprep.subr.mxu0 %v8488_v60 }
0x1308   :  { %6341 = vmatmul.mubr.f32.gmra.mrb[50].mxu0 %v3799_v8 }
0x1309   :  { %6345 = vmatprep.mubr.msk.f32.mxu0 %vm7044_vm2, %v8488_v60 }
0x13b7   :  { %v6301_v12 = vpop.f32.mrb[44].mxu0 }
0x13b8   :  { %v3784_v38 = vsel %vm818_vm3, %v6301_v12, 0.0  ;;  %v3764_v18 = vpop.f32.mrb[45].mxu0 }
0x13b9   :  { %v3783_v20 = vsel %vm818_vm3, %v3764_v18, 0.0 }
0x13ba   :  { %v3785_v39 = vadd.f32 %v3784_v38, %v3783_v20 }
0x13bb   :  { %v6304_v19 = vpop.f32.mrb[46].mxu0 }
0x13bc   :  { %v3774_v22 = vpop.f32.mrb[47].mxu0  ;;  %v3788_v44 = vsel %vm818_vm3, %v6304_v19, 0.0 }
0x13bd   :  { %v3786_v47 = vsel %vm818_vm3, %v3774_v22, 0.0 }
0x13be   :  { %v3787_v17 = vadd.f32 %v3786_v47, %v3785_v39 }
0x13c0   :  { %v3789_v11 = vadd.f32 %v3788_v44, %v3787_v17 }
0x13c2   :  { %v3790_v32 = vrot.slane %v3789_v11, 4 }
0x13c4   :  { %v3791_v58 = vadd.f32 %v3790_v32, %v3789_v11 }
0x13c6   :  { %v3792_v31 = vrot.slane %v3791_v58, 2 }
0x13c8   :  { %v3793_v4 = vadd.f32 %v3792_v31, %v3791_v58 }
0x13ca   :  { %v3794_v47 = vrot.slane %v3793_v4, 1 }
0x13cc   :  { %v3795_v11 = vadd.f32 %v3794_v47, %v3793_v4 }
0x13ce   :  { %v3898_v30 = vmul.f32 0.001953125, %v3795_v11 }
0x13d0   :  { %v3900_v54 = vmul.f32 %v3898_v30, %v3898_v30 }
0x13d7   :  { %v6339_v9 = vpop.f32.mrb[48].mxu0 }
0x13d8   :  { %v3886_v8 = vsel %vm818_vm3, %v6339_v9, 0.0  ;;  %v3866_v27 = vpop.f32.mrb[49].mxu0 }
0x13d9   :  { %v3885_v12 = vsel %vm818_vm3, %v3866_v27, 0.0 }
0x13da   :  { %v3887_v57 = vadd.f32 %v3886_v8, %v3885_v12 }
0x13db   :  { %v6342_v18 = vpop.f32.mrb[50].mxu0 }
0x13dc   :  { %v3876_v38 = vpop.f32.mrb[51].mxu0  ;;  %v3890_v39 = vsel %vm818_vm3, %v6342_v18, 0.0 }
0x13dd   :  { %v3888_v20 = vsel %vm818_vm3, %v3876_v38, 0.0 }
0x13de   :  { %v3889_v22 = vadd.f32 %v3888_v20, %v3887_v57 }
0x13e0   :  { %v3891_v19 = vadd.f32 %v3890_v39, %v3889_v22 }
0x13e2   :  { %v3892_v17 = vrot.slane %v3891_v19, 4 }
0x13e4   :  { %v3893_v44 = vadd.f32 %v3892_v17, %v3891_v19 }
0x13e6   :  { %v3894_v32 = vrot.slane %v3893_v44, 2 }
0x13e8   :  { %v3895_v9 = vadd.f32 %v3894_v32, %v3893_v44 }
0x13ea   :  { %v3896_v42 = vrot.slane %v3895_v9, 1 }
0x13ec   :  { %v3897_v27 = vadd.f32 %v3896_v42, %v3895_v9 }
0x13ee   :  { %v3899_v8 = vmul.f32 0.001953125, %v3897_v27 }
0x13f0   :  { %v3901_v12 = vsub.f32 %v3899_v8, %v3900_v54 }
0x13f2   :  { %v3902_v23 = vadd.f32 1e-05, %v3901_v12 }
0x13f4   :  { %7025 = vrsqrt.f32 %v3902_v23  ;;  %v7042_v23 = vld [vmem:[%s8434_s3] sm:$0xff]  }
0x13fe   :  { %v7026_v38 = vpop.eup %7025 }
0x13ff   :  { %v3904_v57 = vmul.f32 %v7026_v38, %v8106_v51 }
0x1401   :  { %v3911_v31 = vrot.slane %v3904_v57, %v7509_v50  ;;  %v3905_v58 = vmul.f32 %v3904_v57, %v3898_v30 }
0x1403   :  { %6346 = vmatmul.mubr.msk.f32.vlgmr.msra.gmra.mrb[52].mxu0 %vm818_vm3, %v3911_v31  ;;  %v3906_v4 = vsub.f32 %v8112_v34, %v3905_v58 }
0x1404   :  { %6349 = vmatpush3.msra.mxu0 %v8087_v41  ;;  %6350 = vmatprep.mubr.msk.f32.mxu0 %vm7044_vm2, %v8488_v60 }
0x1405   :  { %v3996_v42 = vrot.slane %v3906_v4, %v7509_v50 }
0x1407   :  { %6351 = vmatmul.mubr.msk.f32.vlgmr.msra.gmra.mrb[54].mxu0 %vm818_vm3, %v3996_v42 }
0x1408   :  { %6357 = vmatprep.mubr.msk.bf16.mxu0 %vm186_vm1, %v7042_v23 }
0x14d6   :  { %v3980_v54 = vpop.f32.mrb[52].mxu0 }
0x14d7   :  { %v3987_v30 = vrot.slane %v3980_v54, %v7509_v50  ;;  %v6347_v18 = vpop.f32.mrb[53].mxu0 }
0x14d9   :  { %v3988_v20 = vmul.f32 %v3987_v30, %v8211_v25  ;;  %v3989_v22 = vmul.f32 %v3987_v30, %v8216_v10  ;;  %v3990_v39 = vmul.f32 %v8209_v24, %v3987_v30  ;;  %v3991_v19 = vmul.f32 %v8213_v62, %v3987_v30 }
0x14da   :  { %v4065_v47 = vpop.f32.mrb[54].mxu0 }
0x14db   :  { %v4072_v17 = vrot.slane %v4065_v47, %v7509_v50  ;;  %v6352_v44 = vpop.f32.mrb[55].mxu0 }
0x14dd   :  { %v4073_v11 = vadd.f32 %v4072_v17, %v3988_v20  ;;  %v4074_v32 = vadd.f32 %v4072_v17, %v3989_v22  ;;  %v4075_v9 = vadd.f32 %v4072_v17, %v3990_v39  ;;  %v4076_v27 = vadd.f32 %v4072_v17, %v3991_v19 }
0x14df   :  { %v4077_v8 = vmax.f32 %v4073_v11, 0.0  ;;  %v4078_v12 = vmax.f32 %v4074_v32, 0.0  ;;  %v4079_v38 = vmax.f32 %v4075_v9, 0.0  ;;  %v4080_v57 = vmax.f32 %v4076_v27, 0.0 }
0x14e1   :  { %v4081_v25 = vadd.f32 %v4077_v8, %v7823_v63  ;;  %v4082_v10 = vadd.f32 %v4078_v12, %v7825_v48  ;;  %v4083_v24 = vadd.f32 %v4079_v38, %v7827_v0  ;;  %v4084_v62 = vadd.f32 %v4080_v57, %v7829_v33 }
0x14e3   :  { %v4085_v31 = vpack.c.bf16 %v4082_v10, %v4081_v25  ;;  %v4086_v58 = vpack.c.bf16 %v4084_v62, %v4083_v24 }
0x14e5   :  { %6353 = vmatprep.subr.bf16.mxu0 %v4085_v31  ;;  %6361 = vmatprep.subr.bf16.mxu1 %v4085_v31 }
0x14e6   :  { %6354 = vmatpush3.bf16.msra.mxu0 %v4085_v31  ;;  %6362 = vmatpush3.bf16.msra.mxu1 %v4085_v31 }
0x14e7   :  { %6355 = vmatprep.subr.bf16.mxu0 %v4086_v58  ;;  %6363 = vmatprep.subr.bf16.mxu1 %v4086_v58 }
0x14ea   :  { %6356 = vmatpush3.bf16.msra.mxu0 %v4086_v58  ;;  %6364 = vmatpush3.bf16.msra.mxu1 %v4086_v58 }
0x14eb   :  { %6409 = vmatprep.subr.bf16.mxu1 %v4085_v31  ;;  %6369 = vmatprep.subr.bf16.mxu0 %v7838_v36 }
0x14ed   :  { %6366 = vmatmul.mubr.msk.bf16.vlgmr.msra.gmra.mrb[88].mxu1 %vm186_vm1, %v7849_v2  ;;  %6358 = vmatmul.mubr.msk.bf16.vlgmr.msra.gmra.mrb[56].mxu0 %vm186_vm1, %v7856_v3 }
0x14ee   :  { %6410 = vmatpush3.bf16.msra.mxu1 %v4085_v31  ;;  %6413 = vmatprep.mubr.msk.bf16.mxu1 %vm186_vm1, %v7863_v28 }
0x14ef   :  { %6411 = vmatprep.subr.bf16.mxu1 %v4086_v58  ;;  %6370 = vmatpush3.bf16.msra.mxu0 %v7838_v36 }
0x14f0   :  { %6371 = vmatprep.subr.bf16.mxu0 %v7844_v1 }
0x14f2   :  { %6412 = vmatpush3.bf16.msra.mxu1 %v4086_v58 }
0x14f3   :  { %6372 = vmatpush3.bf16.msra.mxu0 %v7844_v1  ;;  %6844 = vmatprep.subr.bf16.mxu1 %v7256_v35 }
0x14f4   :  { %6373 = vmatprep.subr.bf16.mxu0 %v7872_v5 }
0x14f5   :  { %6414 = vmatmul.mubr.msk.bf16.vlgmr.msra.gmra.mrb[92].mxu1 %vm186_vm1, %v7885_v16 }
0x14f6   :  { %6846 = vmatpush3.bf16.msra.mxu1 %v7256_v35 }
0x14f7   :  { %6374 = vmatpush3.bf16.msra.mxu0 %v7872_v5  ;;  %6848 = vmatprep.subr.bf16.mxu1 %v7261_v37 }
0x14f8   :  { %6375 = vmatprep.subr.bf16.mxu0 %v7880_v14 }
0x14fa   :  { %6850 = vmatpush3.bf16.msra.mxu1 %v7261_v37 }
0x14fb   :  { %6376 = vmatpush3.bf16.msra.mxu0 %v7880_v14  ;;  %6852 = vmatprep.subr.bf16.mxu1 %v7272_v40 }
0x14fc   :  { %6377 = vmatprep.subr.bf16.mxu0 %v7896_v15 }
0x14fe   :  { %6854 = vmatpush3.bf16.msra.mxu1 %v7272_v40 }
0x14ff   :  { %6378 = vmatpush3.bf16.msra.mxu0 %v7896_v15  ;;  %6856 = vmatprep.subr.bf16.mxu1 %v7282_v43 }
0x1500   :  { %6379 = vmatprep.subr.bf16.mxu0 %v7905_v21 }
0x1502   :  { %6858 = vmatpush3.bf16.msra.mxu1 %v7282_v43 }
0x1503   :  { %6380 = vmatpush3.bf16.msra.mxu0 %v7905_v21  ;;  %6860 = vmatprep.subr.bf16.mxu1 %v7292_v46 }
0x1504   :  { %6381 = vmatprep.subr.bf16.mxu0 %v7914_v53 }
0x1506   :  { %6862 = vmatpush3.bf16.msra.mxu1 %v7292_v46 }
0x1507   :  { %6382 = vmatpush3.bf16.msra.mxu0 %v7914_v53  ;;  %6864 = vmatprep.subr.bf16.mxu1 %v7302_v49 }
0x1508   :  { %6383 = vmatprep.subr.bf16.mxu0 %v7932_v13 }
0x150a   :  { %6866 = vmatpush3.bf16.msra.mxu1 %v7302_v49 }
0x150b   :  { %6384 = vmatpush3.bf16.msra.mxu0 %v7932_v13  ;;  %6868 = vmatprep.subr.bf16.mxu1 %v7312_v52 }
0x150c   :  { %6389 = vmatprep.subr.bf16.mxu0 %v7939_v29 }
0x150e   :  { %6870 = vmatpush3.bf16.msra.mxu1 %v7312_v52 }
0x150f   :  { %6872 = vmatprep.subr.bf16.mxu1 %v7322_v55 }
0x1512   :  { %6874 = vmatpush3.bf16.msra.mxu1 %v7322_v55 }
0x1513   :  { %6876 = vmatprep.subr.bf16.mxu1 %v7256_v35 }
0x15c0   :  { %v6367_v63 = vpop.f32.mrb[88].mxu1  ;;  %v6359_v48 = vpop.f32.mrb[56].mxu0 }
0x15c1   :  { %v4172_v0 = vpop.f32.mrb[89].mxu1  ;;  %v4121_v33 = vpop.f32.mrb[57].mxu0 }
0x15c2   :  { %v6368_v36 = vpop.f32.mrb[90].mxu1  ;;  %v6360_v1 = vpop.f32.mrb[58].mxu0 }
0x15c3   :  { %v4188_v2 = vpack.c.bf16 %v6368_v36, %v6367_v63  ;;  %v4175_v3 = vpop.f32.mrb[91].mxu1  ;;  %v4137_v28 = vpack.c.bf16 %v6360_v1, %v6359_v48  ;;  %v4124_v5 = vpop.f32.mrb[59].mxu0 }
0x15c4   :  { %v4187_v14 = vpack.c.bf16 %v4175_v3, %v4172_v0  ;;  %v4136_v16 = vpack.c.bf16 %v4124_v5, %v4121_v33 }
0x15c6   :  { %6385 = vmatprep.mubr.bf16.mxu0 %v4187_v14 }
0x15c7   :  { %6386 = vmatmul.mubr.bf16.vlgmr.msra.gmra.mrb[60].mxu0 %v4188_v2 }
0x15c8   :  { %6390 = vmatpush3.bf16.msra.mxu0 %v7939_v29  ;;  %6405 = vmatprep.mubr.bf16.mxu0 %v4136_v16  ;;  %v6415_v15 = vpop.f32.mrb[92].mxu1  ;;  %v8509_v29 = vld [vmem:[#allocation7_spill] sm:$0xff] }
0x15c9   :  { %6391 = vmatprep.subr.bf16.mxu0 %v7945_v45  ;;  %v4321_v21 = vpop.f32.mrb[93].mxu1 }
0x15ca   :  { %v6416_v53 = vpop.f32.mrb[94].mxu1 }
0x15cb   :  { %v4337_v13 = vpack.c.bf16 %v6416_v53, %v6415_v15  ;;  %v4324_v4 = vpop.f32.mrb[95].mxu1 }
0x15cc   :  { %6392 = vmatpush3.bf16.msra.mxu0 %v7945_v45  ;;  %v4336_v42 = vpack.c.bf16 %v4324_v4, %v4321_v21  ;;  %v8510_v45 = vld [vmem:[#allocation8_spill] sm:$0xff] }
0x15cd   :  { %6393 = vmatprep.subr.bf16.mxu0 %v7952_v6 }
0x15d0   :  { %6394 = vmatpush3.bf16.msra.mxu0 %v7952_v6  ;;  %v8511_v6 = vld [vmem:[#allocation9_spill] sm:$0xff] }
0x15d1   :  { %6395 = vmatprep.subr.bf16.mxu0 %v7959_v56 }
0x15d4   :  { %6396 = vmatpush3.bf16.msra.mxu0 %v7959_v56  ;;  %v8512_v56 = vld [vmem:[#allocation10_spill] sm:$0xff] }
0x15d5   :  { %6397 = vmatprep.subr.bf16.mxu0 %v7966_v7 }
0x15d8   :  { %6398 = vmatpush3.bf16.msra.mxu0 %v7966_v7  ;;  %v8513_v7 = vld [vmem:[#allocation11_spill] sm:$0xff] }
0x15d9   :  { %6399 = vmatprep.subr.bf16.mxu0 %v7973_v26 }
0x15dc   :  { %6400 = vmatpush3.bf16.msra.mxu0 %v7973_v26  ;;  %v8514_v26 = vld [vmem:[#allocation12_spill] sm:$0xff] }
0x15dd   :  { %6401 = vmatprep.subr.bf16.mxu0 %v7980_v59 }
0x15e0   :  { %6402 = vmatpush3.bf16.msra.mxu0 %v7980_v59  ;;  %v8515_v59 = vld [vmem:[#allocation13_spill] sm:$0xff] }
0x15e1   :  { %6403 = vmatprep.subr.bf16.mxu0 %v7987_v61 }
0x15e4   :  { %6404 = vmatpush3.bf16.msra.mxu0 %v7987_v61  ;;  %v8516_v61 = vld [vmem:[#allocation14_spill] sm:$0xff] }
0x15e5   :  { %6417 = vmatprep.subr.bf16.mxu0 %v8509_v29 }
0x15e7   :  { %6406 = vmatmul.mubr.bf16.vlgmr.msra.gmra.mrb[60].mxu0 %v4137_v28 }
0x15e8   :  { %6418 = vmatpush3.bf16.msra.mxu0 %v8509_v29  ;;  %6433 = vmatprep.mubr.bf16.mxu0 %v4336_v42 }
0x15e9   :  { %6419 = vmatprep.subr.bf16.mxu0 %v8510_v45 }
0x15ec   :  { %6420 = vmatpush3.bf16.msra.mxu0 %v8510_v45 }
0x15ed   :  { %6421 = vmatprep.subr.bf16.mxu0 %v8511_v6 }
0x15f0   :  { %6422 = vmatpush3.bf16.msra.mxu0 %v8511_v6 }
0x15f1   :  { %6423 = vmatprep.subr.bf16.mxu0 %v8512_v56 }
0x15f4   :  { %6424 = vmatpush3.bf16.msra.mxu0 %v8512_v56 }
0x15f5   :  { %6425 = vmatprep.subr.bf16.mxu0 %v8513_v7 }
0x15f8   :  { %6426 = vmatpush3.bf16.msra.mxu0 %v8513_v7 }
0x15f9   :  { %6427 = vmatprep.subr.bf16.mxu0 %v8514_v26 }
0x15fc   :  { %6428 = vmatpush3.bf16.msra.mxu0 %v8514_v26 }
0x15fd   :  { %6429 = vmatprep.subr.bf16.mxu0 %v8515_v59 }
0x1600   :  { %6430 = vmatpush3.bf16.msra.mxu0 %v8515_v59 }
0x1601   :  { %6431 = vmatprep.subr.bf16.mxu0 %v8516_v61 }
0x1604   :  { %6432 = vmatpush3.bf16.msra.mxu0 %v8516_v61 }
0x1607   :  { %6434 = vmatmul.mubr.bf16.vlgmr.msra.gmra.mrb[60].mxu0 %v4337_v13 }
0x16da   :  { %v8353_v23 = vpop.f32.mrb[60].mxu0 }
0x16db   :  { %v8355_v54 = vpop.f32.mrb[61].mxu0 }
0x16dc   :  { %v8357_v30 = vpop.f32.mrb[62].mxu0  ;;  %6469 = vmatprep.mubr.f32.mxu1 %v8355_v54  ;;  %v4489_v20 = vmul.f32 %v8355_v54, %v8355_v54 }
0x16dd   :  { %v8360_v18 = vpop.f32.mrb[63].mxu0 }
0x16de   :  { %6470 = vmatmul.mubr.f32.vlgmr.msra.gmra.mrb[96].mxu1 %v8360_v18 }
0x16df   :  { %6878 = vmatpush3.bf16.msra.mxu1 %v7256_v35  ;;  %6472 = vmatprep.mubr.f32.mxu1 %v8353_v23  ;;  %v4490_v35 = vmul.f32 %v8360_v18, %v8360_v18 }
0x16e0   :  { %6880 = vmatprep.subr.bf16.mxu1 %v7261_v37 }
0x16e2   :  { %6473 = vmatmul.mubr.f32.gmra.mrb[98].mxu1 %v8357_v30 }
0x16e3   :  { %6882 = vmatpush3.bf16.msra.mxu1 %v7261_v37  ;;  %6507 = vmatprep.mubr.f32.mxu1 %v4489_v20  ;;  %v4491_v37 = vmul.f32 %v8353_v23, %v8353_v23 }
0x16e4   :  { %6884 = vmatprep.subr.bf16.mxu1 %v7272_v40 }
0x16e7   :  { %6886 = vmatpush3.bf16.msra.mxu1 %v7272_v40  ;;  %v4492_v40 = vmul.f32 %v8357_v30, %v8357_v30 }
0x16e8   :  { %6888 = vmatprep.subr.bf16.mxu1 %v7282_v43 }
0x16eb   :  { %6890 = vmatpush3.bf16.msra.mxu1 %v7282_v43 }
0x16ec   :  { %6892 = vmatprep.subr.bf16.mxu1 %v7292_v46 }
0x16ef   :  { %6894 = vmatpush3.bf16.msra.mxu1 %v7292_v46 }
0x16f0   :  { %6896 = vmatprep.subr.bf16.mxu1 %v7302_v49 }
0x16f3   :  { %6898 = vmatpush3.bf16.msra.mxu1 %v7302_v49 }
0x16f4   :  { %6900 = vmatprep.subr.bf16.mxu1 %v7312_v52 }
0x16f7   :  { %6902 = vmatpush3.bf16.msra.mxu1 %v7312_v52 }
0x16f8   :  { %6904 = vmatprep.subr.bf16.mxu1 %v7322_v55 }
0x16fb   :  { %6906 = vmatpush3.bf16.msra.mxu1 %v7322_v55 }
0x16fc   :  { %6513 = vmatprep.subr.mxu1 %v8488_v60 }
0x16fe   :  { %6508 = vmatmul.mubr.f32.vlgmr.msra.gmra.mrb[100].mxu1 %v4490_v35 }
0x16ff   :  { %6510 = vmatprep.mubr.f32.mxu1 %v4491_v37  ;;  %6514 = vmatpush3.msra.mxu1 %v8087_v41 }
0x1700   :  { %6518 = vmatprep.subr.mxu1 %v8488_v60 }
0x1702   :  { %6511 = vmatmul.mubr.f32.gmra.mrb[102].mxu1 %v4492_v40 }
0x1703   :  { %6515 = vmatprep.mubr.msk.f32.mxu1 %vm7044_vm2, %v8488_v60 }
0x17b1   :  { %v6471_v43 = vpop.f32.mrb[96].mxu1 }
0x17b2   :  { %v4477_v46 = vsel %vm818_vm3, %v6471_v43, 0.0  ;;  %v4457_v49 = vpop.f32.mrb[97].mxu1 }
0x17b3   :  { %v4476_v52 = vsel %vm818_vm3, %v4457_v49, 0.0 }
0x17b4   :  { %v4478_v55 = vadd.f32 %v4477_v46, %v4476_v52 }
0x17b5   :  { %v6474_v22 = vpop.f32.mrb[98].mxu1 }
0x17b6   :  { %v4467_v39 = vpop.f32.mrb[99].mxu1  ;;  %v4481_v17 = vsel %vm818_vm3, %v6474_v22, 0.0  ;;  %v8518_v22 = vld [vmem:[#allocation4_spill] sm:$0xff] }
0x17b7   :  { %v4479_v19 = vsel %vm818_vm3, %v4467_v39, 0.0  ;;  %v8519_v39 = vld [vmem:[#allocation5_spill] sm:$0xff] }
0x17b8   :  { %v4480_v47 = vadd.f32 %v4479_v19, %v4478_v55  ;;  %v8517_v55 = vld [vmem:[#allocation2_spill] sm:$0xff]  ;;  %v8520_v19 = vld [vmem:[#allocation3_spill] sm:$0xff] }
0x17ba   :  { %v4482_v44 = vadd.f32 %v4481_v17, %v4480_v47 }
0x17bc   :  { %v4483_v11 = vrot.slane %v4482_v44, 4 }
0x17be   :  { %v4484_v32 = vadd.f32 %v4483_v11, %v4482_v44 }
0x17c0   :  { %v4485_v38 = vrot.slane %v4484_v32, 2 }
0x17c2   :  { %v4486_v62 = vadd.f32 %v4485_v38, %v4484_v32 }
0x17c4   :  { %v4487_v48 = vrot.slane %v4486_v62, 1 }
0x17c6   :  { %v4488_v36 = vadd.f32 %v4487_v48, %v4486_v62 }
0x17c8   :  { %v4591_v3 = vmul.f32 0.001953125, %v4488_v36 }
0x17ca   :  { %v4593_v14 = vmul.f32 %v4591_v3, %v4591_v3 }
0x17d1   :  { %v6509_v9 = vpop.f32.mrb[100].mxu1 }
0x17d2   :  { %v4579_v27 = vsel %vm818_vm3, %v6509_v9, 0.0  ;;  %v4559_v8 = vpop.f32.mrb[101].mxu1 }
0x17d3   :  { %v4578_v12 = vsel %vm818_vm3, %v4559_v8, 0.0 }
0x17d4   :  { %v4580_v57 = vadd.f32 %v4579_v27, %v4578_v12 }
0x17d5   :  { %v6512_v25 = vpop.f32.mrb[102].mxu1 }
0x17d6   :  { %v4569_v10 = vpop.f32.mrb[103].mxu1  ;;  %v4583_v58 = vsel %vm818_vm3, %v6512_v25, 0.0 }
0x17d7   :  { %v4581_v24 = vsel %vm818_vm3, %v4569_v10, 0.0 }
0x17d8   :  { %v4582_v31 = vadd.f32 %v4581_v24, %v4580_v57 }
0x17da   :  { %v4584_v63 = vadd.f32 %v4583_v58, %v4582_v31 }
0x17dc   :  { %v4585_v0 = vrot.slane %v4584_v63, 4 }
0x17de   :  { %v4586_v33 = vadd.f32 %v4585_v0, %v4584_v63 }
0x17e0   :  { %v4587_v1 = vrot.slane %v4586_v33, 2 }
0x17e2   :  { %v4588_v2 = vadd.f32 %v4587_v1, %v4586_v33 }
0x17e4   :  { %v4589_v28 = vrot.slane %v4588_v2, 1 }
0x17e6   :  { %v4590_v5 = vadd.f32 %v4589_v28, %v4588_v2 }
0x17e8   :  { %v4592_v16 = vmul.f32 0.001953125, %v4590_v5 }
0x17ea   :  { %v4594_v15 = vsub.f32 %v4592_v16, %v4593_v14 }
0x17ec   :  { %v4595_v21 = vadd.f32 1e-05, %v4594_v15 }
0x17ee   :  { %7027 = vrsqrt.f32 %v4595_v21 }
0x17f8   :  { %v7028_v53 = vpop.eup %7027 }
0x17f9   :  { %v4597_v13 = vmul.f32 %v7028_v53, %v8106_v51 }
0x17fb   :  { %v4604_v4 = vrot.slane %v4597_v13, %v7509_v50  ;;  %v4598_v42 = vmul.f32 %v4597_v13, %v4591_v3 }
0x17fd   :  { %6516 = vmatmul.mubr.msk.f32.vlgmr.msra.gmra.mrb[104].mxu1 %vm818_vm3, %v4604_v4  ;;  %v4599_v29 = vsub.f32 %v8112_v34, %v4598_v42 }
0x17fe   :  { %6519 = vmatpush3.msra.mxu1 %v8087_v41  ;;  %6520 = vmatprep.mubr.msk.f32.mxu1 %vm7044_vm2, %v8488_v60 }
0x17ff   :  { %v4689_v45 = vrot.slane %v4599_v29, %v7509_v50 }
0x1801   :  { %6521 = vmatmul.mubr.msk.f32.vlgmr.msra.gmra.mrb[106].mxu1 %vm818_vm3, %v4689_v45 }
0x18d0   :  { %v4673_v6 = vpop.f32.mrb[104].mxu1 }
0x18d1   :  { %v4680_v56 = vrot.slane %v4673_v6, %v7509_v50  ;;  %v6517_v51 = vpop.f32.mrb[105].mxu1 }
0x18d3   :  { %v4681_v7 = vmul.f32 %v4680_v56, %v8355_v54  ;;  %v4682_v26 = vmul.f32 %v4680_v56, %v8360_v18  ;;  %v4683_v59 = vmul.f32 %v8353_v23, %v4680_v56  ;;  %v4684_v34 = vmul.f32 %v8357_v30, %v4680_v56 }
0x18d4   :  { %v4758_v41 = vpop.f32.mrb[106].mxu1 }
0x18d5   :  { %v4765_v61 = vrot.slane %v4758_v41, %v7509_v50  ;;  %v6522_v60 = vpop.f32.mrb[107].mxu1 }
0x18d7   :  { %v4766_v20 = vadd.f32 %v4765_v61, %v4681_v7  ;;  %v4767_v35 = vadd.f32 %v4765_v61, %v4682_v26  ;;  %v4768_v37 = vadd.f32 %v4765_v61, %v4683_v59  ;;  %v4769_v40 = vadd.f32 %v4765_v61, %v4684_v34 }
0x18d9   :  { %v4770_v43 = vmax.f32 %v4766_v20, 0.0  ;;  %v4771_v46 = vmax.f32 %v4767_v35, 0.0  ;;  %v4772_v49 = vmax.f32 %v4768_v37, 0.0  ;;  %v4773_v52 = vmax.f32 %v4769_v40, 0.0 }
0x18db   :  { %v4774_v54 = vadd.f32 %v4770_v43, %v8517_v55  ;;  %v4775_v18 = vadd.f32 %v4771_v46, %v8518_v22  ;;  %v4776_v23 = vadd.f32 %v4772_v49, %v8519_v39  ;;  %v4777_v30 = vadd.f32 %v4773_v52, %v8520_v19 }
0x18dd   :  { %4778 = vst [vmem:[%s8444_s12] sm:$0xff] %v4774_v54  ;;  %4779 = vst [vmem:[%s8444_s12 + $0x8] sm:$0xff] %v4775_v18 }
0x18de   :  { %4780 = vst [vmem:[%s8444_s12 + $0x10] sm:$0xff] %v4776_v23  ;;  %4781 = vst [vmem:[%s8444_s12 + $0x18] sm:$0xff] %v4777_v30 }

</bundles_post_ra>
